<compile_context>
chip_gen: v7x
topology: tpu7x:2x2x1
jax: 0.10.0
libtpu: 0.0.40
codegen_flags: <defaults>
</compile_context>

<pallas_src>
import numpy as np
import jax
import jax.numpy as jnp
from jax import lax
from jax.experimental import pallas as pl
from jax.experimental.pallas import tpu as pltpu


def _silu(x):
    return x * jax.nn.sigmoid(x)


def egcl_kernel(rowT_ref, row_ref, col_ref, h_ref, coord_ref,
                we1s_ref, we1d_ref, we1r_ref, be1_ref,
                we2_ref, be2_ref,
                wa1_ref, ba1_ref, wa2t_ref, ba2_ref,
                wc1_ref, bc1_ref, wc2t_ref,
                wn1h_ref, wn1a_ref, bn1_ref, wn2_ref, bn2_ref,
                gamma_ref, beta_ref,
                h_out_ref, coord_out_ref,
                gsrc_ref, gdst_ref, acch_ref, accc_ref):
    f32 = jnp.float32
    bf16 = jnp.bfloat16
    N = h_ref.shape[0]
    TE = row_ref.shape[0]
    H = wn1a_ref.shape[0]          # true hidden width (un-padded)
    eb = pl.program_id(0)

    # ---------------- first edge block: node-level precompute + accumulator init
    @pl.when(eb == 0)
    def _init():
        h = h_ref[...]                                                 # [N, F]
        # edge-MLP layer-1 hoisted to node level (runs once per call -> f32)
        hs = jnp.dot(h, we1s_ref[...], preferred_element_type=f32)    # [N, Hp]
        hd = jnp.dot(h, we1d_ref[...], preferred_element_type=f32)    # [N, Hp]
        gsrc_ref[...] = hs.astype(bf16)        # lane-dense 128-padded slab [R3]
        gdst_ref[...] = hd.astype(bf16)
        acch_ref[...] = jnp.zeros_like(acch_ref)
        accc_ref[...] = jnp.zeros_like(accc_ref)

    # ---------------- per-edge-block work
    row = row_ref[...]                  # [TE, 1] int32; padded edges are -1
    col = col_ref[...]                  # [TE, 1]
    rowT = rowT_ref[...]                # [1, TE]

    # gather one-hots (VPU iota-compare); padded edge -> all-zero row
    ids_e = lax.broadcasted_iota(jnp.int32, (TE, N), 1)
    m_row = ids_e == row
    m_col = ids_e == col
    g_row_bf = m_row.astype(bf16)
    g_col_bf = m_col.astype(bf16)
    g_row_f = m_row.astype(f32)
    g_col_f = m_col.astype(f32)

    # bf16 gathers of the hoisted edge-MLP layer-1 parts [R2]
    m_src = jnp.dot(g_row_bf, gsrc_ref[...], preferred_element_type=f32)   # [TE, Hp]
    m_dst = jnp.dot(g_col_bf, gdst_ref[...], preferred_element_type=f32)   # [TE, Hp]
    # coordinates gathered in f32 (cancellation-sensitive) [RC]
    coord = coord_ref[...]                                                  # [N, 3]
    c_row = jnp.dot(g_row_f, coord, preferred_element_type=f32)            # [TE, 3]
    c_col = jnp.dot(g_col_f, coord, preferred_element_type=f32)

    # coord2radial (normalize=True); single EUP rsqrt [R5]
    coord_diff = c_row - c_col
    radial = jnp.sum(coord_diff * coord_diff, axis=-1, keepdims=True)       # [TE, 1]
    coord_diff = coord_diff * lax.rsqrt(radial + 1e-15)

    # edge_mlp: layer-1 finished per edge, layer-2 bf16 x bf16 on MXU [R2]
    m = _silu(m_src + m_dst + radial * we1r_ref[...] + be1_ref[...])        # [TE, Hp]
    m = _silu(jnp.dot(m.astype(bf16), we2_ref[...],
                      preferred_element_type=f32) + be2_ref[...])           # [TE, Hp]
    m_bf = m.astype(bf16)

    # attention MLP; 1-column layer-2 as VPU multiply + lane reduction
    a = _silu(jnp.dot(m_bf, wa1_ref[...], preferred_element_type=f32) + ba1_ref[...])
    att = jax.nn.sigmoid(jnp.sum(a * wa2t_ref[...], axis=-1, keepdims=True)
                         + ba2_ref[...])                                    # [TE, 1]
    edge_feat = m * att                                                     # [TE, Hp]
    ef_bf = edge_feat.astype(bf16)

    # coord_mlp (tanh=False); 1-column layer-2 as VPU multiply + reduction
    c1 = _silu(jnp.dot(ef_bf, wc1_ref[...], preferred_element_type=f32) + bc1_ref[...])
    t = jnp.sum(c1 * wc2t_ref[...], axis=-1, keepdims=True)                 # [TE, 1]
    trans = coord_diff * t                                                  # [TE, 3]

    # scatter one-hot built transposed directly -> plain jnp.dot, no XLU transpose [R4]
    ids_n = lax.broadcasted_iota(jnp.int32, (N, TE), 0)
    mT = ids_n == rowT                                                      # [N, TE]
    gT_bf = mT.astype(bf16)
    gT_f = mT.astype(f32)

    # wide bf16 scatter for edge features (f32 accumulation) [R2][R3]
    acch_ref[...] += jnp.dot(gT_bf, ef_bf, preferred_element_type=f32)      # [N, Hp]
    # tiny f32 scatter for coord translation + edge count [RC]
    payload_c = jnp.concatenate([trans, jnp.ones((TE, 1), f32)], axis=-1)   # [TE, 4]
    accc_ref[...] += jnp.dot(gT_f, payload_c, preferred_element_type=f32)   # [N, 4]

    # ---------------- last edge block: coord update + node MLP + LayerNorm
    @pl.when(eb == pl.num_programs(0) - 1)
    def _finish():
        accc = accc_ref[...]
        agg_c = accc[:, :3]
        cnt = accc[:, 3:4]
        # coords_agg == 'mean' (runs once -> exact divide) [RC]
        coord_out_ref[...] = coord_ref[...] + agg_c / jnp.maximum(cnt, 1.0)

        h = h_ref[...]
        agg_h = acch_ref[...][:, :H]
        # node_mlp: Linear(F+H -> H) decomposed, SiLU, Linear(H -> F); once per call -> f32
        n1 = _silu(jnp.dot(h, wn1h_ref[...], preferred_element_type=f32)
                   + jnp.dot(agg_h, wn1a_ref[...], preferred_element_type=f32)
                   + bn1_ref[...])
        out = jnp.dot(n1, wn2_ref[...], preferred_element_type=f32) + bn2_ref[...]
        out = h + out                       # residual (output_nf == input_nf)

        # LayerNorm(output_nf), eps = 1e-5 (PyTorch default)
        mu = jnp.mean(out, axis=-1, keepdims=True)
        var = jnp.mean((out - mu) ** 2, axis=-1, keepdims=True)
        out = (out - mu) * lax.rsqrt(var + 1e-5)
        h_out_ref[...] = out * gamma_ref[...] + beta_ref[...]


def _pad2(a, rows, cols):
    return jnp.pad(a, ((0, rows - a.shape[0]), (0, cols - a.shape[1])))


def egcl_forward(h, coord, row, col, params, *, edge_tile=128):
    # edge_tile: 128 for v5e (4x128 MXU); prefer 256 on v6e/v7x [R1]
    N, F = h.shape
    H = params['we2'].shape[0]
    A = params['wa1'].shape[1]
    Hp = ((H + 127) // 128) * 128              # 128-lane padded hidden width [R3]
    E = int(row.shape[0])

    # pad the edge list to a multiple of the edge tile; padded edges use index -1
    # -> their one-hot rows/cols are all-zero, so they contribute nothing.
    n_blk = int(pl.cdiv(E, edge_tile))
    E_pad = n_blk * edge_tile
    pad = E_pad - E
    row = row.astype(jnp.int32)
    col = col.astype(jnp.int32)
    if pad:
        fill = jnp.full((pad,), -1, jnp.int32)
        row = jnp.concatenate([row, fill])
        col = jnp.concatenate([col, fill])
    row2 = row.reshape(E_pad, 1)
    col2 = col.reshape(E_pad, 1)
    rowT = row.reshape(1, E_pad)               # pre-transposed for the scatter one-hot [R4]

    bf16 = jnp.bfloat16
    p = params
    # zero-padded weights so all hot-path slabs are 128-lane dense [R3];
    # bf16 only where used as hot-path MXU operands [R2]
    weights = (
        _pad2(p['we1s'], F, Hp),                       # we1s  [F, Hp]  f32
        _pad2(p['we1d'], F, Hp),                       # we1d  [F, Hp]  f32
        _pad2(p['we1r'], 1, Hp),                       # we1r  [1, Hp]  f32
        _pad2(p['be1'], 1, Hp),                        # be1   [1, Hp]  f32
        _pad2(p['we2'], Hp, Hp).astype(bf16),          # we2   [Hp,Hp]  bf16
        _pad2(p['be2'], 1, Hp),                        # be2   [1, Hp]  f32
        _pad2(p['wa1'], Hp, A).astype(bf16),           # wa1   [Hp, A]  bf16
        p['ba1'],                                      # ba1   [1, A]
        p['wa2'].T,                                    # wa2t  [1, A]
        p['ba2'],                                      # ba2   [1, 1]
        _pad2(p['wc1'], Hp, H).astype(bf16),           # wc1   [Hp, H]  bf16
        p['bc1'],                                      # bc1   [1, H]
        p['wc2'].T,                                    # wc2t  [1, H]
        p['wn1h'], p['wn1a'], p['bn1'],                # node MLP (finish phase, f32)
        p['wn2'], p['bn2'],
        p['gamma'], p['beta'],
    )

    edge_spec_T = pl.BlockSpec((1, edge_tile), lambda e: (0, e))
    edge_spec = pl.BlockSpec((edge_tile, 1), lambda e: (e, 0))
    const2d = lambda shape: pl.BlockSpec(shape, lambda e: (0, 0))

    in_specs = ([edge_spec_T, edge_spec, edge_spec, const2d((N, F)), const2d((N, 3))]
                + [const2d(tuple(w.shape)) for w in weights])

    # rough cost hint for the surrounding XLA schedule [R8]
    flops = int(
        2 * 2 * N * F * Hp                                        # hs/hd precompute
        + E_pad * (2 * N * (2 * Hp + 6)                            # gathers
                   + 2 * (Hp * Hp + Hp * A + Hp * H)               # edge/att/coord MLPs
                   + 2 * N * (Hp + 4))                             # scatters
        + 2 * (N * F * H + N * H * H + N * H * F))                 # node MLP
    transcendentals = int(E_pad * (2 * Hp + A + H + 4) + N * (H + 2 * F))
    bytes_accessed = int(sum(int(x.size) * x.dtype.itemsize
                             for x in (row2, col2, rowT, h, coord) + weights)
                         + (N * F + N * 3) * 4)

    h_out, coord_out = pl.pallas_call(
        egcl_kernel,
        out_shape=(jax.ShapeDtypeStruct((N, F), jnp.float32),
                   jax.ShapeDtypeStruct((N, 3), jnp.float32)),
        grid=(n_blk,),
        in_specs=in_specs,
        out_specs=(const2d((N, F)), const2d((N, 3))),
        scratch_shapes=[pltpu.VMEM((N, Hp), jnp.bfloat16),    # hoisted src parts [R3]
                        pltpu.VMEM((N, Hp), jnp.bfloat16),    # hoisted dst parts
                        pltpu.VMEM((N, Hp), jnp.float32),     # agg_h accumulator
                        pltpu.VMEM((N, 4), jnp.float32)],     # [agg_coord | count] (f32) [RC]
        compiler_params=pltpu.CompilerParams(
            dimension_semantics=("arbitrary",),               # accumulates across edge blocks
            vmem_limit_bytes=32 * 1024 * 1024),
        cost_estimate=pl.CostEstimate(flops=flops,
                                      transcendentals=transcendentals,
                                      bytes_accessed=bytes_accessed),
    )(rowT, row2, col2, h, coord, *weights)
    return h_out, coord_out


def egcl_reference(h, coord, row1d, col1d, p):
    # pure-JAX f32 reference replicating the PyTorch forward
    h_row, h_col = h[row1d], h[col1d]
    coord_diff = coord[row1d] - coord[col1d]
    radial = jnp.sum(coord_diff ** 2, axis=-1, keepdims=True)
    coord_diff = coord_diff / (jnp.sqrt(radial) + 1e-8)
    we1 = jnp.concatenate([p['we1s'], p['we1d'], p['we1r']], axis=0)
    edge_in = jnp.concatenate([h_row, h_col, radial], axis=-1)
    m = _silu(edge_in @ we1 + p['be1'])
    m = _silu(m @ p['we2'] + p['be2'])
    att = jax.nn.sigmoid(_silu(m @ p['wa1'] + p['ba1']) @ p['wa2'] + p['ba2'])
    edge_feat = m * att
    t = _silu(edge_feat @ p['wc1'] + p['bc1']) @ p['wc2']
    trans = coord_diff * t
    N = h.shape[0]
    E = row1d.shape[0]
    agg_c = jnp.zeros((N, 3), jnp.float32).at[row1d].add(trans)
    cnt = jnp.zeros((N, 1), jnp.float32).at[row1d].add(jnp.ones((E, 1), jnp.float32))
    coord_out = coord + agg_c / jnp.maximum(cnt, 1.0)
    agg_h = jnp.zeros((N, edge_feat.shape[1]), jnp.float32).at[row1d].add(edge_feat)
    wn1 = jnp.concatenate([p['wn1h'], p['wn1a']], axis=0)
    n_in = jnp.concatenate([h, agg_h], axis=-1)
    out = _silu(n_in @ wn1 + p['bn1']) @ p['wn2'] + p['bn2']
    out = h + out
    mu = out.mean(-1, keepdims=True)
    var = ((out - mu) ** 2).mean(-1, keepdims=True)
    out = (out - mu) / jnp.sqrt(var + 1e-5) * p['gamma'] + p['beta']
    return out, coord_out


def make_params(key, input_nf, hidden_nf, output_nf):
    ks = jax.random.split(key, 20)
    F, H, O = input_nf, hidden_nf, output_nf

    def lin(k, fan_in, shape, scale=None):
        s = scale if scale is not None else 1.0 / np.sqrt(fan_in)
        return jax.random.normal(k, shape, jnp.float32) * s

    e_in = 2 * F + 1     # edge_mlp layer-1 full fan-in (matches nn.Linear init scale)
    n_in = F + H         # node_mlp layer-1 full fan-in
    p = {
        # edge_mlp Linear1 split: [src F | dst F | radial 1] -> H
        'we1s': lin(ks[0], e_in, (F, H)), 'we1d': lin(ks[1], e_in, (F, H)),
        'we1r': lin(ks[2], e_in, (1, H)),
        'be1': jax.random.normal(ks[3], (1, H), jnp.float32) * 0.01,
        'we2': lin(ks[4], H, (H, H)),
        'be2': jax.random.normal(ks[5], (1, H), jnp.float32) * 0.01,
        # attention MLP
        'wa1': lin(ks[6], H, (H, H // 2)),
        'ba1': jax.random.normal(ks[7], (1, H // 2), jnp.float32) * 0.01,
        'wa2': lin(ks[8], H // 2, (H // 2, 1)),
        'ba2': jax.random.normal(ks[9], (1, 1), jnp.float32) * 0.01,
        # coord_mlp (last layer xavier-uniform gain=0.001 -> tiny, no bias)
        'wc1': lin(ks[10], H, (H, H)),
        'bc1': jax.random.normal(ks[11], (1, H), jnp.float32) * 0.01,
        'wc2': lin(ks[12], H, (H, 1), scale=0.001),
        # node_mlp Linear1 split: [h F | agg H] -> H
        'wn1h': lin(ks[13], n_in, (F, H)), 'wn1a': lin(ks[14], n_in, (H, H)),
        'bn1': jax.random.normal(ks[15], (1, H), jnp.float32) * 0.01,
        'wn2': lin(ks[16], H, (H, O)),
        'bn2': jax.random.normal(ks[17], (1, O), jnp.float32) * 0.01,
        # LayerNorm affine
        'gamma': 1.0 + jax.random.normal(ks[18], (1, O), jnp.float32) * 0.05,
        'beta': jax.random.normal(ks[19], (1, O), jnp.float32) * 0.05,
    }
    return p


if __name__ == "__main__":
    # small shapes: N=16 nodes, fully-connected E=N*(N-1)=240 (padded to 256,
    # two edge blocks of 128), input_nf = output_nf = hidden_nf = 32, coords in R^3.
    N, F, H = 16, 32, 32
    key = jax.random.PRNGKey(0)
    kh, kc, kp = jax.random.split(key, 3)

    h = jax.random.normal(kh, (N, F), jnp.float32)
    coord = jax.random.normal(kc, (N, 3), jnp.float32)

    rr, cc = np.meshgrid(np.arange(N), np.arange(N), indexing='ij')
    sel = rr != cc
    row1d = jnp.asarray(rr[sel], jnp.int32)   # [E]
    col1d = jnp.asarray(cc[sel], jnp.int32)   # [E]

    params = make_params(kp, F, H, F)

    h_out, coord_out = egcl_forward(h, coord, row1d, col1d, params, edge_tile=128)
    jax.block_until_ready((h_out, coord_out))

    h_exp, coord_exp = egcl_reference(h, coord, row1d, col1d, params)
    # bf16 operands on the hot-path matmuls (per perf guidance) -> compare at
    # 5e-2 against the pure-f32 reference.
    np.testing.assert_allclose(np.asarray(h_out), np.asarray(h_exp),
                               atol=5e-2, rtol=5e-2)
    np.testing.assert_allclose(np.asarray(coord_out), np.asarray(coord_exp),
                               atol=5e-2, rtol=5e-2)

    print("KERNEL_OK")
</pallas_src>

<mosaic_0001>
module attributes {stable_mosaic.version = 11 : i64} {
  func.func @egcl_kernel(%arg0: i32, %arg1: memref<1x128xi32, #tpu.memory_space<vmem>>, %arg2: memref<128x1xi32, #tpu.memory_space<vmem>>, %arg3: memref<128x1xi32, #tpu.memory_space<vmem>>, %arg4: memref<16x32xf32, #tpu.memory_space<vmem>>, %arg5: memref<16x3xf32, #tpu.memory_space<vmem>>, %arg6: memref<32x128xf32, #tpu.memory_space<vmem>>, %arg7: memref<32x128xf32, #tpu.memory_space<vmem>>, %arg8: memref<1x128xf32, #tpu.memory_space<vmem>>, %arg9: memref<1x128xf32, #tpu.memory_space<vmem>>, %arg10: memref<128x128xbf16, #tpu.memory_space<vmem>>, %arg11: memref<1x128xf32, #tpu.memory_space<vmem>>, %arg12: memref<128x16xbf16, #tpu.memory_space<vmem>>, %arg13: memref<1x16xf32, #tpu.memory_space<vmem>>, %arg14: memref<1x16xf32, #tpu.memory_space<vmem>>, %arg15: memref<1x1xf32, #tpu.memory_space<vmem>>, %arg16: memref<128x32xbf16, #tpu.memory_space<vmem>>, %arg17: memref<1x32xf32, #tpu.memory_space<vmem>>, %arg18: memref<1x32xf32, #tpu.memory_space<vmem>>, %arg19: memref<32x32xf32, #tpu.memory_space<vmem>>, %arg20: memref<32x32xf32, #tpu.memory_space<vmem>>, %arg21: memref<1x32xf32, #tpu.memory_space<vmem>>, %arg22: memref<32x32xf32, #tpu.memory_space<vmem>>, %arg23: memref<1x32xf32, #tpu.memory_space<vmem>>, %arg24: memref<1x32xf32, #tpu.memory_space<vmem>>, %arg25: memref<1x32xf32, #tpu.memory_space<vmem>>, %arg26: memref<16x32xf32, #tpu.memory_space<vmem>>, %arg27: memref<16x3xf32, #tpu.memory_space<vmem>>, %arg28: memref<16x128xbf16, #tpu.memory_space<vmem>>, %arg29: memref<16x128xbf16, #tpu.memory_space<vmem>>, %arg30: memref<16x128xf32, #tpu.memory_space<vmem>>, %arg31: memref<16x4xf32, #tpu.memory_space<vmem>>) attributes {dimension_semantics = [#tpu.dimension_semantics<arbitrary>], iteration_bounds = array<i64: 2>, scalar_prefetch = 0 : i64, scratch_operands = 4 : i64, tpu.core_type = #tpu.core_type<tc>, window_params = [{transform_indices = @transform_0, window_bounds = array<i64: 1, 128>}, {transform_indices = @transform_1, window_bounds = array<i64: 128, 1>}, {transform_indices = @transform_2, window_bounds = array<i64: 128, 1>}, {pipeline_mode = #tpu.pipeline_mode<synchronous>, transform_indices = @transform_3, window_bounds = array<i64: 16, 32>}, {pipeline_mode = #tpu.pipeline_mode<synchronous>, transform_indices = @transform_4, window_bounds = array<i64: 16, 3>}, {pipeline_mode = #tpu.pipeline_mode<synchronous>, transform_indices = @transform_5, window_bounds = array<i64: 32, 128>}, {pipeline_mode = #tpu.pipeline_mode<synchronous>, transform_indices = @transform_6, window_bounds = array<i64: 32, 128>}, {pipeline_mode = #tpu.pipeline_mode<synchronous>, transform_indices = @transform_7, window_bounds = array<i64: 1, 128>}, {pipeline_mode = #tpu.pipeline_mode<synchronous>, transform_indices = @transform_8, window_bounds = array<i64: 1, 128>}, {pipeline_mode = #tpu.pipeline_mode<synchronous>, transform_indices = @transform_9, window_bounds = array<i64: 128, 128>}, {pipeline_mode = #tpu.pipeline_mode<synchronous>, transform_indices = @transform_10, window_bounds = array<i64: 1, 128>}, {pipeline_mode = #tpu.pipeline_mode<synchronous>, transform_indices = @transform_11, window_bounds = array<i64: 128, 16>}, {pipeline_mode = #tpu.pipeline_mode<synchronous>, transform_indices = @transform_12, window_bounds = array<i64: 1, 16>}, {pipeline_mode = #tpu.pipeline_mode<synchronous>, transform_indices = @transform_13, window_bounds = array<i64: 1, 16>}, {pipeline_mode = #tpu.pipeline_mode<synchronous>, transform_indices = @transform_14, window_bounds = array<i64: 1, 1>}, {pipeline_mode = #tpu.pipeline_mode<synchronous>, transform_indices = @transform_15, window_bounds = array<i64: 128, 32>}, {pipeline_mode = #tpu.pipeline_mode<synchronous>, transform_indices = @transform_16, window_bounds = array<i64: 1, 32>}, {pipeline_mode = #tpu.pipeline_mode<synchronous>, transform_indices = @transform_17, window_bounds = array<i64: 1, 32>}, {pipeline_mode = #tpu.pipeline_mode<synchronous>, transform_indices = @transform_18, window_bounds = array<i64: 32, 32>}, {pipeline_mode = #tpu.pipeline_mode<synchronous>, transform_indices = @transform_19, window_bounds = array<i64: 32, 32>}, {pipeline_mode = #tpu.pipeline_mode<synchronous>, transform_indices = @transform_20, window_bounds = array<i64: 1, 32>}, {pipeline_mode = #tpu.pipeline_mode<synchronous>, transform_indices = @transform_21, window_bounds = array<i64: 32, 32>}, {pipeline_mode = #tpu.pipeline_mode<synchronous>, transform_indices = @transform_22, window_bounds = array<i64: 1, 32>}, {pipeline_mode = #tpu.pipeline_mode<synchronous>, transform_indices = @transform_23, window_bounds = array<i64: 1, 32>}, {pipeline_mode = #tpu.pipeline_mode<synchronous>, transform_indices = @transform_24, window_bounds = array<i64: 1, 32>}, {pipeline_mode = #tpu.pipeline_mode<synchronous>, transform_indices = @transform_25, window_bounds = array<i64: 16, 32>}, {pipeline_mode = #tpu.pipeline_mode<synchronous>, transform_indices = @transform_26, window_bounds = array<i64: 16, 3>}]} {
    %c0_i32 = arith.constant 0 : i32
    %0 = arith.cmpi eq, %arg0, %c0_i32 : i32
    %1 = arith.extui %0 : i1 to i32
    %c0_i32_0 = arith.constant 0 : i32
    %2 = arith.cmpi ne, %1, %c0_i32_0 : i32
    scf.if %2 {
      %c0_61 = arith.constant 0 : index
      %c0_62 = arith.constant 0 : index
      %131 = vector.load %arg4[%c0_61, %c0_62] : memref<16x32xf32, #tpu.memory_space<vmem>>, vector<16x32xf32>
      %c0_63 = arith.constant 0 : index
      %c0_64 = arith.constant 0 : index
      %132 = vector.load %arg6[%c0_63, %c0_64] : memref<32x128xf32, #tpu.memory_space<vmem>>, vector<32x128xf32>
      %cst_65 = arith.constant dense<0.000000e+00> : vector<16x128xf32>
      %133 = tpu.matmul %131, %132, %cst_65 {dimension_numbers = #tpu.dot_dimension_numbers<[1], [0], [0], [1], [0, 0, 1, 1], [], []>} : vector<16x32xf32>, vector<32x128xf32>, vector<16x128xf32> -> vector<16x128xf32>
      %c0_66 = arith.constant 0 : index
      %c0_67 = arith.constant 0 : index
      %134 = vector.load %arg7[%c0_66, %c0_67] : memref<32x128xf32, #tpu.memory_space<vmem>>, vector<32x128xf32>
      %cst_68 = arith.constant dense<0.000000e+00> : vector<16x128xf32>
      %135 = tpu.matmul %131, %134, %cst_68 {dimension_numbers = #tpu.dot_dimension_numbers<[1], [0], [0], [1], [0, 0, 1, 1], [], []>} : vector<16x32xf32>, vector<32x128xf32>, vector<16x128xf32> -> vector<16x128xf32>
      %136 = arith.truncf %133 : vector<16x128xf32> to vector<16x128xbf16>
      %c0_69 = arith.constant 0 : index
      %c0_70 = arith.constant 0 : index
      %137 = vector.load %arg28[%c0_69, %c0_70] : memref<16x128xbf16, #tpu.memory_space<vmem>>, vector<16x128xbf16>
      tpu.vector_store %arg28[%c0_69, %c0_70], %136 {strides = array<i32>} : memref<16x128xbf16, #tpu.memory_space<vmem>>, vector<16x128xbf16>,
      %138 = arith.truncf %135 : vector<16x128xf32> to vector<16x128xbf16>
      %c0_71 = arith.constant 0 : index
      %c0_72 = arith.constant 0 : index
      %139 = vector.load %arg29[%c0_71, %c0_72] : memref<16x128xbf16, #tpu.memory_space<vmem>>, vector<16x128xbf16>
      tpu.vector_store %arg29[%c0_71, %c0_72], %138 {strides = array<i32>} : memref<16x128xbf16, #tpu.memory_space<vmem>>, vector<16x128xbf16>,
      %cst_73 = arith.constant 0.000000e+00 : f32
      %140 = vector.broadcast %cst_73 : f32 to vector<16x128xf32>
      %c0_74 = arith.constant 0 : index
      %c0_75 = arith.constant 0 : index
      %141 = vector.load %arg30[%c0_74, %c0_75] : memref<16x128xf32, #tpu.memory_space<vmem>>, vector<16x128xf32>
      tpu.vector_store %arg30[%c0_74, %c0_75], %140 {strides = array<i32>} : memref<16x128xf32, #tpu.memory_space<vmem>>, vector<16x128xf32>,
      %cst_76 = arith.constant 0.000000e+00 : f32
      %142 = vector.broadcast %cst_76 : f32 to vector<16x4xf32>
      %c0_77 = arith.constant 0 : index
      %c0_78 = arith.constant 0 : index
      %143 = vector.load %arg31[%c0_77, %c0_78] : memref<16x4xf32, #tpu.memory_space<vmem>>, vector<16x4xf32>
      tpu.vector_store %arg31[%c0_77, %c0_78], %142 {strides = array<i32>} : memref<16x4xf32, #tpu.memory_space<vmem>>, vector<16x4xf32>,
    } else {
    }
    %c0 = arith.constant 0 : index
    %c0_1 = arith.constant 0 : index
    %3 = vector.load %arg2[%c0, %c0_1] : memref<128x1xi32, #tpu.memory_space<vmem>>, vector<128x1xi32>
    %c0_2 = arith.constant 0 : index
    %c0_3 = arith.constant 0 : index
    %4 = vector.load %arg3[%c0_2, %c0_3] : memref<128x1xi32, #tpu.memory_space<vmem>>, vector<128x1xi32>
    %c0_4 = arith.constant 0 : index
    %c0_5 = arith.constant 0 : index
    %5 = vector.load %arg1[%c0_4, %c0_5] : memref<1x128xi32, #tpu.memory_space<vmem>>, vector<1x128xi32>
    %6 = tpu.iota {dimensions = array<i32: 1>} : vector<128x16xi32>
    %7 = vector.broadcast %3 : vector<128x1xi32> to vector<128x16xi32>
    %8 = arith.cmpi eq, %6, %7 : vector<128x16xi32>
    %9 = vector.broadcast %4 : vector<128x1xi32> to vector<128x16xi32>
    %10 = arith.cmpi eq, %6, %9 : vector<128x16xi32>
    %11 = arith.extui %8 : vector<128x16xi1> to vector<128x16xi32>
    %12 = arith.sitofp %11 : vector<128x16xi32> to vector<128x16xf32>
    %13 = arith.truncf %12 : vector<128x16xf32> to vector<128x16xbf16>
    %14 = arith.extui %10 : vector<128x16xi1> to vector<128x16xi32>
    %15 = arith.sitofp %14 : vector<128x16xi32> to vector<128x16xf32>
    %16 = arith.truncf %15 : vector<128x16xf32> to vector<128x16xbf16>
    %17 = arith.extui %8 : vector<128x16xi1> to vector<128x16xi32>
    %18 = arith.sitofp %17 : vector<128x16xi32> to vector<128x16xf32>
    %19 = arith.extui %10 : vector<128x16xi1> to vector<128x16xi32>
    %20 = arith.sitofp %19 : vector<128x16xi32> to vector<128x16xf32>
    %c0_6 = arith.constant 0 : index
    %c0_7 = arith.constant 0 : index
    %21 = vector.load %arg28[%c0_6, %c0_7] : memref<16x128xbf16, #tpu.memory_space<vmem>>, vector<16x128xbf16>
    %cst = arith.constant dense<0.000000e+00> : vector<128x128xf32>
    %22 = tpu.matmul %13, %21, %cst {dimension_numbers = #tpu.dot_dimension_numbers<[1], [0], [0], [1], [0, 0, 1, 1], [], []>} : vector<128x16xbf16>, vector<16x128xbf16>, vector<128x128xf32> -> vector<128x128xf32>
    %c0_8 = arith.constant 0 : index
    %c0_9 = arith.constant 0 : index
    %23 = vector.load %arg29[%c0_8, %c0_9] : memref<16x128xbf16, #tpu.memory_space<vmem>>, vector<16x128xbf16>
    %cst_10 = arith.constant dense<0.000000e+00> : vector<128x128xf32>
    %24 = tpu.matmul %16, %23, %cst_10 {dimension_numbers = #tpu.dot_dimension_numbers<[1], [0], [0], [1], [0, 0, 1, 1], [], []>} : vector<128x16xbf16>, vector<16x128xbf16>, vector<128x128xf32> -> vector<128x128xf32>
    %c0_11 = arith.constant 0 : index
    %c0_12 = arith.constant 0 : index
    %25 = vector.load %arg5[%c0_11, %c0_12] : memref<16x3xf32, #tpu.memory_space<vmem>>, vector<16x3xf32>
    %cst_13 = arith.constant dense<0.000000e+00> : vector<128x3xf32>
    %26 = tpu.matmul %18, %25, %cst_13 {dimension_numbers = #tpu.dot_dimension_numbers<[1], [0], [0], [1], [0, 0, 1, 1], [], []>} : vector<128x16xf32>, vector<16x3xf32>, vector<128x3xf32> -> vector<128x3xf32>
    %cst_14 = arith.constant dense<0.000000e+00> : vector<128x3xf32>
    %27 = tpu.matmul %20, %25, %cst_14 {dimension_numbers = #tpu.dot_dimension_numbers<[1], [0], [0], [1], [0, 0, 1, 1], [], []>} : vector<128x16xf32>, vector<16x3xf32>, vector<128x3xf32> -> vector<128x3xf32>
    %28 = arith.subf %26, %27 : vector<128x3xf32>
    %29 = arith.mulf %28, %28 : vector<128x3xf32>
    %cst_15 = arith.constant dense<0.000000e+00> : vector<128xf32>
    %30 = vector.multi_reduction <add>, %29, %cst_15 [1] : vector<128x3xf32> to vector<128xf32>
    %31 = vector.shape_cast %30 : vector<128xf32> to vector<128x1xf32>
    %cst_16 = arith.constant 1.000000e-15 : f32
    %32 = vector.broadcast %cst_16 : f32 to vector<128x1xf32>
    %33 = arith.addf %31, %32 : vector<128x1xf32>
    %34 = math.rsqrt %33 : vector<128x1xf32>
    %35 = vector.broadcast %34 : vector<128x1xf32> to vector<128x3xf32>
    %36 = arith.mulf %28, %35 : vector<128x3xf32>
    %37 = arith.addf %22, %24 : vector<128x128xf32>
    %c0_17 = arith.constant 0 : index
    %c0_18 = arith.constant 0 : index
    %38 = vector.load %arg8[%c0_17, %c0_18] : memref<1x128xf32, #tpu.memory_space<vmem>>, vector<1x128xf32>
    %39 = vector.broadcast %31 : vector<128x1xf32> to vector<128x128xf32>
    %40 = vector.broadcast %38 : vector<1x128xf32> to vector<128x128xf32>
    %41 = arith.mulf %39, %40 : vector<128x128xf32>
    %42 = arith.addf %37, %41 : vector<128x128xf32>
    %c0_19 = arith.constant 0 : index
    %c0_20 = arith.constant 0 : index
    %43 = vector.load %arg9[%c0_19, %c0_20] : memref<1x128xf32, #tpu.memory_space<vmem>>, vector<1x128xf32>
    %44 = vector.broadcast %43 : vector<1x128xf32> to vector<128x128xf32>
    %45 = arith.addf %42, %44 : vector<128x128xf32>
    %46 = arith.negf %45 : vector<128x128xf32>
    %47 = math.exp %46 : vector<128x128xf32>
    %cst_21 = arith.constant 1.000000e+00 : f32
    %48 = vector.broadcast %cst_21 : f32 to vector<128x128xf32>
    %49 = arith.addf %48, %47 : vector<128x128xf32>
    %50 = arith.divf %48, %49 : vector<128x128xf32>
    %51 = arith.mulf %45, %50 : vector<128x128xf32>
    %52 = arith.truncf %51 : vector<128x128xf32> to vector<128x128xbf16>
    %c0_22 = arith.constant 0 : index
    %c0_23 = arith.constant 0 : index
    %53 = vector.load %arg10[%c0_22, %c0_23] : memref<128x128xbf16, #tpu.memory_space<vmem>>, vector<128x128xbf16>
    %cst_24 = arith.constant dense<0.000000e+00> : vector<128x128xf32>
    %54 = tpu.matmul %52, %53, %cst_24 {dimension_numbers = #tpu.dot_dimension_numbers<[1], [0], [0], [1], [0, 0, 1, 1], [], []>} : vector<128x128xbf16>, vector<128x128xbf16>, vector<128x128xf32> -> vector<128x128xf32>
    %c0_25 = arith.constant 0 : index
    %c0_26 = arith.constant 0 : index
    %55 = vector.load %arg11[%c0_25, %c0_26] : memref<1x128xf32, #tpu.memory_space<vmem>>, vector<1x128xf32>
    %56 = vector.broadcast %55 : vector<1x128xf32> to vector<128x128xf32>
    %57 = arith.addf %54, %56 : vector<128x128xf32>
    %58 = arith.negf %57 : vector<128x128xf32>
    %59 = math.exp %58 : vector<128x128xf32>
    %cst_27 = arith.constant 1.000000e+00 : f32
    %60 = vector.broadcast %cst_27 : f32 to vector<128x128xf32>
    %61 = arith.addf %60, %59 : vector<128x128xf32>
    %62 = arith.divf %60, %61 : vector<128x128xf32>
    %63 = arith.mulf %57, %62 : vector<128x128xf32>
    %64 = arith.truncf %63 : vector<128x128xf32> to vector<128x128xbf16>
    %c0_28 = arith.constant 0 : index
    %c0_29 = arith.constant 0 : index
    %65 = vector.load %arg12[%c0_28, %c0_29] : memref<128x16xbf16, #tpu.memory_space<vmem>>, vector<128x16xbf16>
    %cst_30 = arith.constant dense<0.000000e+00> : vector<128x16xf32>
    %66 = tpu.matmul %64, %65, %cst_30 {dimension_numbers = #tpu.dot_dimension_numbers<[1], [0], [0], [1], [0, 0, 1, 1], [], []>} : vector<128x128xbf16>, vector<128x16xbf16>, vector<128x16xf32> -> vector<128x16xf32>
    %c0_31 = arith.constant 0 : index
    %c0_32 = arith.constant 0 : index
    %67 = vector.load %arg13[%c0_31, %c0_32] : memref<1x16xf32, #tpu.memory_space<vmem>>, vector<1x16xf32>
    %68 = vector.broadcast %67 : vector<1x16xf32> to vector<128x16xf32>
    %69 = arith.addf %66, %68 : vector<128x16xf32>
    %70 = arith.negf %69 : vector<128x16xf32>
    %71 = math.exp %70 : vector<128x16xf32>
    %cst_33 = arith.constant 1.000000e+00 : f32
    %72 = vector.broadcast %cst_33 : f32 to vector<128x16xf32>
    %73 = arith.addf %72, %71 : vector<128x16xf32>
    %74 = arith.divf %72, %73 : vector<128x16xf32>
    %75 = arith.mulf %69, %74 : vector<128x16xf32>
    %c0_34 = arith.constant 0 : index
    %c0_35 = arith.constant 0 : index
    %76 = vector.load %arg14[%c0_34, %c0_35] : memref<1x16xf32, #tpu.memory_space<vmem>>, vector<1x16xf32>
    %77 = vector.broadcast %76 : vector<1x16xf32> to vector<128x16xf32>
    %78 = arith.mulf %75, %77 : vector<128x16xf32>
    %cst_36 = arith.constant dense<0.000000e+00> : vector<128xf32>
    %79 = vector.multi_reduction <add>, %78, %cst_36 [1] : vector<128x16xf32> to vector<128xf32>
    %80 = vector.shape_cast %79 : vector<128xf32> to vector<128x1xf32>
    %c0_37 = arith.constant 0 : index
    %c0_38 = arith.constant 0 : index
    %81 = vector.load %arg15[%c0_37, %c0_38] : memref<1x1xf32, #tpu.memory_space<vmem>>, vector<1x1xf32>
    %82 = vector.broadcast %81 : vector<1x1xf32> to vector<128x1xf32>
    %83 = arith.addf %80, %82 : vector<128x1xf32>
    %84 = arith.negf %83 : vector<128x1xf32>
    %85 = math.exp %84 : vector<128x1xf32>
    %cst_39 = arith.constant 1.000000e+00 : f32
    %86 = vector.broadcast %cst_39 : f32 to vector<128x1xf32>
    %87 = arith.addf %86, %85 : vector<128x1xf32>
    %88 = arith.divf %86, %87 : vector<128x1xf32>
    %89 = vector.broadcast %88 : vector<128x1xf32> to vector<128x128xf32>
    %90 = arith.mulf %63, %89 : vector<128x128xf32>
    %91 = arith.truncf %90 : vector<128x128xf32> to vector<128x128xbf16>
    %c0_40 = arith.constant 0 : index
    %c0_41 = arith.constant 0 : index
    %92 = vector.load %arg16[%c0_40, %c0_41] : memref<128x32xbf16, #tpu.memory_space<vmem>>, vector<128x32xbf16>
    %cst_42 = arith.constant dense<0.000000e+00> : vector<128x32xf32>
    %93 = tpu.matmul %91, %92, %cst_42 {dimension_numbers = #tpu.dot_dimension_numbers<[1], [0], [0], [1], [0, 0, 1, 1], [], []>} : vector<128x128xbf16>, vector<128x32xbf16>, vector<128x32xf32> -> vector<128x32xf32>
    %c0_43 = arith.constant 0 : index
    %c0_44 = arith.constant 0 : index
    %94 = vector.load %arg17[%c0_43, %c0_44] : memref<1x32xf32, #tpu.memory_space<vmem>>, vector<1x32xf32>
    %95 = vector.broadcast %94 : vector<1x32xf32> to vector<128x32xf32>
    %96 = arith.addf %93, %95 : vector<128x32xf32>
    %97 = arith.negf %96 : vector<128x32xf32>
    %98 = math.exp %97 : vector<128x32xf32>
    %cst_45 = arith.constant 1.000000e+00 : f32
    %99 = vector.broadcast %cst_45 : f32 to vector<128x32xf32>
    %100 = arith.addf %99, %98 : vector<128x32xf32>
    %101 = arith.divf %99, %100 : vector<128x32xf32>
    %102 = arith.mulf %96, %101 : vector<128x32xf32>
    %c0_46 = arith.constant 0 : index
    %c0_47 = arith.constant 0 : index
    %103 = vector.load %arg18[%c0_46, %c0_47] : memref<1x32xf32, #tpu.memory_space<vmem>>, vector<1x32xf32>
    %104 = vector.broadcast %103 : vector<1x32xf32> to vector<128x32xf32>
    %105 = arith.mulf %102, %104 : vector<128x32xf32>
    %cst_48 = arith.constant dense<0.000000e+00> : vector<128xf32>
    %106 = vector.multi_reduction <add>, %105, %cst_48 [1] : vector<128x32xf32> to vector<128xf32>
    %107 = vector.shape_cast %106 : vector<128xf32> to vector<128x1xf32>
    %108 = vector.broadcast %107 : vector<128x1xf32> to vector<128x3xf32>
    %109 = arith.mulf %36, %108 : vector<128x3xf32>
    %110 = tpu.iota {dimensions = array<i32: 0>} : vector<16x128xi32>
    %111 = vector.broadcast %5 : vector<1x128xi32> to vector<16x128xi32>
    %112 = arith.cmpi eq, %110, %111 : vector<16x128xi32>
    %113 = arith.extui %112 : vector<16x128xi1> to vector<16x128xi32>
    %114 = arith.sitofp %113 : vector<16x128xi32> to vector<16x128xf32>
    %115 = arith.truncf %114 : vector<16x128xf32> to vector<16x128xbf16>
    %116 = arith.extui %112 : vector<16x128xi1> to vector<16x128xi32>
    %117 = arith.sitofp %116 : vector<16x128xi32> to vector<16x128xf32>
    %c0_49 = arith.constant 0 : index
    %c0_50 = arith.constant 0 : index
    %118 = vector.load %arg30[%c0_49, %c0_50] : memref<16x128xf32, #tpu.memory_space<vmem>>, vector<16x128xf32>
    %cst_51 = arith.constant dense<0.000000e+00> : vector<16x128xf32>
    %119 = tpu.matmul %115, %91, %cst_51 {dimension_numbers = #tpu.dot_dimension_numbers<[1], [0], [0], [1], [0, 0, 1, 1], [], []>} : vector<16x128xbf16>, vector<128x128xbf16>, vector<16x128xf32> -> vector<16x128xf32>
    %120 = arith.addf %118, %119 : vector<16x128xf32>
    %c0_52 = arith.constant 0 : index
    %c0_53 = arith.constant 0 : index
    %121 = vector.load %arg30[%c0_52, %c0_53] : memref<16x128xf32, #tpu.memory_space<vmem>>, vector<16x128xf32>
    tpu.vector_store %arg30[%c0_52, %c0_53], %120 {strides = array<i32>} : memref<16x128xf32, #tpu.memory_space<vmem>>, vector<16x128xf32>,
    %cst_54 = arith.constant 1.000000e+00 : f32
    %122 = vector.broadcast %cst_54 : f32 to vector<128x1xf32>
    %123 = tpu.concatenate %109, %122 in 1 : vector<128x3xf32>, vector<128x1xf32> -> vector<128x4xf32>
    %c0_55 = arith.constant 0 : index
    %c0_56 = arith.constant 0 : index
    %124 = vector.load %arg31[%c0_55, %c0_56] : memref<16x4xf32, #tpu.memory_space<vmem>>, vector<16x4xf32>
    %cst_57 = arith.constant dense<0.000000e+00> : vector<16x4xf32>
    %125 = tpu.matmul %117, %123, %cst_57 {dimension_numbers = #tpu.dot_dimension_numbers<[1], [0], [0], [1], [0, 0, 1, 1], [], []>} : vector<16x128xf32>, vector<128x4xf32>, vector<16x4xf32> -> vector<16x4xf32>
    %126 = arith.addf %124, %125 : vector<16x4xf32>
    %c0_58 = arith.constant 0 : index
    %c0_59 = arith.constant 0 : index
    %127 = vector.load %arg31[%c0_58, %c0_59] : memref<16x4xf32, #tpu.memory_space<vmem>>, vector<16x4xf32>
    tpu.vector_store %arg31[%c0_58, %c0_59], %126 {strides = array<i32>} : memref<16x4xf32, #tpu.memory_space<vmem>>, vector<16x4xf32>,
    %c1_i32 = arith.constant 1 : i32
    %128 = arith.cmpi eq, %arg0, %c1_i32 : i32
    %129 = arith.extui %128 : i1 to i32
    %c0_i32_60 = arith.constant 0 : i32
    %130 = arith.cmpi ne, %129, %c0_i32_60 : i32
    scf.if %130 {
      %c0_61 = arith.constant 0 : index
      %c0_62 = arith.constant 0 : index
      %131 = vector.load %arg31[%c0_61, %c0_62] : memref<16x4xf32, #tpu.memory_space<vmem>>, vector<16x4xf32>
      %132 = vector.extract_strided_slice %131 {offsets = [0, 0], sizes = [16, 3], strides = [1, 1]} : vector<16x4xf32> to vector<16x3xf32>
      %133 = vector.extract_strided_slice %131 {offsets = [0, 3], sizes = [16, 1], strides = [1, 1]} : vector<16x4xf32> to vector<16x1xf32>
      %c0_63 = arith.constant 0 : index
      %c0_64 = arith.constant 0 : index
      %134 = vector.load %arg5[%c0_63, %c0_64] : memref<16x3xf32, #tpu.memory_space<vmem>>, vector<16x3xf32>
      %cst_65 = arith.constant 1.000000e+00 : f32
      %135 = vector.broadcast %cst_65 : f32 to vector<16x1xf32>
      %136 = arith.maximumf %133, %135 : vector<16x1xf32>
      %137 = vector.broadcast %136 : vector<16x1xf32> to vector<16x3xf32>
      %138 = arith.divf %132, %137 : vector<16x3xf32>
      %139 = arith.addf %134, %138 : vector<16x3xf32>
      %c0_66 = arith.constant 0 : index
      %c0_67 = arith.constant 0 : index
      %140 = vector.load %arg27[%c0_66, %c0_67] : memref<16x3xf32, #tpu.memory_space<vmem>>, vector<16x3xf32>
      tpu.vector_store %arg27[%c0_66, %c0_67], %139 {strides = array<i32>} : memref<16x3xf32, #tpu.memory_space<vmem>>, vector<16x3xf32>,
      %c0_68 = arith.constant 0 : index
      %c0_69 = arith.constant 0 : index
      %141 = vector.load %arg4[%c0_68, %c0_69] : memref<16x32xf32, #tpu.memory_space<vmem>>, vector<16x32xf32>
      %c0_70 = arith.constant 0 : index
      %c0_71 = arith.constant 0 : index
      %142 = vector.load %arg30[%c0_70, %c0_71] : memref<16x128xf32, #tpu.memory_space<vmem>>, vector<16x128xf32>
      %143 = vector.extract_strided_slice %142 {offsets = [0, 0], sizes = [16, 32], strides = [1, 1]} : vector<16x128xf32> to vector<16x32xf32>
      %c0_72 = arith.constant 0 : index
      %c0_73 = arith.constant 0 : index
      %144 = vector.load %arg19[%c0_72, %c0_73] : memref<32x32xf32, #tpu.memory_space<vmem>>, vector<32x32xf32>
      %cst_74 = arith.constant dense<0.000000e+00> : vector<16x32xf32>
      %145 = tpu.matmul %141, %144, %cst_74 {dimension_numbers = #tpu.dot_dimension_numbers<[1], [0], [0], [1], [0, 0, 1, 1], [], []>} : vector<16x32xf32>, vector<32x32xf32>, vector<16x32xf32> -> vector<16x32xf32>
      %c0_75 = arith.constant 0 : index
      %c0_76 = arith.constant 0 : index
      %146 = vector.load %arg20[%c0_75, %c0_76] : memref<32x32xf32, #tpu.memory_space<vmem>>, vector<32x32xf32>
      %cst_77 = arith.constant dense<0.000000e+00> : vector<16x32xf32>
      %147 = tpu.matmul %143, %146, %cst_77 {dimension_numbers = #tpu.dot_dimension_numbers<[1], [0], [0], [1], [0, 0, 1, 1], [], []>} : vector<16x32xf32>, vector<32x32xf32>, vector<16x32xf32> -> vector<16x32xf32>
      %148 = arith.addf %145, %147 : vector<16x32xf32>
      %c0_78 = arith.constant 0 : index
      %c0_79 = arith.constant 0 : index
      %149 = vector.load %arg21[%c0_78, %c0_79] : memref<1x32xf32, #tpu.memory_space<vmem>>, vector<1x32xf32>
      %150 = vector.broadcast %149 : vector<1x32xf32> to vector<16x32xf32>
      %151 = arith.addf %148, %150 : vector<16x32xf32>
      %152 = arith.negf %151 : vector<16x32xf32>
      %153 = math.exp %152 : vector<16x32xf32>
      %cst_80 = arith.constant 1.000000e+00 : f32
      %154 = vector.broadcast %cst_80 : f32 to vector<16x32xf32>
      %155 = arith.addf %154, %153 : vector<16x32xf32>
      %156 = arith.divf %154, %155 : vector<16x32xf32>
      %157 = arith.mulf %151, %156 : vector<16x32xf32>
      %c0_81 = arith.constant 0 : index
      %c0_82 = arith.constant 0 : index
      %158 = vector.load %arg22[%c0_81, %c0_82] : memref<32x32xf32, #tpu.memory_space<vmem>>, vector<32x32xf32>
      %cst_83 = arith.constant dense<0.000000e+00> : vector<16x32xf32>
      %159 = tpu.matmul %157, %158, %cst_83 {dimension_numbers = #tpu.dot_dimension_numbers<[1], [0], [0], [1], [0, 0, 1, 1], [], []>} : vector<16x32xf32>, vector<32x32xf32>, vector<16x32xf32> -> vector<16x32xf32>
      %c0_84 = arith.constant 0 : index
      %c0_85 = arith.constant 0 : index
      %160 = vector.load %arg23[%c0_84, %c0_85] : memref<1x32xf32, #tpu.memory_space<vmem>>, vector<1x32xf32>
      %161 = vector.broadcast %160 : vector<1x32xf32> to vector<16x32xf32>
      %162 = arith.addf %159, %161 : vector<16x32xf32>
      %163 = arith.addf %141, %162 : vector<16x32xf32>
      %cst_86 = arith.constant dense<0.000000e+00> : vector<16xf32>
      %164 = vector.multi_reduction <add>, %163, %cst_86 [1] : vector<16x32xf32> to vector<16xf32>
      %165 = vector.shape_cast %164 : vector<16xf32> to vector<16x1xf32>
      %cst_87 = arith.constant 3.200000e+01 : f32
      %166 = vector.broadcast %cst_87 : f32 to vector<16x1xf32>
      %167 = arith.divf %165, %166 : vector<16x1xf32>
      %168 = vector.broadcast %167 : vector<16x1xf32> to vector<16x32xf32>
      %169 = arith.subf %163, %168 : vector<16x32xf32>
      %170 = arith.mulf %169, %169 : vector<16x32xf32>
      %cst_88 = arith.constant dense<0.000000e+00> : vector<16xf32>
      %171 = vector.multi_reduction <add>, %170, %cst_88 [1] : vector<16x32xf32> to vector<16xf32>
      %172 = vector.shape_cast %171 : vector<16xf32> to vector<16x1xf32>
      %cst_89 = arith.constant 3.200000e+01 : f32
      %173 = vector.broadcast %cst_89 : f32 to vector<16x1xf32>
      %174 = arith.divf %172, %173 : vector<16x1xf32>
      %175 = vector.broadcast %167 : vector<16x1xf32> to vector<16x32xf32>
      %176 = arith.subf %163, %175 : vector<16x32xf32>
      %cst_90 = arith.constant 9.99999974E-6 : f32
      %177 = vector.broadcast %cst_90 : f32 to vector<16x1xf32>
      %178 = arith.addf %174, %177 : vector<16x1xf32>
      %179 = math.rsqrt %178 : vector<16x1xf32>
      %180 = vector.broadcast %179 : vector<16x1xf32> to vector<16x32xf32>
      %181 = arith.mulf %176, %180 : vector<16x32xf32>
      %c0_91 = arith.constant 0 : index
      %c0_92 = arith.constant 0 : index
      %182 = vector.load %arg24[%c0_91, %c0_92] : memref<1x32xf32, #tpu.memory_space<vmem>>, vector<1x32xf32>
      %183 = vector.broadcast %182 : vector<1x32xf32> to vector<16x32xf32>
      %184 = arith.mulf %181, %183 : vector<16x32xf32>
      %c0_93 = arith.constant 0 : index
      %c0_94 = arith.constant 0 : index
      %185 = vector.load %arg25[%c0_93, %c0_94] : memref<1x32xf32, #tpu.memory_space<vmem>>, vector<1x32xf32>
      %186 = vector.broadcast %185 : vector<1x32xf32> to vector<16x32xf32>
      %187 = arith.addf %184, %186 : vector<16x32xf32>
      %c0_95 = arith.constant 0 : index
      %c0_96 = arith.constant 0 : index
      %188 = vector.load %arg26[%c0_95, %c0_96] : memref<16x32xf32, #tpu.memory_space<vmem>>, vector<16x32xf32>
      tpu.vector_store %arg26[%c0_95, %c0_96], %187 {strides = array<i32>} : memref<16x32xf32, #tpu.memory_space<vmem>>, vector<16x32xf32>,
    } else {
    }
    return
  }
  func.func @transform_0(%arg0: i32) -> (i32, i32) {
    %c0_i32 = arith.constant 0 : i32
    %c0_i32_0 = arith.constant 0 : i32
    return %c0_i32, %arg0 : i32, i32
  }
  func.func @transform_1(%arg0: i32) -> (i32, i32) {
    %c0_i32 = arith.constant 0 : i32
    %c0_i32_0 = arith.constant 0 : i32
    return %arg0, %c0_i32 : i32, i32
  }
  func.func @transform_2(%arg0: i32) -> (i32, i32) {
    %c0_i32 = arith.constant 0 : i32
    %c0_i32_0 = arith.constant 0 : i32
    return %arg0, %c0_i32 : i32, i32
  }
  func.func @transform_3(%arg0: i32) -> (i32, i32) {
    %c0_i32 = arith.constant 0 : i32
    %c0_i32_0 = arith.constant 0 : i32
    %c0_i32_1 = arith.constant 0 : i32
    return %c0_i32, %c0_i32_0 : i32, i32
  }
  func.func @transform_4(%arg0: i32) -> (i32, i32) {
    %c0_i32 = arith.constant 0 : i32
    %c0_i32_0 = arith.constant 0 : i32
    %c0_i32_1 = arith.constant 0 : i32
    return %c0_i32, %c0_i32_0 : i32, i32
  }
  func.func @transform_5(%arg0: i32) -> (i32, i32) {
    %c0_i32 = arith.constant 0 : i32
    %c0_i32_0 = arith.constant 0 : i32
    %c0_i32_1 = arith.constant 0 : i32
    return %c0_i32, %c0_i32_0 : i32, i32
  }
  func.func @transform_6(%arg0: i32) -> (i32, i32) {
    %c0_i32 = arith.constant 0 : i32
    %c0_i32_0 = arith.constant 0 : i32
    %c0_i32_1 = arith.constant 0 : i32
    return %c0_i32, %c0_i32_0 : i32, i32
  }
  func.func @transform_7(%arg0: i32) -> (i32, i32) {
    %c0_i32 = arith.constant 0 : i32
    %c0_i32_0 = arith.constant 0 : i32
    %c0_i32_1 = arith.constant 0 : i32
    return %c0_i32, %c0_i32_0 : i32, i32
  }
  func.func @transform_8(%arg0: i32) -> (i32, i32) {
    %c0_i32 = arith.constant 0 : i32
    %c0_i32_0 = arith.constant 0 : i32
    %c0_i32_1 = arith.constant 0 : i32
    return %c0_i32, %c0_i32_0 : i32, i32
  }
  func.func @transform_9(%arg0: i32) -> (i32, i32) {
    %c0_i32 = arith.constant 0 : i32
    %c0_i32_0 = arith.constant 0 : i32
    %c0_i32_1 = arith.constant 0 : i32
    return %c0_i32, %c0_i32_0 : i32, i32
  }
  func.func @transform_10(%arg0: i32) -> (i32, i32) {
    %c0_i32 = arith.constant 0 : i32
    %c0_i32_0 = arith.constant 0 : i32
    %c0_i32_1 = arith.constant 0 : i32
    return %c0_i32, %c0_i32_0 : i32, i32
  }
  func.func @transform_11(%arg0: i32) -> (i32, i32) {
    %c0_i32 = arith.constant 0 : i32
    %c0_i32_0 = arith.constant 0 : i32
    %c0_i32_1 = arith.constant 0 : i32
    return %c0_i32, %c0_i32_0 : i32, i32
  }
  func.func @transform_12(%arg0: i32) -> (i32, i32) {
    %c0_i32 = arith.constant 0 : i32
    %c0_i32_0 = arith.constant 0 : i32
    %c0_i32_1 = arith.constant 0 : i32
    return %c0_i32, %c0_i32_0 : i32, i32
  }
  func.func @transform_13(%arg0: i32) -> (i32, i32) {
    %c0_i32 = arith.constant 0 : i32
    %c0_i32_0 = arith.constant 0 : i32
    %c0_i32_1 = arith.constant 0 : i32
    return %c0_i32, %c0_i32_0 : i32, i32
  }
  func.func @transform_14(%arg0: i32) -> (i32, i32) {
    %c0_i32 = arith.constant 0 : i32
    %c0_i32_0 = arith.constant 0 : i32
    %c0_i32_1 = arith.constant 0 : i32
    return %c0_i32, %c0_i32_0 : i32, i32
  }
  func.func @transform_15(%arg0: i32) -> (i32, i32) {
    %c0_i32 = arith.constant 0 : i32
    %c0_i32_0 = arith.constant 0 : i32
    %c0_i32_1 = arith.constant 0 : i32
    return %c0_i32, %c0_i32_0 : i32, i32
  }
  func.func @transform_16(%arg0: i32) -> (i32, i32) {
    %c0_i32 = arith.constant 0 : i32
    %c0_i32_0 = arith.constant 0 : i32
    %c0_i32_1 = arith.constant 0 : i32
    return %c0_i32, %c0_i32_0 : i32, i32
  }
  func.func @transform_17(%arg0: i32) -> (i32, i32) {
    %c0_i32 = arith.constant 0 : i32
    %c0_i32_0 = arith.constant 0 : i32
    %c0_i32_1 = arith.constant 0 : i32
    return %c0_i32, %c0_i32_0 : i32, i32
  }
  func.func @transform_18(%arg0: i32) -> (i32, i32) {
    %c0_i32 = arith.constant 0 : i32
    %c0_i32_0 = arith.constant 0 : i32
    %c0_i32_1 = arith.constant 0 : i32
    return %c0_i32, %c0_i32_0 : i32, i32
  }
  func.func @transform_19(%arg0: i32) -> (i32, i32) {
    %c0_i32 = arith.constant 0 : i32
    %c0_i32_0 = arith.constant 0 : i32
    %c0_i32_1 = arith.constant 0 : i32
    return %c0_i32, %c0_i32_0 : i32, i32
  }
  func.func @transform_20(%arg0: i32) -> (i32, i32) {
    %c0_i32 = arith.constant 0 : i32
    %c0_i32_0 = arith.constant 0 : i32
    %c0_i32_1 = arith.constant 0 : i32
    return %c0_i32, %c0_i32_0 : i32, i32
  }
  func.func @transform_21(%arg0: i32) -> (i32, i32) {
    %c0_i32 = arith.constant 0 : i32
    %c0_i32_0 = arith.constant 0 : i32
    %c0_i32_1 = arith.constant 0 : i32
    return %c0_i32, %c0_i32_0 : i32, i32
  }
  func.func @transform_22(%arg0: i32) -> (i32, i32) {
    %c0_i32 = arith.constant 0 : i32
    %c0_i32_0 = arith.constant 0 : i32
    %c0_i32_1 = arith.constant 0 : i32
    return %c0_i32, %c0_i32_0 : i32, i32
  }
  func.func @transform_23(%arg0: i32) -> (i32, i32) {
    %c0_i32 = arith.constant 0 : i32
    %c0_i32_0 = arith.constant 0 : i32
    %c0_i32_1 = arith.constant 0 : i32
    return %c0_i32, %c0_i32_0 : i32, i32
  }
  func.func @transform_24(%arg0: i32) -> (i32, i32) {
    %c0_i32 = arith.constant 0 : i32
    %c0_i32_0 = arith.constant 0 : i32
    %c0_i32_1 = arith.constant 0 : i32
    return %c0_i32, %c0_i32_0 : i32, i32
  }
  func.func @transform_25(%arg0: i32) -> (i32, i32) {
    %c0_i32 = arith.constant 0 : i32
    %c0_i32_0 = arith.constant 0 : i32
    %c0_i32_1 = arith.constant 0 : i32
    return %c0_i32, %c0_i32_0 : i32, i32
  }
  func.func @transform_26(%arg0: i32) -> (i32, i32) {
    %c0_i32 = arith.constant 0 : i32
    %c0_i32_0 = arith.constant 0 : i32
    %c0_i32_1 = arith.constant 0 : i32
    return %c0_i32, %c0_i32_0 : i32, i32
  }
}

</mosaic_0001>

<bundles_post_ra>
// kernel: tpu_custom_call.1
= control target key start
LH: loop header
LB: loop body
LE: loop exit
PB: predicated region body
PF: predicated region fallthrough
CT: control target
= control target key end

     0   :  { %s6649_s0 = inlined_call_operand.vmem [shape: s32[1,256], index: 0, kind: input, shape index: {}]   ;;  %s6650_s1 = inlined_call_operand.vmem [shape: s32[256,1], index: 1, kind: input, shape index: {}]   ;;  %s6651_s2 = inlined_call_operand.vmem [shape: s32[256,1], index: 2, kind: input, shape index: {}]   ;;  %s6652_s3 = inlined_call_operand.vmem [shape: f32[16,32], index: 3, kind: input, shape index: {}]   ;;  %s6653_s4 = inlined_call_operand.vmem [shape: f32[16,3], index: 4, kind: input, shape index: {}]   ;;  %s6654_s5 = inlined_call_operand.vmem [shape: f32[32,128], index: 5, kind: input, shape index: {}]   ;;  %s6655_s6 = inlined_call_operand.vmem [shape: f32[32,128], index: 6, kind: input, shape index: {}]   ;;  %s6656_s7 = inlined_call_operand.vmem [shape: f32[1,128], index: 7, kind: input, shape index: {}]   ;;  %s6657_s8 = inlined_call_operand.vmem [shape: f32[1,128], index: 8, kind: input, shape index: {}]   ;;  %s6658_s9 = inlined_call_operand.vmem [shape: bf16[128,128], index: 9, kind: input, shape index: {}]   ;;  %s6659_s10 = inlined_call_operand.vmem [shape: f32[1,128], index: 10, kind: input, shape index: {}]   ;;  %s6660_s11 = inlined_call_operand.vmem [shape: bf16[128,16], index: 11, kind: input, shape index: {}]   ;;  %s6661_s12 = inlined_call_operand.vmem [shape: f32[1,16], index: 12, kind: input, shape index: {}]   ;;  %s6662_s13 = inlined_call_operand.vmem [shape: f32[1,16], index: 13, kind: input, shape index: {}]   ;;  %s6663_s14 = inlined_call_operand.<no memory space> [shape: f32[1,1], index: 14, kind: input, shape index: {}]   ;;  %s6664_s15 = inlined_call_operand.vmem [shape: bf16[128,32], index: 15, kind: input, shape index: {}]   ;;  %s6665_s16 = inlined_call_operand.vmem [shape: f32[1,32], index: 16, kind: input, shape index: {}]   ;;  %s6666_s17 = inlined_call_operand.vmem [shape: f32[1,32], index: 17, kind: input, shape index: {}]   ;;  %s6667_s18 = inlined_call_operand.vmem [shape: f32[32,32], index: 18, kind: input, shape index: {}]   ;;  %s6668_s19 = inlined_call_operand.vmem [shape: f32[32,32], index: 19, kind: input, shape index: {}]   ;;  %s6669_s20 = inlined_call_operand.vmem [shape: f32[1,32], index: 20, kind: input, shape index: {}]   ;;  %s6670_s21 = inlined_call_operand.vmem [shape: f32[32,32], index: 21, kind: input, shape index: {}]   ;;  %s6671_s22 = inlined_call_operand.vmem [shape: f32[1,32], index: 22, kind: input, shape index: {}]   ;;  %s6672_s23 = inlined_call_operand.vmem [shape: f32[1,32], index: 23, kind: input, shape index: {}]   ;;  %s6673_s24 = inlined_call_operand.vmem [shape: f32[1,32], index: 24, kind: input, shape index: {}]   ;;  %s6674_s25 = inlined_call_operand.hbm [shape: f32[16,32], index: 25, kind: output, shape index: {0}]   ;;  %s6675_s26 = inlined_call_operand.vmem [shape: f32[16,3], index: 26, kind: output, shape index: {1}]  }
   0x1   :  { %6703 = sst [smem:[#allocation26_spill]] %s6649_s0  ;;  %v32_v0 = vstv %s6663_s14 }
   0x2   :  { %6704 = sst [smem:[#allocation27_spill]] %s6650_s1  ;;  %33 = vst [vmem:[#allocation6] sm:$0x1] %v32_v0 }
   0x3   :  { %6705 = sst [smem:[#allocation28_spill]] %s6651_s2 }
   0x4   :  { %6706 = sst [smem:[#allocation29_spill]] %s6652_s3 }
   0x5   :  { %6707 = sst [smem:[#allocation30_spill]] %s6653_s4 }
   0x6   :  { %6708 = sst [smem:[#allocation31_spill]] %s6654_s5 }
   0x7   :  { %6709 = sst [smem:[#allocation32_spill]] %s6655_s6 }
   0x8   :  { %6710 = sst [smem:[#allocation33_spill]] %s6656_s7 }
   0x9   :  { %6711 = sst [smem:[#allocation34_spill]] %s6657_s8 }
   0xa   :  { %6712 = sst [smem:[#allocation35_spill]] %s6658_s9 }
   0xb   :  { %6713 = sst [smem:[#allocation36_spill]] %s6659_s10 }
   0xc   :  { %6714 = sst [smem:[#allocation37_spill]] %s6672_s23 }
   0xd   :  { %6715 = sst [smem:[#allocation38_spill]] %s6673_s24 }
   0xe   :  { %6716 = sst [smem:[#allocation39_spill]] %s6674_s25 }
   0xf   :  { %34 = vsyncpa [#allocation8], 0  ;;  %s5406_s7 = smov 0  }
  0x10 LB: > { %6717 = sst [smem:[#allocation10_spill]] %s5256_s7  ;;  %s5412_s28 = sadd.s32 4294967295, %s5256_s7   ;;  %s5256_s7 = sphi %s5406_s7, %s40_s7  }
  0x11   : > { %p4017_p0 = scmp.ge.s32.totalorder %s5256_s7, 1  ;;  %p728_p1 = scmp.lt.s32.totalorder %s5256_s7, 3 }
  0x13   : > { %p729_p2 = pnand %p4017_p0, %p728_p1 }
  0x15   : > { %732 = sbr.rel (%p729_p2) target bundleno = 2960 (0xb90), region = 120 }
  0x1c   : > { %p801_p3 = scmp.lt.s32.totalorder %s5412_s28, 1  ;;  %s4018_s14 = sshll.u32 %s5412_s28, 4 }
  0x1d   : > { %p805_p4 = scmp.lt.s32.totalorder %s4018_s14, 31  ;;  %s6718_s0 = sld [smem:[#allocation26_spill]] }
  0x1e   : > { %s5419_s8 = scalar_select %p801_p3, %s5412_s28, 1 }
  0x1f   : > { %s6769_s14 = smov (!%p805_p4, %s4018_s14), 31  ;;  %s6719_s10 = sld [smem:[#allocation27_spill]] }
  0x20   : > { %s4019_s30 = sshll.u32 %s6769_s14, 3  ;;  %s6720_s3 = sld [smem:[#allocation28_spill]] }
  0x21   : > { %p4022_p5 = scmp.ne.s32.totalorder %s5412_s28, 0 }
  0x22   : > { %s6721_s23 = sld [smem:[#allocation31_spill]] (!%p4022_p5)  ;;  %s6722_s2 = sld [smem:[#allocation32_spill]] (!%p4022_p5)  ;;  %vm827_vm0 = vcmask (!%p4022_p5), 261120   ;;  %vm994_vm1 = vcmask (!%p4022_p5), 31744   ;;  %v5258_v15 = vmov (!%p4022_p5), 0.0  }
  0x23   : > { %s803_s9 = scalar_lea.vmem %s6718_s0, %s5419_s8  ;;  %820 = sbr.rel (%p4022_p5) target bundleno = 268 (0x10c), region = 124  ;;  %992 = vst [vmem:[#allocation4] sm:$0xff] (!%p4022_p5), %v5258_v15  ;;  %993 = vst [vmem:[#allocation4 + $0x8] sm:$0xff] (!%p4022_p5), %v5258_v15 }
  0x24   : > { %s6723_s5 = sld [smem:[#allocation29_spill]] (!%p4022_p5)  ;;  %995 = vst.msk [vmem:[#allocation5] sm:$0xff] (!%p4022_p5), %vm994_vm1, %v5258_v15  ;;  %996 = vst.msk [vmem:[#allocation5 + $0x8] sm:$0xff] (!%p4022_p5), %vm994_vm1, %v5258_v15 }
  0x25   : > { %s5428_s6 = scalar_lea.vmem %s6719_s10, %s4019_s30 }
  0x26   : > { %s5433_s7 = scalar_lea.vmem %s6720_s3, %s4019_s30 }
  0x28   : > { %v823_v1 = vld [vmem:[%s6721_s23] sm:$0xff] (!%p4022_p5)  ;;  %v824_v2 = vld [vmem:[%s6721_s23 + $0x8] sm:$0xff] (!%p4022_p5)  ;;  %v825_v6 = vld [vmem:[%s6721_s23 + $0x10] sm:$0xff] (!%p4022_p5) }
  0x29   : > { %v909_v3 = vld [vmem:[%s6722_s2] sm:$0xff] (!%p4022_p5)  ;;  %v4700_v4 = vpack.c.bf16 (!%p4022_p5), %v824_v2, %v823_v1  ;;  %v910_v5 = vld [vmem:[%s6722_s2 + $0x8] sm:$0xff] (!%p4022_p5)  ;;  %v826_v7 = vld [vmem:[%s6721_s23 + $0x18] sm:$0xff] (!%p4022_p5) }
  0x2a   : > { %v4708_v8 = vpack.c.bf16 %v910_v5, %v909_v3  ;;  %v4704_v9 = vpack.c.bf16 %v826_v7, %v825_v6  ;;  %v911_v10 = vld [vmem:[%s6722_s2 + $0x10] sm:$0xff]  ;;  %v912_v11 = vld [vmem:[%s6722_s2 + $0x18] sm:$0xff]  ;;  %v821_v12 = vld [vmem:[%s6723_s5] sm:$0xff] }
  0x2b   : > { %4701 = vmatprep.subr.bf16.mxu0 %v4700_v4  ;;  %v4712_v13 = vpack.c.bf16 %v912_v11, %v911_v10  ;;  %4410 = vmatprep.mubr.msk.f32.mxu0 %vm827_vm0, %v821_v12  ;;  %v822_v14 = vld [vmem:[%s6723_s5 + $0x8] sm:$0xff] }
  0x2c   : > { %4709 = vmatprep.subr.bf16.mxu1 %v4708_v8  ;;  %4703 = vmatpush3.bf16.msra.mxu0 %v4700_v4 }
  0x2d   : > { %4711 = vmatpush3.bf16.msra.mxu1 %v4708_v8  ;;  %4705 = vmatprep.subr.bf16.mxu0 %v4704_v9 }
  0x2e   : > { %4713 = vmatprep.subr.bf16.mxu1 %v4712_v13  ;;  %4421 = vmatprep.mubr.msk.f32.mxu1 %vm827_vm0, %v821_v12 }
  0x30   : > { %4707 = vmatpush3.bf16.msra.mxu0 %v4704_v9 }
  0x31   : > { %4715 = vmatpush3.bf16.msra.mxu1 %v4712_v13 }
  0x33   : > { %4411 = vmatmul.mubr.msk.f32.vlgmr.msra.gmra.mrb[0].mxu0 %vm827_vm0, %v822_v14 }
  0x34   : > { %4422 = vmatmul.mubr.msk.f32.vlgmr.msra.gmra.mrb[0].mxu1 %vm827_vm0, %v822_v14 }
 0x106   : > { %v4412_v16 = vpop.f32.mrb[0].mxu0 }
 0x107   : > { %v4423_v17 = vpop.f32.mrb[0].mxu1  ;;  %v900_v18 = vpop.f32.mrb[1].mxu0 }
 0x108   : > { %v988_v19 = vpack.c.bf16 %v4412_v16, %v900_v18  ;;  %v979_v20 = vpop.f32.mrb[1].mxu1 }
 0x109   : > { %v990_v21 = vpack.c.bf16 %v4423_v17, %v979_v20 }
 0x10a   : > { %989 = vst [vmem:[#allocation2] sm:$0xff] %v988_v19 }
 0x10b   : > { %991 = vst [vmem:[#allocation3] sm:$0xff] %v990_v21 }
 0x10c PF: > { %v1015_v22 = vld [vmem:[%s5433_s7 + $0x10] sm:$0xff]  ;;  %v1013_v23 = vld [vmem:[%s5433_s7] sm:$0xff]  ;;  %v5259_v24 = vmov 0   ;;  %v1016_v25 = vld [vmem:[%s5433_s7 + $0x18] sm:$0xff]  ;;  %s6724_s25 = sld [smem:[#allocation30_spill]]  ;;  %v6685_v59 = vlaneseq  ;;  %vm1242_vm6 = vcmask 130048  }
 0x10d   : > { %4825 = vset.pattern.permute.xlu1 %v5259_v24  ;;  %4824 = vset.pattern.permute.xlu0 %v5259_v24  ;;  %v1014_v26 = vld [vmem:[%s5433_s7 + $0x8] sm:$0xff]  ;;  %v1017_v28 = vld [vmem:[%s5433_s7 + $0x20] sm:$0xff]  ;;  %v1020_v29 = vld [vmem:[%s5433_s7 + $0x38] sm:$0xff]  ;;  %v6686_v1 = vmov 0.0   ;;  %s6735_s4 = sld [smem:[#allocation35_spill]]  ;;  %s6736_s5 = sld [smem:[#allocation33_spill]] }
 0x10e   : > { %1103 = vperm.xlu1 %4825, %v1015_v22   ;;  %1097 = vperm.xlu0 %4824, %v1013_v23   ;;  %v1018_v27 = vld [vmem:[%s5433_s7 + $0x28] sm:$0xff]  ;;  %v1019_v30 = vld [vmem:[%s5433_s7 + $0x30] sm:$0xff]  ;;  %v1021_v33 = vld [vmem:[%s5433_s7 + $0x40] sm:$0xff]  ;;  %v5513_v60 = vand.u32 127, %v6685_v59  ;;  %s6737_s1 = sld [smem:[#allocation34_spill]]  ;;  %p4226_p6 = scmp.ne.s32.totalorder %s5412_s28, 1 }
 0x10f   : > { %v1022_v32 = vld [vmem:[%s5433_s7 + $0x48] sm:$0xff]  ;;  %v1025_v35 = vld [vmem:[%s5433_s7 + $0x60] sm:$0xff]  ;;  %v1024_v38 = vld [vmem:[%s5433_s7 + $0x58] sm:$0xff]  ;;  %s6762_s0 = sld [smem:[#allocation29_spill]] (!%p4226_p6)  ;;  %s6763_s30 = sld [smem:[#allocation30_spill]] (!%p4226_p6) }
 0x110   : > { %v1026_v34 = vld [vmem:[%s5433_s7 + $0x68] sm:$0xff]  ;;  %v1023_v39 = vld [vmem:[%s5433_s7 + $0x50] sm:$0xff]  ;;  %v1028_v41 = vld [vmem:[%s5433_s7 + $0x78] sm:$0xff]  ;;  %s6764_s27 = sld [smem:[#allocation37_spill]] (!%p4226_p6) }
 0x111   : > { %v1027_v42 = vld [vmem:[%s5433_s7 + $0x70] sm:$0xff]  ;;  %v998_v43 = vld [vmem:[%s5428_s6 + $0x8] sm:$0xff]  ;;  %v997_v44 = vld [vmem:[%s5428_s6] sm:$0xff] }
 0x112   : > { %1106 = vperm.xlu1 %4825, %v1016_v25   ;;  %1100 = vperm.xlu0 %4824, %v1014_v26   ;;  %v1241_v31 = vld [vmem:[#allocation3] sm:$0xff]  ;;  %v1364_v36 = vld [vmem:[%s6724_s25] sm:$0xff]  ;;  %v1000_v45 = vld [vmem:[%s5428_s6 + $0x18] sm:$0xff] }
 0x113   : > { %4424 = vmatprep.subr.bf16.mxu0 %v1241_v31  ;;  %4780 = vmatprep.subr.bf16.mxu1 %v1241_v31  ;;  %v1365_v37 = vld [vmem:[%s6724_s25 + $0x8] sm:$0xff]  ;;  %v999_v46 = vld [vmem:[%s5428_s6 + $0x10] sm:$0xff]  ;;  %v1001_v48 = vld [vmem:[%s5428_s6 + $0x20] sm:$0xff] }
 0x114   : > { %4425 = vmatpush3.bf16.msra.mxu0 %v1241_v31  ;;  %4781 = vmatpush3.bf16.msra.mxu1 %v1241_v31  ;;  %v5490_v40 = vpack.c.bf16 %v1365_v37, %v1364_v36  ;;  %v1002_v47 = vld [vmem:[%s5428_s6 + $0x28] sm:$0xff]  ;;  %v1004_v49 = vld [vmem:[%s5428_s6 + $0x38] sm:$0xff]  ;;  %v1003_v50 = vld [vmem:[%s5428_s6 + $0x30] sm:$0xff] }
 0x115   : > { %v1006_v51 = vld [vmem:[%s5428_s6 + $0x48] sm:$0xff]  ;;  %v1005_v52 = vld [vmem:[%s5428_s6 + $0x40] sm:$0xff]  ;;  %v1008_v53 = vld [vmem:[%s5428_s6 + $0x58] sm:$0xff] }
 0x116   : > { %1112 = vperm.xlu1 %4825, %v1018_v27   ;;  %1109 = vperm.xlu0 %4824, %v1017_v28   ;;  %v1007_v54 = vld [vmem:[%s5428_s6 + $0x50] sm:$0xff]  ;;  %v1010_v55 = vld [vmem:[%s5428_s6 + $0x68] sm:$0xff]  ;;  %v1009_v56 = vld [vmem:[%s5428_s6 + $0x60] sm:$0xff] }
 0x117   : > { %4721 = vmatprep.subr.bf16.mxu0 %v5490_v40  ;;  %4717 = vmatprep.subr.bf16.mxu1 %v5490_v40  ;;  %v1012_v57 = vld [vmem:[%s5428_s6 + $0x78] sm:$0xff]  ;;  %v1011_v58 = vld [vmem:[%s5428_s6 + $0x70] sm:$0xff]  ;;  %v1240_v10 = vld [vmem:[#allocation2] sm:$0xff]  ;;  %s6744_s6 = sld [smem:[#allocation36_spill]] }
 0x11a   : > { %1118 = vperm.xlu1 %4825, %v1020_v29   ;;  %1115 = vperm.xlu0 %4824, %v1019_v30  }
 0x11e   : > { %1124 = vperm.xlu1 %4825, %v1022_v32   ;;  %1121 = vperm.xlu0 %4824, %v1021_v33  }
 0x122   : > { %1136 = vperm.xlu1 %4825, %v1026_v34   ;;  %1133 = vperm.xlu0 %4824, %v1025_v35  }
 0x126   : > { %1130 = vperm.xlu1 %4825, %v1024_v38   ;;  %1127 = vperm.xlu0 %4824, %v1023_v39  }
 0x12a   : > { %1142 = vperm.xlu1 %4825, %v1028_v41   ;;  %1139 = vperm.xlu0 %4824, %v1027_v42  }
 0x12e   : > { %1036 = vperm.xlu1 %4825, %v998_v43   ;;  %1033 = vperm.xlu0 %4824, %v997_v44  }
 0x132   : > { %1042 = vperm.xlu1 %4825, %v1000_v45   ;;  %1039 = vperm.xlu0 %4824, %v999_v46  }
 0x136   : > { %1048 = vperm.xlu1 %4825, %v1002_v47   ;;  %1045 = vperm.xlu0 %4824, %v1001_v48  }
 0x13a   : > { %1054 = vperm.xlu1 %4825, %v1004_v49   ;;  %1051 = vperm.xlu0 %4824, %v1003_v50  }
 0x13e   : > { %1060 = vperm.xlu1 %4825, %v1006_v51   ;;  %1057 = vperm.xlu0 %4824, %v1005_v52  }
 0x142   : > { %1066 = vperm.xlu1 %4825, %v1008_v53   ;;  %1063 = vperm.xlu0 %4824, %v1007_v54  }
 0x146   : > { %1072 = vperm.xlu1 %4825, %v1010_v55   ;;  %1069 = vperm.xlu0 %4824, %v1009_v56  }
 0x14a   : > { %1078 = vperm.xlu1 %4825, %v1012_v57   ;;  %1075 = vperm.xlu0 %4824, %v1011_v58  }
 0x18d   : > { %v1104_v61 = vpop.permute.xlu1 %1103  ;;  %v1098_v62 = vpop.permute.xlu0 %1097 }
 0x18e   : > { %vm1146_vm2 = vcmp.eq.s32.totalorder %v5513_v60, %v1104_v61  ;;  %vm1144_vm3 = vcmp.eq.s32.totalorder %v5513_v60, %v1098_v62 }
 0x18f   : > { %v5520_v2 = vsel %vm1146_vm2, 1.0, %v6686_v1  ;;  %v4043_v3 = vsel %vm1144_vm3, 1.0, %v6686_v1 }
 0x191   : > { %v1107_v63 = vpop.permute.xlu1 %1106  ;;  %v1101_v0 = vpop.permute.xlu0 %1100 }
 0x192   : > { %vm1147_vm4 = vcmp.eq.s32.totalorder %v5513_v60, %v1107_v63  ;;  %vm1145_vm5 = vcmp.eq.s32.totalorder %v5513_v60, %v1101_v0 }
 0x193   : > { %v5524_v4 = vsel %vm1147_vm4, 1.0, %v6686_v1  ;;  %v5527_v5 = vsel %vm1145_vm5, 1.0, %v6686_v1 }
 0x194   : > { %v1233_v6 = vpack.c.bf16 %v5524_v4, %v5520_v2  ;;  %v1232_v7 = vpack.c.bf16 %v5527_v5, %v4043_v3 }
 0x195   : > { %v1113_v8 = vpop.permute.xlu1 %1112  ;;  %v1110_v9 = vpop.permute.xlu0 %1109 }
 0x196   : > { %vm1149_vm7 = vcmp.eq.s32.totalorder %v5513_v60, %v1113_v8  ;;  %vm1148_vm8 = vcmp.eq.s32.totalorder %v5513_v60, %v1110_v9  ;;  %4426 = vmatprep.mubr.msk.bf16.mxu0 %vm1242_vm6, %v1232_v7 }
 0x197   : > { %v5536_v11 = vsel %vm1149_vm7, 1.0, %v6686_v1  ;;  %v5539_v12 = vsel %vm1148_vm8, 1.0, %v6686_v1  ;;  %4427 = vmatmul.mubr.msk.bf16.vlgmr.msra.gmra.mrb[0].mxu0 %vm1242_vm6, %v1233_v6 }
 0x198   : > { %v1234_v13 = vpack.c.bf16 %v5536_v11, %v5539_v12  ;;  %4723 = vmatpush3.bf16.msra.mxu0 %v5490_v40 }
 0x199   : > { %v1119_v14 = vpop.permute.xlu1 %1118  ;;  %v1116_v15 = vpop.permute.xlu0 %1115  ;;  %4498 = vmatprep.subr.bf16.mxu0 %v1240_v10 }
 0x19a   : > { %vm1151_vm9 = vcmp.eq.s32.totalorder %v5513_v60, %v1119_v14  ;;  %vm1150_vm10 = vcmp.eq.s32.totalorder %v5513_v60, %v1116_v15  ;;  %4430 = vmatprep.mubr.msk.bf16.mxu0 %vm1242_vm6, %v1234_v13 }
 0x19b   : > { %v5549_v16 = vsel %vm1151_vm9, 1.0, %v6686_v1  ;;  %v5552_v17 = vsel %vm1150_vm10, 1.0, %v6686_v1 }
 0x19c   : > { %v1235_v18 = vpack.c.bf16 %v5549_v16, %v5552_v17 }
 0x19d   : > { %v1125_v19 = vpop.permute.xlu1 %1124  ;;  %v1122_v20 = vpop.permute.xlu0 %1121 }
 0x19e   : > { %vm1153_vm11 = vcmp.eq.s32.totalorder %v5513_v60, %v1125_v19  ;;  %vm1152_vm12 = vcmp.eq.s32.totalorder %v5513_v60, %v1122_v20 }
 0x19f   : > { %v5559_v21 = vsel %vm1153_vm11, 1.0, %v6686_v1  ;;  %v5562_v22 = vsel %vm1152_vm12, 1.0, %v6686_v1  ;;  %4431 = vmatmul.mubr.msk.bf16.gmra.mrb[4].mxu0 %vm1242_vm6, %v1235_v18 }
 0x1a0   : > { %v1236_v23 = vpack.c.bf16 %v5559_v21, %v5562_v22 }
 0x1a1   : > { %v1137_v24 = vpop.permute.xlu1 %1136  ;;  %v1134_v25 = vpop.permute.xlu0 %1133 }
 0x1a2   : > { %vm1157_vm13 = vcmp.eq.s32.totalorder %v5513_v60, %v1137_v24  ;;  %vm1156_vm14 = vcmp.eq.s32.totalorder %v5513_v60, %v1134_v25  ;;  %4434 = vmatprep.mubr.msk.bf16.mxu0 %vm1242_vm6, %v1236_v23 }
 0x1a3   : > { %v5571_v26 = vsel %vm1157_vm13, 1.0, %v6686_v1  ;;  %v5574_v27 = vsel %vm1156_vm14, 1.0, %v6686_v1 }
 0x1a4   : > { %v1238_v28 = vpack.c.bf16 %v5571_v26, %v5574_v27 }
 0x1a5   : > { %v1131_v29 = vpop.permute.xlu1 %1130  ;;  %v1128_v30 = vpop.permute.xlu0 %1127 }
 0x1a6   : > { %vm1155_vm15 = vcmp.eq.s32.totalorder %v5513_v60, %v1131_v29  ;;  %vm1154_vm0 = vcmp.eq.s32.totalorder %v5513_v60, %v1128_v30  ;;  %4438 = vmatprep.mubr.msk.bf16.mxu1 %vm1242_vm6, %v1238_v28 }
 0x1a7   : > { %v5582_v31 = vsel %vm1155_vm15, 1.0, %v6686_v1  ;;  %v5585_v32 = vsel %vm1154_vm0, 1.0, %v6686_v1 }
 0x1a8   : > { %v1237_v33 = vpack.c.bf16 %v5582_v31, %v5585_v32 }
 0x1a9   : > { %v1143_v34 = vpop.permute.xlu1 %1142  ;;  %v1140_v35 = vpop.permute.xlu0 %1139 }
 0x1aa   : > { %vm1159_vm1 = vcmp.eq.s32.totalorder %v5513_v60, %v1143_v34  ;;  %vm1158_vm2 = vcmp.eq.s32.totalorder %v5513_v60, %v1140_v35  ;;  %4435 = vmatmul.mubr.msk.bf16.gmra.mrb[8].mxu0 %vm1242_vm6, %v1237_v33 }
 0x1ab   : > { %v5593_v36 = vsel %vm1159_vm1, 1.0, %v6686_v1  ;;  %v5596_v37 = vsel %vm1158_vm2, 1.0, %v6686_v1  ;;  %4474 = vmatprep.mubr.msk.f32.mxu0 %vm1242_vm6, %v4043_v3 }
 0x1ac   : > { %v1239_v38 = vpack.c.bf16 %v5593_v36, %v5596_v37 }
 0x1ad   : > { %v1037_v39 = vpop.permute.xlu1 %1036  ;;  %v1034_v41 = vpop.permute.xlu0 %1033 }
 0x1ae   : > { %vm1080_vm3 = vcmp.eq.s32.totalorder %v5513_v60, %v1034_v41  ;;  %4439 = vmatmul.mubr.msk.bf16.vlgmr.msra.gmra.mrb[0].mxu1 %vm1242_vm6, %v1239_v38  ;;  %vm1081_vm4 = vcmp.eq.s32.totalorder %v5513_v60, %v1037_v39 }
 0x1af   : > { %v5604_v42 = vsel %vm1080_vm3, 1.0, %v6686_v1  ;;  %4719 = vmatpush3.bf16.msra.mxu1 %v5490_v40  ;;  %v5616_v45 = vsel %vm1081_vm4, 1.0, %v6686_v1  ;;  %vm1784_vm4 = vcmask 23552  }
 0x1b0   : > { %4446 = vmatprep.mubr.msk.f32.mxu1 %vm1242_vm6, %v5604_v42  ;;  %v1192_v7 = vpack.c.bf16 %v5616_v45, %v5604_v42 }
 0x1b1   : > { %v1043_v43 = vpop.permute.xlu1 %1042  ;;  %v1040_v44 = vpop.permute.xlu0 %1039 }
 0x1b2   : > { %4475 = vmatmul.mubr.msk.f32.vlgmr.msra.gmra.mrb[12].mxu0 %vm1242_vm6, %v5527_v5  ;;  %vm1082_vm5 = vcmp.eq.s32.totalorder %v5513_v60, %v1040_v44  ;;  %vm1083_vm7 = vcmp.eq.s32.totalorder %v5513_v60, %v1043_v43 }
 0x1b3   : > { %4477 = vmatprep.mubr.msk.f32.mxu0 %vm1242_vm6, %v5520_v2  ;;  %4499 = vmatpush3.bf16.msra.mxu0 %v1240_v10  ;;  %v5620_v47 = vsel %vm1082_vm5, 1.0, %v6686_v1  ;;  %v5632_v48 = vsel %vm1083_vm7, 1.0, %v6686_v1  ;;  %vm5261_vm5 = vmmov 0  }
 0x1b4   : > { %v1193_v10 = vpack.c.bf16 %v5632_v48, %v5620_v47 }
 0x1b5   : > { %v1049_v40 = vpop.permute.xlu1 %1048  ;;  %v1046_v46 = vpop.permute.xlu0 %1045 }
 0x1b6   : > { %4447 = vmatmul.mubr.msk.f32.vlgmr.msra.gmra.mrb[4].mxu1 %vm1242_vm6, %v5616_v45  ;;  %4478 = vmatmul.mubr.msk.f32.gmra.mrb[14].mxu0 %vm1242_vm6, %v5524_v4  ;;  %vm1084_vm8 = vcmp.eq.s32.totalorder %v5513_v60, %v1046_v46  ;;  %vm1085_vm9 = vcmp.eq.s32.totalorder %v5513_v60, %v1049_v40 }
 0x1b7   : > { %4449 = vmatprep.mubr.msk.f32.mxu1 %vm1242_vm6, %v5620_v47  ;;  %4480 = vmatprep.mubr.msk.f32.mxu0 %vm1242_vm6, %v5539_v12  ;;  %v4031_v51 = vsel %vm1084_vm8, 1.0, %v6686_v1  ;;  %v4032_v52 = vsel %vm1085_vm9, 1.0, %v6686_v1 }
 0x1b9   : > { %v1055_v49 = vpop.permute.xlu1 %1054  ;;  %v1052_v50 = vpop.permute.xlu0 %1051 }
 0x1ba   : > { %4450 = vmatmul.mubr.msk.f32.gmra.mrb[6].mxu1 %vm1242_vm6, %v5632_v48  ;;  %4481 = vmatmul.mubr.msk.f32.gmra.mrb[16].mxu0 %vm1242_vm6, %v5536_v11  ;;  %vm1086_vm10 = vcmp.eq.s32.totalorder %v5513_v60, %v1052_v50  ;;  %vm1087_vm11 = vcmp.eq.s32.totalorder %v5513_v60, %v1055_v49  ;;  %v1194_v11 = vpack.c.bf16 %v4032_v52, %v4031_v51 }
 0x1bb   : > { %4452 = vmatprep.mubr.msk.f32.mxu1 %vm1242_vm6, %v4031_v51  ;;  %4483 = vmatprep.mubr.msk.f32.mxu0 %vm1242_vm6, %v5552_v17  ;;  %v4033_v55 = vsel %vm1086_vm10, 1.0, %v6686_v1  ;;  %v4034_v56 = vsel %vm1087_vm11, 1.0, %v6686_v1  ;;  %vm3570_vm10 = vcmask 31744  }
 0x1bd   : > { %v1061_v53 = vpop.permute.xlu1 %1060  ;;  %v1058_v54 = vpop.permute.xlu0 %1057 }
 0x1be   : > { %4453 = vmatmul.mubr.msk.f32.gmra.mrb[8].mxu1 %vm1242_vm6, %v4032_v52  ;;  %4484 = vmatmul.mubr.msk.f32.gmra.mrb[18].mxu0 %vm1242_vm6, %v5549_v16  ;;  %vm1088_vm12 = vcmp.eq.s32.totalorder %v5513_v60, %v1058_v54  ;;  %vm1089_vm13 = vcmp.eq.s32.totalorder %v5513_v60, %v1061_v53 }
 0x1bf   : > { %4455 = vmatprep.mubr.msk.f32.mxu1 %vm1242_vm6, %v4033_v55  ;;  %4486 = vmatprep.mubr.msk.f32.mxu0 %vm1242_vm6, %v5562_v22  ;;  %v4035_v61 = vsel %vm1088_vm12, 1.0, %v6686_v1  ;;  %v4036_v62 = vsel %vm1089_vm13, 1.0, %v6686_v1 }
 0x1c0   : > { %v1196_v13 = vpack.c.bf16 %v4036_v62, %v4035_v61 }
 0x1c1   : > { %v1067_v57 = vpop.permute.xlu1 %1066  ;;  %v1064_v58 = vpop.permute.xlu0 %1063 }
 0x1c2   : > { %4456 = vmatmul.mubr.msk.f32.gmra.mrb[10].mxu1 %vm1242_vm6, %v4034_v56  ;;  %4487 = vmatmul.mubr.msk.f32.gmra.mrb[20].mxu0 %vm1242_vm6, %v5559_v21  ;;  %vm1090_vm14 = vcmp.eq.s32.totalorder %v5513_v60, %v1064_v58  ;;  %vm1091_vm15 = vcmp.eq.s32.totalorder %v5513_v60, %v1067_v57 }
 0x1c3   : > { %4458 = vmatprep.mubr.msk.f32.mxu1 %vm1242_vm6, %v4035_v61  ;;  %4489 = vmatprep.mubr.msk.f32.mxu0 %vm1242_vm6, %v5585_v32  ;;  %v4037_v2 = vsel %vm1090_vm14, 1.0, %v6686_v1  ;;  %v4038_v3 = vsel %vm1091_vm15, 1.0, %v6686_v1 }
 0x1c4   : > { %v1197_v14 = vpack.c.bf16 %v4038_v3, %v4037_v2 }
 0x1c5   : > { %v1073_v63 = vpop.permute.xlu1 %1072  ;;  %v1070_v0 = vpop.permute.xlu0 %1069 }
 0x1c6   : > { %4459 = vmatmul.mubr.msk.f32.gmra.mrb[12].mxu1 %vm1242_vm6, %v4036_v62  ;;  %4490 = vmatmul.mubr.msk.f32.gmra.mrb[22].mxu0 %vm1242_vm6, %v5582_v31  ;;  %vm1092_vm0 = vcmp.eq.s32.totalorder %v5513_v60, %v1070_v0  ;;  %vm1093_vm1 = vcmp.eq.s32.totalorder %v5513_v60, %v1073_v63 }
 0x1c7   : > { %4461 = vmatprep.mubr.msk.f32.mxu1 %vm1242_vm6, %v4037_v2  ;;  %4492 = vmatprep.mubr.msk.f32.mxu0 %vm1242_vm6, %v5574_v27  ;;  %v4039_v5 = vsel %vm1092_vm0, 1.0, %v6686_v1  ;;  %v4040_v8 = vsel %vm1093_vm1, 1.0, %v6686_v1 }
 0x1c8   : > { %v1198_v15 = vpack.c.bf16 %v4040_v8, %v4039_v5 }
 0x1c9   : > { %v1076_v4 = vpop.permute.xlu0 %1075  ;;  %v1079_v6 = vpop.permute.xlu1 %1078 }
 0x1ca   : > { %4462 = vmatmul.mubr.msk.f32.gmra.mrb[14].mxu1 %vm1242_vm6, %v4038_v3  ;;  %4493 = vmatmul.mubr.msk.f32.gmra.mrb[24].mxu0 %vm1242_vm6, %v5571_v26  ;;  %vm1094_vm2 = vcmp.eq.s32.totalorder %v5513_v60, %v1076_v4  ;;  %vm1095_vm3 = vcmp.eq.s32.totalorder %v5513_v60, %v1079_v6  ;;  %v1195_v60 = vpack.c.bf16 %v4034_v56, %v4033_v55 }
 0x1cb   : > { %4464 = vmatprep.mubr.msk.f32.mxu1 %vm1242_vm6, %v4039_v5  ;;  %4495 = vmatprep.mubr.msk.f32.mxu0 %vm1242_vm6, %v5596_v37  ;;  %v4041_v9 = vsel %vm1094_vm2, 1.0, %v6686_v1  ;;  %v4042_v12 = vsel %vm1095_vm3, 1.0, %v6686_v1 }
 0x1cc   : > { %v1199_v16 = vpack.c.bf16 %v4042_v12, %v4041_v9 }
 0x1ce   : > { %4465 = vmatmul.mubr.msk.f32.gmra.mrb[16].mxu1 %vm1242_vm6, %v4040_v8  ;;  %4496 = vmatmul.mubr.msk.f32.gmra.mrb[26].mxu0 %vm1242_vm6, %v5593_v36 }
 0x1cf   : > { %4467 = vmatprep.mubr.msk.f32.mxu1 %vm1242_vm6, %v4041_v9  ;;  %4500 = vmatprep.mubr.msk.bf16.mxu0 %vm1242_vm6, %v1192_v7 }
 0x1d2   : > { %4468 = vmatmul.mubr.msk.f32.gmra.mrb[18].mxu1 %vm1242_vm6, %v4042_v12  ;;  %4501 = vmatmul.mubr.msk.bf16.vlgmr.msra.gmra.mrb[0].mxu0 %vm1242_vm6, %v1193_v10 }
 0x1d3   : > { %4504 = vmatprep.mubr.msk.bf16.mxu0 %vm1242_vm6, %v1194_v11 }
 0x1da   : > { %4505 = vmatmul.mubr.msk.bf16.gmra.mrb[4].mxu0 %vm1242_vm6, %v1195_v60 }
 0x1db   : > { %4508 = vmatprep.mubr.msk.bf16.mxu0 %vm1242_vm6, %v1196_v13 }
 0x1e2   : > { %4509 = vmatmul.mubr.msk.bf16.gmra.mrb[8].mxu0 %vm1242_vm6, %v1197_v14 }
 0x1e3   : > { %4512 = vmatprep.mubr.msk.bf16.mxu0 %vm1242_vm6, %v1198_v15 }
 0x1ea   : > { %4513 = vmatmul.mubr.msk.bf16.gmra.mrb[28].mxu0 %vm1242_vm6, %v1199_v16 }
 0x281   : > { %v5705_v17 = vpop.f32.mrb[0].mxu1 }
 0x282   : > { %v5707_v18 = vpop.f32.mrb[1].mxu1 }
 0x283   : > { %v5709_v19 = vpop.f32.mrb[2].mxu1 }
 0x284   : > { %v5711_v20 = vpop.f32.mrb[3].mxu1 }
 0x285   : > { %v4476_v21 = vpop.f32.mrb[12].mxu0 }
 0x286   : > { %v1673_v22 = vpop.f32.mrb[13].mxu0 }
 0x289   : > { %v4448_v23 = vpop.f32.mrb[4].mxu1  ;;  %v4479_v24 = vpop.f32.mrb[14].mxu0 }
 0x28a   : > { %v5713_v25 = vsub.f32 %v4448_v23, %v4476_v21  ;;  %v1480_v26 = vpop.f32.mrb[5].mxu1  ;;  %v1683_v27 = vpop.f32.mrb[15].mxu0 }
 0x28b   : > { %v5715_v28 = vsub.f32 %v1480_v26, %v1673_v22 }
 0x28c   : > { %v1769_v29 = vmul.f32 %v5713_v25, %v5713_v25 }
 0x28d   : > { %v4451_v30 = vpop.f32.mrb[6].mxu1  ;;  %v4482_v31 = vpop.f32.mrb[16].mxu0  ;;  %v1768_v32 = vmul.f32 %v5715_v28, %v5715_v28 }
 0x28e   : > { %v5721_v33 = vsub.f32 %v4451_v30, %v4479_v24  ;;  %v1490_v34 = vpop.f32.mrb[7].mxu1  ;;  %v1693_v35 = vpop.f32.mrb[17].mxu0  ;;  %v1788_v36 = vsel %vm1784_vm4, %v1769_v29, 0.0 }
 0x28f   : > { %v5724_v37 = vsub.f32 %v1490_v34, %v1683_v27  ;;  %1789 = vadd.xlane.f32.xlu1 %v1788_v36  ;;  %v1785_v38 = vsel %vm1784_vm4, %v1768_v32, 0.0 }
 0x290   : > { %1786 = vadd.xlane.f32.xlu0 %v1785_v38  ;;  %v1771_v39 = vmul.f32 %v5721_v33, %v5721_v33 }
 0x291   : > { %v4454_v41 = vpop.f32.mrb[8].mxu1  ;;  %v4485_v42 = vpop.f32.mrb[18].mxu0  ;;  %v1770_v47 = vmul.f32 %v5724_v37, %v5724_v37 }
 0x292   : > { %v5729_v43 = vsub.f32 %v4454_v41, %v4482_v31  ;;  %v1500_v44 = vpop.f32.mrb[9].mxu1  ;;  %v1703_v45 = vpop.f32.mrb[19].mxu0  ;;  %v1794_v40 = vsel %vm1784_vm4, %v1771_v39, 0.0 }
 0x293   : > { %v5732_v46 = vsub.f32 %v1500_v44, %v1693_v35  ;;  %v1791_v55 = vsel %vm1784_vm4, %v1770_v47, 0.0 }
 0x294   : > { %1795 = vadd.xlane.f32.xlu0 %v1794_v40  ;;  %v1773_v57 = vmul.f32 %v5729_v43, %v5729_v43 }
 0x295   : > { %v4457_v48 = vpop.f32.mrb[10].mxu1  ;;  %v4488_v49 = vpop.f32.mrb[20].mxu0  ;;  %v1772_v50 = vmul.f32 %v5732_v46, %v5732_v46 }
 0x296   : > { %v5738_v51 = vsub.f32 %v4457_v48, %v4485_v42  ;;  %v1510_v52 = vpop.f32.mrb[11].mxu1  ;;  %v1713_v53 = vpop.f32.mrb[21].mxu0  ;;  %v1800_v4 = vsel %vm1784_vm4, %v1773_v57, 0.0 }
 0x297   : > { %v5740_v54 = vsub.f32 %v1510_v52, %v1703_v45  ;;  %v1797_v56 = vsel %vm1784_vm4, %v1772_v50, 0.0 }
 0x298   : > { %6725 = vst [vmem:[#allocation11_spill] sm:$0xff] %v5738_v51  ;;  %1792 = vadd.xlane.f32.xlu0 %v1791_v55  ;;  %1798 = vadd.xlane.f32.xlu1 %v1797_v56  ;;  %v1775_v6 = vmul.f32 %v5738_v51, %v5738_v51 }
 0x299   : > { %6726 = vst [vmem:[#allocation12_spill] sm:$0xff] %v5740_v54  ;;  %v4460_v58 = vpop.f32.mrb[12].mxu1  ;;  %v4491_v61 = vpop.f32.mrb[22].mxu0  ;;  %v1774_v62 = vmul.f32 %v5740_v54, %v5740_v54 }
 0x29a   : > { %v5748_v63 = vsub.f32 %v4460_v58, %v4488_v49  ;;  %v1520_v0 = vpop.f32.mrb[13].mxu1  ;;  %v1723_v2 = vpop.f32.mrb[23].mxu0  ;;  %v1806_v13 = vsel %vm1784_vm4, %v1775_v6, 0.0  ;;  %v4828_v6 = vld [vmem:[%s6735_s4 + $0x10] sm:$0xff]  }
 0x29b   : > { %v5750_v3 = vsub.f32 %v1520_v0, %v1713_v53  ;;  %v1803_v5 = vsel %vm1784_vm4, %v1774_v62, 0.0  ;;  %v4826_v53 = vld [vmem:[%s6735_s4] sm:$0xff]  }
 0x29c   : > { %6727 = vst [vmem:[#allocation13_spill] sm:$0xff] %v5748_v63  ;;  %1801 = vadd.xlane.f32.xlu0 %v1800_v4  ;;  %1804 = vadd.xlane.f32.xlu1 %v1803_v5  ;;  %v1777_v15 = vmul.f32 %v5748_v63, %v5748_v63 }
 0x29d   : > { %6728 = vst [vmem:[#allocation14_spill] sm:$0xff] %v5750_v3  ;;  %v4463_v7 = vpop.f32.mrb[14].mxu1  ;;  %v4494_v8 = vpop.f32.mrb[24].mxu0  ;;  %v1776_v9 = vmul.f32 %v5750_v3, %v5750_v3  ;;  %4516 = vmatprep.subr.bf16.mxu1 %v4826_v53 }
 0x29e   : > { %v5758_v10 = vsub.f32 %v4463_v7, %v4491_v61  ;;  %v1530_v11 = vpop.f32.mrb[15].mxu1  ;;  %v1733_v12 = vpop.f32.mrb[25].mxu0  ;;  %v1812_v29 = vsel %vm1784_vm4, %v1777_v15, 0.0  ;;  %4517 = vmatpush3.bf16.msra.mxu1 %v4826_v53  ;;  %v4827_v61 = vld [vmem:[%s6735_s4 + $0x8] sm:$0xff]   ;;  %v4829_v15 = vld [vmem:[%s6735_s4 + $0x18] sm:$0xff]  }
 0x29f   : > { %v5760_v60 = vsub.f32 %v1530_v11, %v1723_v2  ;;  %v1809_v14 = vsel %vm1784_vm4, %v1776_v9, 0.0  ;;  %4518 = vmatprep.subr.bf16.mxu1 %v4827_v61 }
 0x2a0   : > { %6729 = vst [vmem:[#allocation15_spill] sm:$0xff] %v5758_v10  ;;  %1807 = vadd.xlane.f32.xlu0 %v1806_v13  ;;  %1810 = vadd.xlane.f32.xlu1 %v1809_v14  ;;  %v1779_v31 = vmul.f32 %v5758_v10, %v5758_v10 }
 0x2a1   : > { %6730 = vst [vmem:[#allocation16_spill] sm:$0xff] %v5760_v60  ;;  %v4466_v16 = vpop.f32.mrb[16].mxu1  ;;  %v4497_v21 = vpop.f32.mrb[26].mxu0  ;;  %v1778_v22 = vmul.f32 %v5760_v60, %v5760_v60 }
 0x2a2   : > { %v5768_v23 = vsub.f32 %v4466_v16, %v4494_v8  ;;  %v1540_v24 = vpop.f32.mrb[17].mxu1  ;;  %v1743_v26 = vpop.f32.mrb[27].mxu0  ;;  %v1818_v44 = vsel %vm1784_vm4, %v1779_v31, 0.0  ;;  %4519 = vmatpush3.bf16.msra.mxu1 %v4827_v61 }
 0x2a3   : > { %v5770_v27 = vsub.f32 %v1540_v24, %v1733_v12  ;;  %v1815_v30 = vsel %vm1784_vm4, %v1778_v22, 0.0  ;;  %4520 = vmatprep.subr.bf16.mxu1 %v4828_v6 }
 0x2a4   : > { %6731 = vst [vmem:[#allocation17_spill] sm:$0xff] %v5768_v23  ;;  %1813 = vadd.xlane.f32.xlu0 %v1812_v29  ;;  %1816 = vadd.xlane.f32.xlu1 %v1815_v30  ;;  %v1781_v40 = vmul.f32 %v5768_v23, %v5768_v23  ;;  %v5863_v29 = vld [vmem:[%s6737_s1] ss:$0 sm:$0xff] }
 0x2a5   : > { %6732 = vst [vmem:[#allocation18_spill] sm:$0xff] %v5770_v27  ;;  %v4469_v32 = vpop.f32.mrb[18].mxu1  ;;  %v5776_v34 = vpop.f32.mrb[0].mxu0  ;;  %v1780_v35 = vmul.f32 %v5770_v27, %v5770_v27 }
 0x2a6   : > { %v5780_v36 = vsub.f32 %v4469_v32, %v4497_v21  ;;  %v1550_v38 = vpop.f32.mrb[19].mxu1  ;;  %v5782_v39 = vpop.f32.mrb[1].mxu0  ;;  %v1824_v49 = vsel %vm1784_vm4, %v1781_v40, 0.0  ;;  %4521 = vmatpush3.bf16.msra.mxu1 %v4828_v6  ;;  %v5852_v21 = vld [vmem:[%s6736_s5] ss:$0 sm:$0xff] }
 0x2a7   : > { %v5784_v41 = vsub.f32 %v1550_v38, %v1743_v26  ;;  %v5786_v42 = vpop.f32.mrb[2].mxu0  ;;  %v1821_v45 = vsel %vm1784_vm4, %v1780_v35, 0.0  ;;  %4522 = vmatprep.subr.bf16.mxu1 %v4829_v15 }
 0x2a8   : > { %6733 = vst [vmem:[#allocation19_spill] sm:$0xff] %v5780_v36  ;;  %v1942_v47 = vpop.f32.mrb[3].mxu0  ;;  %1819 = vadd.xlane.f32.xlu0 %v1818_v44  ;;  %1822 = vadd.xlane.f32.xlu1 %v1821_v45  ;;  %v1783_v52 = vmul.f32 %v5780_v36, %v5780_v36 }
 0x2a9   : > { %6734 = vst [vmem:[#allocation20_spill] sm:$0xff] %v5784_v41  ;;  %v1782_v48 = vmul.f32 %v5784_v41, %v5784_v41 }
 0x2aa   : > { %v1830_v58 = vsel %vm1784_vm4, %v1783_v52, 0.0  ;;  %4523 = vmatpush3.bf16.msra.mxu1 %v4829_v15 }
 0x2ab   : > { %v1827_v50 = vsel %vm1784_vm4, %v1782_v48, 0.0 }
 0x2ac   : > { %1825 = vadd.xlane.f32.xlu0 %v1824_v49  ;;  %1828 = vadd.xlane.f32.xlu1 %v1827_v50 }
 0x2ad   : > { %v5801_v55 = vpop.f32.mrb[4].mxu0 }
 0x2ae   : > { %v1955_v56 = vpop.f32.mrb[5].mxu0 }
 0x2af   : > { %v5803_v57 = vpop.f32.mrb[6].mxu0 }
 0x2b0   : > { %v5809_v62 = vpop.f32.mrb[7].mxu0  ;;  %1831 = vadd.xlane.f32.xlu0 %v1830_v58 }
 0x2b5   : > { %v5811_v0 = vpop.f32.mrb[8].mxu0 }
 0x2b6   : > { %v5813_v2 = vpop.f32.mrb[9].mxu0 }
 0x2b7   : > { %v5815_v4 = vpop.f32.mrb[10].mxu0 }
 0x2b8   : > { %v5817_v5 = vpop.f32.mrb[11].mxu0 }
 0x2bd   : > { %v4514_v7 = vpop.f32.mrb[28].mxu0 }
 0x2be   : > { %v5823_v8 = vadd.f32 %v4514_v7, %v5705_v17  ;;  %v1987_v9 = vpop.f32.mrb[29].mxu0  ;;  %v4830_v17 = vld [vmem:[%s6735_s4 + $0x20] sm:$0xff]  }
 0x2bf   : > { %v5826_v11 = vadd.f32 %v1987_v9, %v5707_v18  ;;  %v4515_v12 = vpop.f32.mrb[30].mxu0  ;;  %4524 = vmatprep.subr.bf16.mxu1 %v4830_v17  ;;  %v4831_v18 = vld [vmem:[%s6735_s4 + $0x28] sm:$0xff]  }
 0x2c0   : > { %v5829_v13 = vadd.f32 %v4515_v12, %v5709_v19  ;;  %v1990_v14 = vpop.f32.mrb[31].mxu0  ;;  %4525 = vmatpush3.bf16.msra.mxu1 %v4830_v17  ;;  %v4832_v19 = vld [vmem:[%s6735_s4 + $0x30] sm:$0xff]  }
 0x2c1   : > { %v5835_v16 = vadd.f32 %v1990_v14, %v5711_v20  ;;  %4526 = vmatprep.subr.bf16.mxu1 %v4831_v18  ;;  %v4833_v20 = vld [vmem:[%s6735_s4 + $0x38] sm:$0xff]  }
 0x2c4   : > { %4527 = vmatpush3.bf16.msra.mxu1 %v4831_v18 }
 0x2c5   : > { %4528 = vmatprep.subr.bf16.mxu1 %v4832_v19 }
 0x2c8   : > { %4529 = vmatpush3.bf16.msra.mxu1 %v4832_v19 }
 0x2c9   : > { %4530 = vmatprep.subr.bf16.mxu1 %v4833_v20 }
 0x2cc   : > { %4531 = vmatpush3.bf16.msra.mxu1 %v4833_v20 }
 0x31c   : > { %v5854_v22 = vpop.xlane.xlu1 %1789 }
 0x31d   : > { %v2010_v24 = vmul.f32 %v5852_v21, %v5854_v22  ;;  %v5858_v26 = vpop.xlane.xlu0 %1786 }
 0x31e   : > { %v2009_v30 = vmul.f32 %v5852_v21, %v5858_v26 }
 0x31f   : > { %v2026_v31 = vadd.f32 %v2010_v24, %v1942_v47 }
 0x320   : > { %v2025_v32 = vadd.f32 %v2009_v30, %v5782_v39 }
 0x321   : > { %v5869_v35 = vadd.f32 %v5863_v29, %v2026_v31  ;;  %v5871_v38 = vpop.xlane.xlu0 %1795 }
 0x322   : > { %v5874_v44 = vadd.f32 %v5863_v29, %v2025_v32  ;;  %v2012_v45 = vmul.f32 %v5852_v21, %v5871_v38 }
 0x323   : > { %v4110_v40 = vmul.f32 -1.442695, %v5869_v35 }
 0x324   : > { %v4109_v48 = vmul.f32 -1.442695, %v5874_v44  ;;  %v2028_v49 = vadd.f32 %v5786_v42, %v2012_v45 }
 0x325   : > { %4850 = vpow2.f32 %v4110_v40  ;;  %v5881_v47 = vpop.xlane.xlu1 %1798  ;;  %v5883_v39 = vpop.xlane.xlu0 %1792 }
 0x326   : > { %4852 = vpow2.f32 %v4109_v48  ;;  %v5886_v50 = vadd.f32 %v5863_v29, %v2028_v49  ;;  %v2013_v52 = vmul.f32 %v5852_v21, %v5881_v47  ;;  %v2011_v53 = vmul.f32 %v5852_v21, %v5883_v39 }
 0x328   : > { %v4112_v58 = vmul.f32 -1.442695, %v5886_v50  ;;  %v2029_v61 = vadd.f32 %v2013_v52, %v1955_v56  ;;  %v2027_v42 = vadd.f32 %v5776_v34, %v2011_v53 }
 0x329   : > { %v5894_v6 = vpop.xlane.xlu1 %1804  ;;  %v5896_v7 = vpop.xlane.xlu0 %1801 }
 0x32a   : > { %4854 = vpow2.f32 %v4112_v58  ;;  %v5899_v9 = vadd.f32 %v5863_v29, %v2029_v61  ;;  %v2015_v12 = vmul.f32 %v5852_v21, %v5894_v6  ;;  %v5904_v14 = vadd.f32 %v5863_v29, %v2027_v42 }
 0x32b   : > { %v2014_v15 = vmul.f32 %v5852_v21, %v5896_v7 }
 0x32c   : > { %v4113_v56 = vmul.f32 -1.442695, %v5899_v9  ;;  %v2031_v34 = vadd.f32 %v5801_v55, %v2015_v12  ;;  %v4111_v17 = vmul.f32 -1.442695, %v5904_v14 }
 0x32d   : > { %v2030_v18 = vadd.f32 %v2014_v15, %v5809_v62  ;;  %v5912_v19 = vpop.xlane.xlu1 %1810  ;;  %v5914_v20 = vpop.xlane.xlu0 %1807 }
 0x32e   : > { %4856 = vpow2.f32 %v4113_v56  ;;  %v5917_v24 = vadd.f32 %v5863_v29, %v2031_v34  ;;  %v2017_v30 = vmul.f32 %v5852_v21, %v5912_v19  ;;  %v2016_v55 = vmul.f32 %v5852_v21, %v5914_v20 }
 0x32f   : > { %v4851_v31 = vpop.eup %4850  ;;  %4858 = vpow2.f32 %v4111_v17  ;;  %v5922_v32 = vadd.f32 %v5863_v29, %v2030_v18 }
 0x330   : > { %v4853_v62 = vpop.eup %4852  ;;  %v2113_v45 = vadd.f32 1.0, %v4851_v31  ;;  %v4115_v40 = vmul.f32 -1.442695, %v5917_v24  ;;  %v2033_v48 = vadd.f32 %v2017_v30, %v5813_v2  ;;  %v2032_v53 = vadd.f32 %v5803_v57, %v2016_v55 }
 0x331   : > { %v2112_v49 = vadd.f32 1.0, %v4853_v62  ;;  %v4114_v52 = vmul.f32 -1.442695, %v5922_v32  ;;  %v5930_v58 = vpop.xlane.xlu1 %1816  ;;  %v5932_v61 = vpop.xlane.xlu0 %1813 }
 0x332   : > { %4860 = vrcp.f32 %v2113_v45  ;;  %v5935_v42 = vadd.f32 %v5863_v29, %v2033_v48  ;;  %v2019_v12 = vmul.f32 %v5852_v21, %v5930_v58  ;;  %v5940_v15 = vadd.f32 %v5863_v29, %v2032_v53 }
 0x333   : > { %4862 = vrcp.f32 %v2112_v49  ;;  %v2018_v2 = vmul.f32 %v5852_v21, %v5932_v61 }
 0x334   : > { %v4855_v56 = vpop.eup %4854  ;;  %4864 = vpow2.f32 %v4115_v40  ;;  %v4117_v57 = vmul.f32 -1.442695, %v5935_v42  ;;  %v2035_v34 = vadd.f32 %v5811_v0, %v2019_v12  ;;  %v4116_v17 = vmul.f32 -1.442695, %v5940_v15 }
 0x335   : > { %4866 = vpow2.f32 %v4114_v52  ;;  %v2034_v18 = vadd.f32 %v2018_v2, %v5817_v5  ;;  %v5948_v30 = vpop.xlane.xlu1 %1822  ;;  %v5950_v31 = vpop.xlane.xlu0 %1819  ;;  %v2115_v55 = vadd.f32 1.0, %v4855_v56 }
 0x336   : > { %6738 = vst [vmem:[#allocation21_spill] sm:$0xff] %v5948_v30  ;;  %6739 = vst [vmem:[#allocation22_spill] sm:$0xff] %v5950_v31  ;;  %v2021_v62 = vmul.f32 %v5852_v21, %v5948_v30  ;;  %4868 = vpow2.f32 %v4117_v57  ;;  %v5955_v45 = vadd.f32 %v5863_v29, %v2035_v34  ;;  %v2020_v0 = vmul.f32 %v5852_v21, %v5950_v31 }
 0x337   : > { %v5958_v40 = vadd.f32 %v5863_v29, %v2034_v18  ;;  %4870 = vpow2.f32 %v4116_v17 }
 0x338   : > { %v4857_v48 = vpop.eup %4856  ;;  %v2037_v5 = vadd.f32 %v2021_v62, %v5826_v11  ;;  %4872 = vrcp.f32 %v2115_v55  ;;  %v2036_v56 = vadd.f32 %v5815_v4, %v2020_v0  ;;  %v4119_v57 = vmul.f32 -1.442695, %v5955_v45 }
 0x339   : > { %v4859_v49 = vpop.eup %4858  ;;  %v5963_v52 = vpop.xlane.xlu1 %1828  ;;  %v4118_v2 = vmul.f32 -1.442695, %v5958_v40  ;;  %v2116_v17 = vadd.f32 1.0, %v4857_v48 }
 0x33a   : > { %6740 = vst [vmem:[#allocation23_spill] sm:$0xff] %v5963_v52  ;;  %v5965_v53 = vpop.xlane.xlu0 %1825  ;;  %v2114_v12 = vadd.f32 1.0, %v4859_v49  ;;  %v2023_v34 = vmul.f32 %v5852_v21, %v5963_v52  ;;  %v5973_v11 = vadd.f32 %v5863_v29, %v2037_v5  ;;  %v5982_v1 = vadd.f32 %v5863_v29, %v2036_v56 }
 0x33b   : > { %6741 = vst [vmem:[#allocation24_spill] sm:$0xff] %v5965_v53  ;;  %v2022_v62 = vmul.f32 %v5852_v21, %v5965_v53 }
 0x33c   : > { %v4861_v18 = vpop.eup %4860  ;;  %4874 = vrcp.f32 %v2114_v12  ;;  %v2039_v49 = vadd.f32 %v2023_v34, %v5823_v8  ;;  %v4121_v8 = vmul.f32 -1.442695, %v5973_v11 }
 0x33d   : > { %v4863_v55 = vpop.eup %4862  ;;  %v2161_v4 = vmul.f32 %v4861_v18, %v5869_v35  ;;  %4876 = vpow2.f32 %v4118_v2  ;;  %v2038_v34 = vadd.f32 %v2022_v62, %v5835_v16 }
 0x33e   : > { %v5978_v59 = vpop.xlane.xlu0 %1831  ;;  %v4865_v0 = vpop.eup %4864  ;;  %4878 = vpow2.f32 %v4119_v57  ;;  %v2160_v36 = vmul.f32 %v4863_v55, %v5874_v44  ;;  %v5990_v2 = vadd.f32 %v5863_v29, %v2039_v49  ;;  %v4120_v57 = vmul.f32 -1.442695, %v5982_v1 }
 0x33f   : > { %6742 = vst [vmem:[#allocation25_spill] sm:$0xff] %v5978_v59  ;;  %v4867_v48 = vpop.eup %4866  ;;  %v2118_v12 = vadd.f32 1.0, %v4865_v0  ;;  %v2024_v5 = vmul.f32 %v5852_v21, %v5978_v59  ;;  %4880 = vrcp.f32 %v2116_v17  ;;  %v5995_v55 = vadd.f32 %v5863_v29, %v2038_v34 }
 0x340   : > { %v2117_v41 = vadd.f32 1.0, %v4867_v48  ;;  %v4869_v35 = vpop.eup %4868  ;;  %v2176_v56 = vpack.c.bf16 %v2161_v4, %v2160_v36  ;;  %v4123_v16 = vmul.f32 -1.442695, %v5990_v2 }
 0x341   : > { %v4871_v18 = vpop.eup %4870  ;;  %v2040_v21 = vadd.f32 %v2024_v5, %v5829_v13  ;;  %v2120_v17 = vadd.f32 1.0, %v4869_v35  ;;  %v4122_v13 = vmul.f32 -1.442695, %v5995_v55 }
 0x342   : > { %4882 = vrcp.f32 %v2117_v41  ;;  %v2119_v0 = vadd.f32 1.0, %v4871_v18  ;;  %4532 = vmatprep.mubr.bf16.mxu1 %v2176_v56  ;;  %v4873_v44 = vpop.eup %4872 }
 0x343   : > { %4884 = vrcp.f32 %v2118_v12  ;;  %v2163_v36 = vmul.f32 %v4873_v44, %v5886_v50  ;;  %v2063_v49 = vadd.f32 %v5863_v29, %v2040_v21 }
 0x344   : > { %4886 = vpow2.f32 %v4121_v8 }
 0x345   : > { %4888 = vrcp.f32 %v2119_v0  ;;  %v4124_v34 = vmul.f32 -1.442695, %v2063_v49 }
 0x346   : > { %v4875_v62 = vpop.eup %4874  ;;  %4890 = vpow2.f32 %v4120_v57 }
 0x347   : > { %v2162_v41 = vmul.f32 %v4875_v62, %v5904_v14  ;;  %v4877_v4 = vpop.eup %4876  ;;  %4892 = vrcp.f32 %v2120_v17 }
 0x348   : > { %v4879_v48 = vpop.eup %4878  ;;  %v2121_v5 = vadd.f32 1.0, %v4877_v4  ;;  %4894 = vpow2.f32 %v4123_v16 }
 0x349   : > { %v2177_v12 = vpack.c.bf16 %v2163_v36, %v2162_v41  ;;  %v4881_v8 = vpop.eup %4880  ;;  %v2122_v50 = vadd.f32 1.0, %v4879_v48 }
 0x34a   : > { %4896 = vrcp.f32 %v2121_v5  ;;  %v2164_v14 = vmul.f32 %v4881_v8, %v5899_v9 }
 0x34b   : > { %4533 = vmatmul.mubr.bf16.vlgmr.msra.gmra.mrb[20].mxu1 %v2177_v12  ;;  %4898 = vpow2.f32 %v4122_v13 }
 0x34c   : > { %v4883_v35 = vpop.eup %4882  ;;  %4900 = vpow2.f32 %v4124_v34 }
 0x34d   : > { %v4885_v56 = vpop.eup %4884  ;;  %v2165_v29 = vmul.f32 %v4883_v35, %v5922_v32  ;;  %4902 = vrcp.f32 %v2122_v50 }
 0x34e   : > { %v4887_v18 = vpop.eup %4886  ;;  %v2166_v44 = vmul.f32 %v4885_v56, %v5917_v24 }
 0x34f   : > { %v4889_v57 = vpop.eup %4888  ;;  %v2178_v0 = vpack.c.bf16 %v2165_v29, %v2164_v14  ;;  %v2124_v4 = vadd.f32 1.0, %v4887_v18 }
 0x350   : > { %v4891_v21 = vpop.eup %4890  ;;  %v2167_v17 = vmul.f32 %v4889_v57, %v5940_v15 }
 0x351   : > { %v2123_v16 = vadd.f32 1.0, %v4891_v21  ;;  %4536 = vmatprep.mubr.bf16.mxu1 %v2178_v0  ;;  %v4893_v62 = vpop.eup %4892 }
 0x352   : > { %v2179_v36 = vpack.c.bf16 %v2167_v17, %v2166_v44  ;;  %v4895_v41 = vpop.eup %4894  ;;  %v2168_v48 = vmul.f32 %v4893_v62, %v5935_v42  ;;  %v4840_v62 = vld [vmem:[%s6660_s11 + $0x30] sm:$0xff]  }
 0x353   : > { %4904 = vrcp.f32 %v2123_v16  ;;  %v2126_v13 = vadd.f32 1.0, %v4895_v41  ;;  %v6743_v41 = vmov 0.0  }
 0x354   : > { %4537 = vmatmul.mubr.bf16.gmra.mrb[24].mxu1 %v2179_v36  ;;  %v4897_v9 = vpop.eup %4896  ;;  %4906 = vrcp.f32 %v2124_v4  ;;  %v4841_v36 = vld [vmem:[%s6660_s11 + $0x38] sm:$0xff]   ;;  %v6041_v4 = vld [vmem:[%s6744_s6] ss:$0 sm:$0xff]  ;;  %s6765_s6 = sld [smem:[#allocation38_spill]] (!%p4226_p6) }
 0x355   : > { %v4899_v32 = vpop.eup %4898  ;;  %v2169_v12 = vmul.f32 %v4897_v9, %v5958_v40 }
 0x356   : > { %v2125_v24 = vadd.f32 1.0, %v4899_v32  ;;  %v4901_v15 = vpop.eup %4900 }
 0x357   : > { %v2180_v5 = vpack.c.bf16 %v2169_v12, %v2168_v48  ;;  %v2127_v8 = vadd.f32 1.0, %v4901_v15  ;;  %v4903_v34 = vpop.eup %4902 }
 0x358   : > { %4908 = vrcp.f32 %v2125_v24  ;;  %v2170_v56 = vmul.f32 %v4903_v34, %v5955_v45  ;;  %v4835_v45 = vld [vmem:[%s6660_s11 + $0x8] sm:$0xff]  }
 0x359   : > { %4910 = vrcp.f32 %v2126_v13  ;;  %4540 = vmatprep.mubr.bf16.mxu1 %v2180_v5 }
 0x35a   : > { %4912 = vrcp.f32 %v2127_v8 }
 0x35d   : > { %v4905_v35 = vpop.eup %4904 }
 0x35e   : > { %v2171_v50 = vmul.f32 %v4905_v35, %v5982_v1  ;;  %v4907_v29 = vpop.eup %4906  ;;  %v4834_v1 = vld [vmem:[%s6660_s11] sm:$0xff]  }
 0x35f   : > { %v2172_v18 = vmul.f32 %v4907_v29, %v5973_v11  ;;  %4548 = vmatprep.subr.bf16.mxu1 %v4834_v1  ;;  %v4836_v11 = vld [vmem:[%s6660_s11 + $0x10] sm:$0xff]  }
 0x360   : > { %v2181_v14 = vpack.c.bf16 %v2171_v50, %v2170_v56  ;;  %4549 = vmatpush3.bf16.msra.mxu1 %v4834_v1 }
 0x361   : > { %4550 = vmatprep.subr.bf16.mxu1 %v4835_v45 }
 0x362   : > { %4541 = vmatmul.mubr.bf16.gmra.mrb[28].mxu1 %v2181_v14  ;;  %v4909_v42 = vpop.eup %4908 }
 0x363   : > { %v4911_v40 = vpop.eup %4910  ;;  %v2173_v57 = vmul.f32 %v4909_v42, %v5995_v55  ;;  %v4838_v55 = vld [vmem:[%s6660_s11 + $0x20] sm:$0xff]  }
 0x364   : > { %v4913_v0 = vpop.eup %4912  ;;  %v2174_v44 = vmul.f32 %v4911_v40, %v5990_v2  ;;  %4551 = vmatpush3.bf16.msra.mxu1 %v4835_v45  ;;  %v4837_v2 = vld [vmem:[%s6660_s11 + $0x18] sm:$0xff]  }
 0x365   : > { %v2182_v21 = vpack.c.bf16 %v2173_v57, %v2172_v18  ;;  %v2175_v17 = vmul.f32 %v4913_v0, %v2063_v49  ;;  %4552 = vmatprep.subr.bf16.mxu1 %v4836_v11  ;;  %v4839_v49 = vld [vmem:[%s6660_s11 + $0x28] sm:$0xff]  }
 0x367   : > { %4544 = vmatprep.mubr.bf16.mxu1 %v2182_v21  ;;  %v2183_v16 = vpack.c.bf16 %v2175_v17, %v2174_v44 }
 0x368   : > { %4553 = vmatpush3.bf16.msra.mxu1 %v4836_v11 }
 0x369   : > { %4554 = vmatprep.subr.bf16.mxu1 %v4837_v2 }
 0x36a   : > { %4545 = vmatmul.mubr.bf16.gmra.mrb[32].mxu1 %v2183_v16 }
 0x36c   : > { %4555 = vmatpush3.bf16.msra.mxu1 %v4837_v2 }
 0x36d   : > { %4556 = vmatprep.subr.bf16.mxu1 %v4838_v55 }
 0x370   : > { %4557 = vmatpush3.bf16.msra.mxu1 %v4838_v55 }
 0x371   : > { %4558 = vmatprep.subr.bf16.mxu1 %v4839_v49 }
 0x374   : > { %4559 = vmatpush3.bf16.msra.mxu1 %v4839_v49 }
 0x375   : > { %4560 = vmatprep.subr.bf16.mxu1 %v4840_v62 }
 0x378   : > { %4561 = vmatpush3.bf16.msra.mxu1 %v4840_v62 }
 0x379   : > { %4562 = vmatprep.subr.bf16.mxu1 %v4841_v36 }
 0x37c   : > { %4563 = vmatpush3.bf16.msra.mxu1 %v4841_v36 }
 0x37d   : > { %4612 = vmatprep.subr.bf16.mxu1 %v6743_v41 }
 0x41e   : > { %v4534_v9 = vpop.f32.mrb[20].mxu1 }
 0x41f   : > { %v6044_v32 = vadd.f32 %v4534_v9, %v6041_v4  ;;  %v2289_v13 = vpop.f32.mrb[21].mxu1 }
 0x420   : > { %v6047_v48 = vadd.f32 %v6041_v4, %v2289_v13  ;;  %v4535_v12 = vpop.f32.mrb[22].mxu1 }
 0x421   : > { %v4136_v24 = vmul.f32 -1.442695, %v6044_v32  ;;  %v6051_v5 = vadd.f32 %v4535_v12, %v6041_v4  ;;  %v2292_v15 = vpop.f32.mrb[23].mxu1 }
 0x422   : > { %v4134_v8 = vmul.f32 -1.442695, %v6047_v48  ;;  %v6055_v34 = vadd.f32 %v6041_v4, %v2292_v15 }
 0x423   : > { %4914 = vpow2.f32 %v4136_v24  ;;  %v4137_v35 = vmul.f32 -1.442695, %v6051_v5 }
 0x424   : > { %4916 = vpow2.f32 %v4134_v8  ;;  %v4135_v56 = vmul.f32 -1.442695, %v6055_v34 }
 0x425   : > { %4918 = vpow2.f32 %v4137_v35 }
 0x426   : > { %4920 = vpow2.f32 %v4135_v56 }
 0x427   : > { %v4538_v50 = vpop.f32.mrb[24].mxu1 }
 0x428   : > { %v6060_v14 = vadd.f32 %v4538_v50, %v6041_v4  ;;  %v2305_v29 = vpop.f32.mrb[25].mxu1 }
 0x429   : > { %v6063_v42 = vadd.f32 %v6041_v4, %v2305_v29  ;;  %v4539_v40 = vpop.f32.mrb[26].mxu1 }
 0x42a   : > { %v4140_v18 = vmul.f32 -1.442695, %v6060_v14  ;;  %v6067_v57 = vadd.f32 %v4539_v40, %v6041_v4  ;;  %v2308_v0 = vpop.f32.mrb[27].mxu1 }
 0x42b   : > { %v4138_v21 = vmul.f32 -1.442695, %v6063_v42  ;;  %v6071_v44 = vadd.f32 %v6041_v4, %v2308_v0 }
 0x42c   : > { %4922 = vpow2.f32 %v4140_v18  ;;  %v4141_v17 = vmul.f32 -1.442695, %v6067_v57 }
 0x42d   : > { %v4915_v16 = vpop.eup %4914  ;;  %4924 = vpow2.f32 %v4138_v21  ;;  %v4139_v1 = vmul.f32 -1.442695, %v6071_v44 }
 0x42e   : > { %v4917_v45 = vpop.eup %4916  ;;  %v2402_v11 = vadd.f32 1.0, %v4915_v16  ;;  %4926 = vpow2.f32 %v4141_v17 }
 0x42f   : > { %v4919_v2 = vpop.eup %4918  ;;  %v2400_v55 = vadd.f32 1.0, %v4917_v45  ;;  %4928 = vpow2.f32 %v4139_v1 }
 0x430   : > { %v4921_v49 = vpop.eup %4920  ;;  %4930 = vrcp.f32 %v2402_v11  ;;  %v2403_v62 = vadd.f32 1.0, %v4919_v2 }
 0x431   : > { %4932 = vrcp.f32 %v2400_v55  ;;  %v2401_v36 = vadd.f32 1.0, %v4921_v49 }
 0x432   : > { %4934 = vrcp.f32 %v2403_v62 }
 0x433   : > { %4936 = vrcp.f32 %v2401_v36 }
 0x435   : > { %v4542_v9 = vpop.f32.mrb[28].mxu1 }
 0x436   : > { %v4923_v13 = vpop.eup %4922  ;;  %v6076_v12 = vadd.f32 %v4542_v9, %v6041_v4  ;;  %v2321_v24 = vpop.f32.mrb[29].mxu1 }
 0x437   : > { %v4925_v15 = vpop.eup %4924  ;;  %v2406_v8 = vadd.f32 1.0, %v4923_v13  ;;  %v6079_v35 = vadd.f32 %v6041_v4, %v2321_v24  ;;  %v4543_v56 = vpop.f32.mrb[30].mxu1 }
 0x438   : > { %v4927_v50 = vpop.eup %4926  ;;  %v2404_v29 = vadd.f32 1.0, %v4925_v15  ;;  %v6082_v40 = vadd.f32 %v4543_v56, %v6041_v4  ;;  %v2324_v18 = vpop.f32.mrb[31].mxu1  ;;  %v4144_v17 = vmul.f32 -1.442695, %v6076_v12 }
 0x439   : > { %v4929_v0 = vpop.eup %4928  ;;  %4938 = vrcp.f32 %v2406_v8  ;;  %v2407_v21 = vadd.f32 1.0, %v4927_v50  ;;  %v6086_v16 = vadd.f32 %v6041_v4, %v2324_v18  ;;  %v4142_v11 = vmul.f32 -1.442695, %v6079_v35 }
 0x43a   : > { %v4931_v1 = vpop.eup %4930  ;;  %4940 = vrcp.f32 %v2404_v29  ;;  %v2405_v45 = vadd.f32 1.0, %v4929_v0  ;;  %v4145_v55 = vmul.f32 -1.442695, %v6082_v40 }
 0x43b   : > { %v4933_v2 = vpop.eup %4932  ;;  %4942 = vrcp.f32 %v2407_v21  ;;  %v4143_v62 = vmul.f32 -1.442695, %v6086_v16  ;;  %v6101_v8 = vmul.f32 %v4931_v1, %v6044_v32 }
 0x43c   : > { %v4935_v49 = vpop.eup %4934  ;;  %4944 = vrcp.f32 %v2405_v45  ;;  %v6095_v13 = vmul.f32 %v4933_v2, %v6047_v48 }
 0x43d   : > { %v4937_v36 = vpop.eup %4936  ;;  %v6092_v9 = vmul.f32 %v4935_v49, %v6051_v5  ;;  %4946 = vpow2.f32 %v4144_v17  ;;  %v4546_v15 = vpop.f32.mrb[32].mxu1 }
 0x43e   : > { %v6098_v24 = vmul.f32 %v4937_v36, %v6055_v34  ;;  %4948 = vpow2.f32 %v4142_v11  ;;  %v6104_v56 = vadd.f32 %v4546_v15, %v6041_v4  ;;  %v2337_v50 = vpop.f32.mrb[33].mxu1 }
 0x43f   : > { %4950 = vpow2.f32 %v4145_v55  ;;  %v6107_v5 = vadd.f32 %v6041_v4, %v2337_v50  ;;  %v4547_v29 = vpop.f32.mrb[34].mxu1  ;;  %v2465_v34 = vpack.c.bf16 %v6092_v9, %v6101_v8 }
 0x440   : > { %4952 = vpow2.f32 %v4143_v62  ;;  %v2464_v48 = vpack.c.bf16 %v6098_v24, %v6095_v13  ;;  %v4148_v18 = vmul.f32 -1.442695, %v6104_v56  ;;  %v6115_v32 = vadd.f32 %v4547_v29, %v6041_v4  ;;  %v2340_v0 = vpop.f32.mrb[35].mxu1 }
 0x441   : > { %v4146_v21 = vmul.f32 -1.442695, %v6107_v5  ;;  %v2341_v17 = vadd.f32 %v6041_v4, %v2340_v0 }
 0x442   : > { %4564 = vmatprep.mubr.bf16.mxu1 %v2464_v48  ;;  %4954 = vpow2.f32 %v4148_v18  ;;  %v4149_v45 = vmul.f32 -1.442695, %v6115_v32 }
 0x443   : > { %v4939_v1 = vpop.eup %4938  ;;  %4565 = vmatmul.mubr.bf16.vlgmr.msra.gmra.mrb[36].mxu1 %v2465_v34  ;;  %4956 = vpow2.f32 %v4146_v21  ;;  %v4147_v2 = vmul.f32 -1.442695, %v2341_v17 }
 0x444   : > { %v4941_v11 = vpop.eup %4940  ;;  %4958 = vpow2.f32 %v4149_v45  ;;  %v6130_v29 = vmul.f32 %v4939_v1, %v6060_v14 }
 0x445   : > { %v4943_v55 = vpop.eup %4942  ;;  %4960 = vpow2.f32 %v4147_v2  ;;  %v6124_v15 = vmul.f32 %v4941_v11, %v6063_v42 }
 0x446   : > { %v4945_v49 = vpop.eup %4944  ;;  %v6121_v62 = vmul.f32 %v4943_v55, %v6067_v57 }
 0x447   : > { %v4947_v36 = vpop.eup %4946  ;;  %v6127_v4 = vmul.f32 %v4945_v49, %v6071_v44 }
 0x448   : > { %v4949_v50 = vpop.eup %4948  ;;  %v2410_v48 = vadd.f32 1.0, %v4947_v36  ;;  %v2467_v42 = vpack.c.bf16 %v6121_v62, %v6130_v29 }
 0x449   : > { %v4951_v34 = vpop.eup %4950  ;;  %v2408_v18 = vadd.f32 1.0, %v4949_v50  ;;  %v2466_v0 = vpack.c.bf16 %v6127_v4, %v6124_v15 }
 0x44a   : > { %v4953_v57 = vpop.eup %4952  ;;  %4962 = vrcp.f32 %v2410_v48  ;;  %v2411_v21 = vadd.f32 1.0, %v4951_v34 }
 0x44b   : > { %4964 = vrcp.f32 %v2408_v18  ;;  %v2409_v45 = vadd.f32 1.0, %v4953_v57  ;;  %4568 = vmatprep.mubr.bf16.mxu1 %v2466_v0 }
 0x44c   : > { %4966 = vrcp.f32 %v2411_v21  ;;  %4569 = vmatmul.mubr.bf16.gmra.mrb[40].mxu1 %v2467_v42  ;;  %v4955_v44 = vpop.eup %4954 }
 0x44d   : > { %4968 = vrcp.f32 %v2409_v45  ;;  %v4957_v14 = vpop.eup %4956  ;;  %v2414_v55 = vadd.f32 1.0, %v4955_v44 }
 0x44e   : > { %v4959_v1 = vpop.eup %4958  ;;  %v2412_v11 = vadd.f32 1.0, %v4957_v14 }
 0x44f   : > { %v4961_v2 = vpop.eup %4960  ;;  %v2415_v49 = vadd.f32 1.0, %v4959_v1 }
 0x450   : > { %4970 = vrcp.f32 %v2412_v11  ;;  %v2413_v36 = vadd.f32 1.0, %v4961_v2 }
 0x451   : > { %4972 = vrcp.f32 %v2415_v49 }
 0x452   : > { %4974 = vrcp.f32 %v2413_v36 }
 0x453   : > { %4976 = vrcp.f32 %v2414_v55 }
 0x454   : > { %v4963_v50 = vpop.eup %4962 }
 0x455   : > { %v4965_v48 = vpop.eup %4964  ;;  %v6146_v42 = vmul.f32 %v4963_v50, %v6076_v12 }
 0x456   : > { %v4967_v34 = vpop.eup %4966  ;;  %v6140_v57 = vmul.f32 %v4965_v48, %v6079_v35 }
 0x457   : > { %v4969_v18 = vpop.eup %4968  ;;  %v6137_v0 = vmul.f32 %v4967_v34, %v6082_v40 }
 0x458   : > { %v6143_v21 = vmul.f32 %v4969_v18, %v6086_v16 }
 0x459   : > { %v2469_v14 = vpack.c.bf16 %v6137_v0, %v6146_v42 }
 0x45a   : > { %v2468_v45 = vpack.c.bf16 %v6143_v21, %v6140_v57  ;;  %v4971_v44 = vpop.eup %4970 }
 0x45b   : > { %v4973_v1 = vpop.eup %4972  ;;  %v6153_v35 = vmul.f32 %v4971_v44, %v6107_v5  ;;  %v6170_v5 = vld [vmem:[%s6661_s12] ss:$0 sm:$0xff] }
 0x45c   : > { %4572 = vmatprep.mubr.bf16.mxu1 %v2468_v45  ;;  %v4975_v40 = vpop.eup %4974  ;;  %v6158_v12 = vmul.f32 %v4973_v1, %v6115_v32 }
 0x45d   : > { %4573 = vmatmul.mubr.bf16.gmra.mrb[44].mxu1 %v2469_v14  ;;  %v4977_v11 = vpop.eup %4976  ;;  %v6155_v16 = vmul.f32 %v4975_v40, %v2341_v17 }
 0x45e   : > { %v6163_v55 = vmul.f32 %v4977_v11, %v6104_v56 }
 0x45f   : > { %v2470_v2 = vpack.c.bf16 %v6155_v16, %v6153_v35 }
 0x460   : > { %v2471_v49 = vpack.c.bf16 %v6158_v12, %v6163_v55 }
 0x461   : > { %4576 = vmatprep.mubr.bf16.mxu1 %v2470_v2 }
 0x465   : > { %4577 = vmatmul.mubr.bf16.gmra.mrb[48].mxu1 %v2471_v49 }
 0x466   : > { %4628 = vmatprep.mubr.msk.bf16.mxu1 %vm5261_vm5, %v6743_v41 }
 0x516   : > { %v4566_v17 = vpop.f32.mrb[36].mxu1 }
 0x517   : > { %v2586_v32 = vadd.f32 %v4566_v17, %v6170_v5  ;;  %v2577_v36 = vpop.f32.mrb[37].mxu1 }
 0x518   : > { %v6174_v50 = vadd.f32 %v6170_v5, %v2577_v36  ;;  %v4567_v48 = vpop.f32.mrb[38].mxu1 }
 0x519   : > { %v4161_v56 = vmul.f32 -1.442695, %v2586_v32  ;;  %v6177_v34 = vadd.f32 %v4567_v48, %v6170_v5  ;;  %v2580_v18 = vpop.f32.mrb[39].mxu1 }
 0x51a   : > { %v4159_v45 = vmul.f32 -1.442695, %v6174_v50  ;;  %v6181_v44 = vadd.f32 %v6170_v5, %v2580_v18 }
 0x51b   : > { %4978 = vpow2.f32 %v4161_v56  ;;  %v4162_v14 = vmul.f32 -1.442695, %v6177_v34 }
 0x51c   : > { %4980 = vpow2.f32 %v4159_v45  ;;  %v4160_v1 = vmul.f32 -1.442695, %v6181_v44 }
 0x51d   : > { %4982 = vpow2.f32 %v4162_v14 }
 0x51e   : > { %4984 = vpow2.f32 %v4160_v1 }
 0x51f   : > { %v4570_v40 = vpop.f32.mrb[40].mxu1 }
 0x520   : > { %v6186_v11 = vadd.f32 %v4570_v40, %v6170_v5  ;;  %v2593_v2 = vpop.f32.mrb[41].mxu1 }
 0x521   : > { %v6189_v49 = vadd.f32 %v6170_v5, %v2593_v2  ;;  %v4571_v17 = vpop.f32.mrb[42].mxu1 }
 0x522   : > { %v4165_v36 = vmul.f32 -1.442695, %v6186_v11  ;;  %v6193_v48 = vadd.f32 %v4571_v17, %v6170_v5  ;;  %v2596_v56 = vpop.f32.mrb[43].mxu1 }
 0x523   : > { %v4163_v18 = vmul.f32 -1.442695, %v6189_v49  ;;  %v6197_v45 = vadd.f32 %v6170_v5, %v2596_v56 }
 0x524   : > { %4986 = vpow2.f32 %v4165_v36  ;;  %v4166_v14 = vmul.f32 -1.442695, %v6193_v48 }
 0x525   : > { %v4979_v1 = vpop.eup %4978  ;;  %4988 = vpow2.f32 %v4163_v18  ;;  %v4164_v40 = vmul.f32 -1.442695, %v6197_v45 }
 0x526   : > { %v4981_v2 = vpop.eup %4980  ;;  %v2690_v23 = vadd.f32 1.0, %v4979_v1  ;;  %4990 = vpow2.f32 %v4166_v14 }
 0x527   : > { %v4983_v27 = vpop.eup %4982  ;;  %v2688_v10 = vadd.f32 1.0, %v4981_v2  ;;  %4992 = vpow2.f32 %v4164_v40 }
 0x528   : > { %v4985_v17 = vpop.eup %4984  ;;  %4994 = vrcp.f32 %v2690_v23  ;;  %v2691_v60 = vadd.f32 1.0, %v4983_v27 }
 0x529   : > { %4996 = vrcp.f32 %v2688_v10  ;;  %v2689_v63 = vadd.f32 1.0, %v4985_v17 }
 0x52a   : > { %4998 = vrcp.f32 %v2691_v60 }
 0x52b   : > { %5000 = vrcp.f32 %v2689_v63 }
 0x52e   : > { %v4987_v36 = vpop.eup %4986 }
 0x52f   : > { %v4989_v56 = vpop.eup %4988  ;;  %v2694_v3 = vadd.f32 1.0, %v4987_v36 }
 0x530   : > { %v4991_v59 = vpop.eup %4990  ;;  %v2692_v18 = vadd.f32 1.0, %v4989_v56  ;;  %v4574_v52 = vpop.f32.mrb[44].mxu1 }
 0x531   : > { %v4993_v53 = vpop.eup %4992  ;;  %5002 = vrcp.f32 %v2694_v3  ;;  %v2695_v1 = vadd.f32 1.0, %v4991_v59  ;;  %v6202_v14 = vadd.f32 %v4574_v52, %v6170_v5  ;;  %v2609_v40 = vpop.f32.mrb[45].mxu1  ;;  %v6214_v3 = vld [vmem:[%s6662_s13] ss:$0 sm:$0xff] }
 0x532   : > { %v4995_v2 = vpop.eup %4994  ;;  %5004 = vrcp.f32 %v2692_v18  ;;  %v2693_v23 = vadd.f32 1.0, %v4993_v53  ;;  %v6205_v10 = vadd.f32 %v6170_v5, %v2609_v40  ;;  %v4575_v63 = vpop.f32.mrb[46].mxu1 }
 0x533   : > { %v4997_v60 = vpop.eup %4996  ;;  %v2738_v27 = vmul.f32 %v4995_v2, %v2586_v32  ;;  %5006 = vrcp.f32 %v2695_v1  ;;  %v4169_v17 = vmul.f32 -1.442695, %v6202_v14  ;;  %v6209_v36 = vadd.f32 %v4575_v63, %v6170_v5  ;;  %v2612_v59 = vpop.f32.mrb[47].mxu1 }
 0x534   : > { %v4999_v52 = vpop.eup %4998  ;;  %v2736_v53 = vmul.f32 %v4997_v60, %v6174_v50  ;;  %5008 = vrcp.f32 %v2693_v23  ;;  %v4167_v56 = vmul.f32 -1.442695, %v6205_v10  ;;  %v6219_v32 = vadd.f32 %v6170_v5, %v2612_v59 }
 0x535   : > { %v5001_v18 = vpop.eup %5000  ;;  %v2739_v1 = vmul.f32 %v4999_v52, %v6177_v34  ;;  %5010 = vpow2.f32 %v4169_v17  ;;  %v4170_v40 = vmul.f32 -1.442695, %v6209_v36  ;;  %v2761_v59 = vmul.f32 %v6214_v3, %v2738_v27 }
 0x536   : > { %v2737_v2 = vmul.f32 %v5001_v18, %v6181_v44  ;;  %5012 = vpow2.f32 %v4167_v56  ;;  %v4168_v63 = vmul.f32 -1.442695, %v6219_v32  ;;  %v2759_v51 = vmul.f32 %v6214_v3, %v2736_v53 }
 0x537   : > { %5014 = vpow2.f32 %v4170_v40  ;;  %v2762_v56 = vmul.f32 %v6214_v3, %v2739_v1 }
 0x538   : > { %5016 = vpow2.f32 %v4168_v63  ;;  %v4578_v50 = vpop.f32.mrb[48].mxu1  ;;  %v2775_v23 = vsel %vm1242_vm6, %v2759_v51, 0.0  ;;  %v2760_v60 = vmul.f32 %v6214_v3, %v2737_v2 }
 0x539   : > { %v6230_v34 = vadd.f32 %v4578_v50, %v6170_v5  ;;  %v2625_v17 = vpop.f32.mrb[49].mxu1  ;;  %2776 = vadd.xlane.f32.xlu1 %v2775_v23  ;;  %v2781_v23 = vsel %vm1242_vm6, %v2761_v59, 0.0  ;;  %v2784_v54 = vsel %vm1242_vm6, %v2762_v56, 0.0 }
 0x53a   : > { %v6233_v44 = vadd.f32 %v6170_v5, %v2625_v17  ;;  %v4579_v52 = vpop.f32.mrb[50].mxu1  ;;  %v2778_v53 = vsel %vm1242_vm6, %v2760_v60, 0.0 }
 0x53b   : > { %v5003_v18 = vpop.eup %5002  ;;  %v4173_v51 = vmul.f32 -1.442695, %v6230_v34  ;;  %v6239_v40 = vadd.f32 %v4579_v52, %v6170_v5  ;;  %v2628_v27 = vpop.f32.mrb[51].mxu1  ;;  %2779 = vadd.xlane.f32.xlu0 %v2778_v53 }
 0x53c   : > { %v5005_v2 = vpop.eup %5004  ;;  %v4171_v63 = vmul.f32 -1.442695, %v6233_v44  ;;  %v6243_v50 = vadd.f32 %v6170_v5, %v2628_v27  ;;  %v2742_v60 = vmul.f32 %v5003_v18, %v6186_v11 }
 0x53d   : > { %v5007_v17 = vpop.eup %5006  ;;  %v2740_v1 = vmul.f32 %v5005_v2, %v6189_v49  ;;  %5018 = vpow2.f32 %v4173_v51  ;;  %v4174_v30 = vmul.f32 -1.442695, %v6239_v40  ;;  %2782 = vadd.xlane.f32.xlu1 %v2781_v23 }
 0x53e   : > { %v5009_v52 = vpop.eup %5008  ;;  %5020 = vpow2.f32 %v4171_v63  ;;  %v4172_v53 = vmul.f32 -1.442695, %v6243_v50  ;;  %v2743_v5 = vmul.f32 %v5007_v17, %v6193_v48  ;;  %v2765_v56 = vmul.f32 %v6214_v3, %v2742_v60 }
 0x53f   : > { %v5011_v31 = vpop.eup %5010  ;;  %v2741_v59 = vmul.f32 %v5009_v52, %v6197_v45  ;;  %5022 = vpow2.f32 %v4174_v30  ;;  %2785 = vadd.xlane.f32.xlu0 %v2784_v54  ;;  %v2763_v11 = vmul.f32 %v6214_v3, %v2740_v1 }
 0x540   : > { %v5013_v49 = vpop.eup %5012  ;;  %v2698_v18 = vadd.f32 1.0, %v5011_v31  ;;  %5024 = vpow2.f32 %v4172_v53  ;;  %v2766_v45 = vmul.f32 %v6214_v3, %v2743_v5  ;;  %v2793_v31 = vsel %vm1242_vm6, %v2765_v56, 0.0 }
 0x541   : > { %v5015_v51 = vpop.eup %5014  ;;  %v2696_v27 = vadd.f32 1.0, %v5013_v49  ;;  %v2787_v2 = vsel %vm1242_vm6, %v2763_v11, 0.0  ;;  %v2764_v63 = vmul.f32 %v6214_v3, %v2741_v59 }
 0x542   : > { %v5017_v23 = vpop.eup %5016  ;;  %5026 = vrcp.f32 %v2698_v18  ;;  %v2699_v48 = vadd.f32 1.0, %v5015_v51  ;;  %2788 = vadd.xlane.f32.xlu1 %v2787_v2  ;;  %v2796_v1 = vsel %vm1242_vm6, %v2766_v45, 0.0 }
 0x543   : > { %5028 = vrcp.f32 %v2696_v27  ;;  %v2697_v30 = vadd.f32 1.0, %v5017_v23  ;;  %v2790_v54 = vsel %vm1242_vm6, %v2764_v63, 0.0 }
 0x544   : > { %5030 = vrcp.f32 %v2699_v48  ;;  %2791 = vadd.xlane.f32.xlu0 %v2790_v54 }
 0x545   : > { %5032 = vrcp.f32 %v2697_v30 }
 0x546   : > { %2794 = vadd.xlane.f32.xlu1 %v2793_v31 }
 0x547   : > { %v5019_v17 = vpop.eup %5018 }
 0x548   : > { %v5021_v60 = vpop.eup %5020  ;;  %v2702_v52 = vadd.f32 1.0, %v5019_v17  ;;  %2797 = vadd.xlane.f32.xlu0 %v2796_v1 }
 0x549   : > { %v5023_v53 = vpop.eup %5022  ;;  %v2700_v59 = vadd.f32 1.0, %v5021_v60 }
 0x54a   : > { %v5025_v11 = vpop.eup %5024  ;;  %5034 = vrcp.f32 %v2702_v52  ;;  %v2703_v49 = vadd.f32 1.0, %v5023_v53 }
 0x54b   : > { %5036 = vrcp.f32 %v2700_v59  ;;  %v2701_v18 = vadd.f32 1.0, %v5025_v11 }
 0x54c   : > { %v5027_v5 = vpop.eup %5026  ;;  %5038 = vrcp.f32 %v2703_v49 }
 0x54d   : > { %v5029_v51 = vpop.eup %5028  ;;  %5040 = vrcp.f32 %v2701_v18  ;;  %v2746_v2 = vmul.f32 %v5027_v5, %v6202_v14 }
 0x54e   : > { %v5031_v27 = vpop.eup %5030  ;;  %v2744_v63 = vmul.f32 %v5029_v51, %v6205_v10 }
 0x54f   : > { %v5033_v56 = vpop.eup %5032  ;;  %v2747_v23 = vmul.f32 %v5031_v27, %v6209_v36  ;;  %v2769_v31 = vmul.f32 %v6214_v3, %v2746_v2  ;;  %v4842_v2 = vld [vmem:[%s6664_s15] sm:$0xff]  }
 0x550   : > { %v2745_v48 = vmul.f32 %v5033_v56, %v6219_v32  ;;  %v2767_v30 = vmul.f32 %v6214_v3, %v2744_v63  ;;  %v4843_v63 = vld [vmem:[%s6664_s15 + $0x8] sm:$0xff]   ;;  %4580 = vmatprep.subr.bf16.mxu0 %v4842_v2  ;;  %v4845_v56 = vld [vmem:[%s6664_s15 + $0x18] sm:$0xff]  }
 0x551   : > { %v2770_v14 = vmul.f32 %v6214_v3, %v2747_v23  ;;  %v2805_v52 = vsel %vm1242_vm6, %v2769_v31, 0.0  ;;  %4581 = vmatpush3.bf16.msra.mxu0 %v4842_v2  ;;  %v4846_v23 = vld [vmem:[%s6664_s15 + $0x20] sm:$0xff]  }
 0x552   : > { %v2799_v54 = vsel %vm1242_vm6, %v2767_v30, 0.0  ;;  %v2768_v45 = vmul.f32 %v6214_v3, %v2745_v48  ;;  %4582 = vmatprep.subr.bf16.mxu0 %v4843_v63  ;;  %v6300_v48 = vld [vmem:[#allocation6] ss:$0 sm:$0xff] }
 0x553   : > { %2800 = vadd.xlane.f32.xlu1 %v2799_v54  ;;  %v2808_v49 = vsel %vm1242_vm6, %v2770_v14, 0.0 }
 0x554   : > { %v5035_v17 = vpop.eup %5034  ;;  %v2802_v1 = vsel %vm1242_vm6, %v2768_v45, 0.0 }
 0x555   : > { %v5037_v10 = vpop.eup %5036  ;;  %2803 = vadd.xlane.f32.xlu0 %v2802_v1  ;;  %v2750_v36 = vmul.f32 %v5035_v17, %v6230_v34  ;;  %4583 = vmatpush3.bf16.msra.mxu0 %v4843_v63 }
 0x556   : > { %v5039_v60 = vpop.eup %5038  ;;  %v2748_v32 = vmul.f32 %v5037_v10, %v6233_v44 }
 0x557   : > { %v5041_v53 = vpop.eup %5040  ;;  %2806 = vadd.xlane.f32.xlu1 %v2805_v52  ;;  %v2751_v59 = vmul.f32 %v5039_v60, %v6239_v40  ;;  %v2773_v34 = vmul.f32 %v6214_v3, %v2750_v36 }
 0x558   : > { %v2749_v11 = vmul.f32 %v5041_v53, %v6243_v50  ;;  %v2771_v18 = vmul.f32 %v6214_v3, %v2748_v32 }
 0x559   : > { %2809 = vadd.xlane.f32.xlu0 %v2808_v49  ;;  %v2774_v27 = vmul.f32 %v6214_v3, %v2751_v59  ;;  %v2817_v40 = vsel %vm1242_vm6, %v2773_v34, 0.0 }
 0x55a   : > { %v2811_v5 = vsel %vm1242_vm6, %v2771_v18, 0.0  ;;  %v2772_v51 = vmul.f32 %v6214_v3, %v2749_v11  ;;  %v4844_v3 = vld [vmem:[%s6664_s15 + $0x10] sm:$0xff]  }
 0x55b   : > { %2812 = vadd.xlane.f32.xlu1 %v2811_v5  ;;  %v2820_v50 = vsel %vm1242_vm6, %v2774_v27, 0.0  ;;  %4584 = vmatprep.subr.bf16.mxu0 %v4844_v3 }
 0x55c   : > { %v2814_v44 = vsel %vm1242_vm6, %v2772_v51, 0.0  ;;  %4585 = vmatpush3.bf16.msra.mxu0 %v4844_v3  ;;  %vm3349_vm6 = vcmask 261120  }
 0x55d   : > { %2815 = vadd.xlane.f32.xlu0 %v2814_v44  ;;  %4586 = vmatprep.subr.bf16.mxu0 %v4845_v56 }
 0x55f   : > { %2818 = vadd.xlane.f32.xlu1 %v2817_v40 }
 0x560   : > { %4587 = vmatpush3.bf16.msra.mxu0 %v4845_v56 }
 0x561   : > { %2821 = vadd.xlane.f32.xlu0 %v2820_v50  ;;  %4588 = vmatprep.subr.bf16.mxu0 %v4846_v23 }
 0x564   : > { %4589 = vmatpush3.bf16.msra.mxu0 %v4846_v23 }
 0x5c6   : > { %v2777_v30 = vpop.xlane.xlu1 %2776 }
 0x5c7   : > { %v2830_v54 = vadd.f32 %v6300_v48, %v2777_v30 }
 0x5c8   : > { %v2780_v45 = vpop.xlane.xlu0 %2779 }
 0x5c9   : > { %v4177_v31 = vmul.f32 -1.442695, %v2830_v54  ;;  %v2831_v17 = vadd.f32 %v6300_v48, %v2780_v45 }
 0x5ca   : > { %v2783_v1 = vpop.xlane.xlu1 %2782 }
 0x5cb   : > { %5042 = vpow2.f32 %v4177_v31  ;;  %v4178_v14 = vmul.f32 -1.442695, %v2831_v17  ;;  %v2832_v10 = vadd.f32 %v6300_v48, %v2783_v1 }
 0x5cc   : > { %v2786_v60 = vpop.xlane.xlu0 %2785 }
 0x5cd   : > { %5044 = vpow2.f32 %v4178_v14  ;;  %v4179_v36 = vmul.f32 -1.442695, %v2832_v10  ;;  %v2833_v32 = vadd.f32 %v6300_v48, %v2786_v60 }
 0x5cf   : > { %5046 = vpow2.f32 %v4179_v36  ;;  %v4180_v52 = vmul.f32 -1.442695, %v2833_v32  ;;  %v2789_v53 = vpop.xlane.xlu1 %2788 }
 0x5d0   : > { %v2834_v59 = vadd.f32 %v6300_v48, %v2789_v53 }
 0x5d1   : > { %5048 = vpow2.f32 %v4180_v52  ;;  %v2792_v11 = vpop.xlane.xlu0 %2791 }
 0x5d2   : > { %v4181_v49 = vmul.f32 -1.442695, %v2834_v59  ;;  %v2835_v18 = vadd.f32 %v6300_v48, %v2792_v11  ;;  %v4847_v11 = vld [vmem:[%s6664_s15 + $0x28] sm:$0xff]  }
 0x5d3   : > { %v2795_v5 = vpop.xlane.xlu1 %2794  ;;  %4590 = vmatprep.subr.bf16.mxu0 %v4847_v11 }
 0x5d4   : > { %5050 = vpow2.f32 %v4181_v49  ;;  %v4182_v51 = vmul.f32 -1.442695, %v2835_v18  ;;  %v2836_v34 = vadd.f32 %v6300_v48, %v2795_v5  ;;  %4591 = vmatpush3.bf16.msra.mxu0 %v4847_v11 }
 0x5d5   : > { %v5043_v44 = vpop.eup %5042  ;;  %v2798_v27 = vpop.xlane.xlu0 %2797 }
 0x5d6   : > { %v2894_v40 = vadd.f32 1.0, %v5043_v44  ;;  %5052 = vpow2.f32 %v4182_v51  ;;  %v4183_v50 = vmul.f32 -1.442695, %v2836_v34  ;;  %v2837_v2 = vadd.f32 %v6300_v48, %v2798_v27 }
 0x5d7   : > { %v5045_v63 = vpop.eup %5044 }
 0x5d8   : > { %5054 = vrcp.f32 %v2894_v40  ;;  %v2895_v3 = vadd.f32 1.0, %v5045_v63  ;;  %v4184_v56 = vmul.f32 -1.442695, %v2837_v2 }
 0x5d9   : > { %v5047_v23 = vpop.eup %5046  ;;  %5056 = vpow2.f32 %v4183_v50 }
 0x5da   : > { %5058 = vrcp.f32 %v2895_v3  ;;  %v2896_v30 = vadd.f32 1.0, %v5047_v23  ;;  %v4848_v3 = vld [vmem:[%s6664_s15 + $0x30] sm:$0xff]  }
 0x5db   : > { %v5049_v54 = vpop.eup %5048  ;;  %5060 = vpow2.f32 %v4184_v56  ;;  %4592 = vmatprep.subr.bf16.mxu0 %v4848_v3 }
 0x5dc   : > { %5062 = vrcp.f32 %v2896_v30  ;;  %v2897_v45 = vadd.f32 1.0, %v5049_v54  ;;  %4593 = vmatpush3.bf16.msra.mxu0 %v4848_v3 }
 0x5de   : > { %v5051_v31 = vpop.eup %5050  ;;  %5064 = vrcp.f32 %v2897_v45 }
 0x5df   : > { %v2898_v17 = vadd.f32 1.0, %v5051_v31 }
 0x5e0   : > { %v5053_v1 = vpop.eup %5052  ;;  %v2801_v14 = vpop.xlane.xlu1 %2800 }
 0x5e1   : > { %5066 = vrcp.f32 %v2898_v17  ;;  %v2899_v10 = vadd.f32 1.0, %v5053_v1  ;;  %v2838_v60 = vadd.f32 %v6300_v48, %v2801_v14 }
 0x5e2   : > { %v5055_v36 = vpop.eup %5054  ;;  %v2804_v32 = vpop.xlane.xlu0 %2803 }
 0x5e3   : > { %v5057_v52 = vpop.eup %5056  ;;  %v4185_v53 = vmul.f32 -1.442695, %v2838_v60  ;;  %v2839_v59 = vadd.f32 %v6300_v48, %v2804_v32  ;;  %2944 = vperm.xlu1 %4825, %v5055_v36   ;;  %5068 = vrcp.f32 %v2899_v10  ;;  %v4849_v36 = vld [vmem:[%s6664_s15 + $0x38] sm:$0xff]  }
 0x5e4   : > { %v5059_v49 = vpop.eup %5058  ;;  %v2900_v18 = vadd.f32 1.0, %v5057_v52  ;;  %v2807_v5 = vpop.xlane.xlu1 %2806  ;;  %4594 = vmatprep.subr.bf16.mxu0 %v4849_v36 }
 0x5e5   : > { %v5061_v51 = vpop.eup %5060  ;;  %5070 = vpow2.f32 %v4185_v53  ;;  %v4186_v34 = vmul.f32 -1.442695, %v2839_v59  ;;  %v2840_v44 = vadd.f32 %v6300_v48, %v2807_v5  ;;  %2949 = vperm.xlu0 %4824, %v5059_v49   ;;  %4595 = vmatpush3.bf16.msra.mxu0 %v4849_v36 }
 0x5e6   : > { %v5063_v27 = vpop.eup %5062  ;;  %5072 = vrcp.f32 %v2900_v18  ;;  %v2901_v40 = vadd.f32 1.0, %v5061_v51  ;;  %v2810_v50 = vpop.xlane.xlu0 %2809 }
 0x5e7   : > { %5074 = vpow2.f32 %v4186_v34  ;;  %v4187_v2 = vmul.f32 -1.442695, %v2840_v44  ;;  %v2841_v63 = vadd.f32 %v6300_v48, %v2810_v50  ;;  %2954 = vperm.xlu1 %4825, %v5063_v27  }
 0x5e8   : > { %5076 = vrcp.f32 %v2901_v40  ;;  %v2813_v56 = vpop.xlane.xlu1 %2812  ;;  %v5065_v54 = vpop.eup %5064 }
 0x5e9   : > { %5078 = vpow2.f32 %v4187_v2  ;;  %v4188_v23 = vmul.f32 -1.442695, %v2841_v63  ;;  %v2842_v30 = vadd.f32 %v6300_v48, %v2813_v56 }
 0x5ea   : > { %v2816_v45 = vpop.xlane.xlu0 %2815 }
 0x5eb   : > { %v5067_v31 = vpop.eup %5066  ;;  %5080 = vpow2.f32 %v4188_v23  ;;  %v4189_v17 = vmul.f32 -1.442695, %v2842_v30  ;;  %v2843_v1 = vadd.f32 %v6300_v48, %v2816_v45  ;;  %2959 = vperm.xlu1 %4825, %v5065_v54  }
 0x5ec   : > { %v2819_v14 = vpop.xlane.xlu1 %2818  ;;  %2964 = vperm.xlu0 %4824, %v5067_v31  }
 0x5ed   : > { %5082 = vpow2.f32 %v4189_v17  ;;  %v4190_v10 = vmul.f32 -1.442695, %v2843_v1  ;;  %v2844_v60 = vadd.f32 %v6300_v48, %v2819_v14  ;;  %v5069_v32 = vpop.eup %5068 }
 0x5ee   : > { %v2822_v52 = vpop.xlane.xlu0 %2821 }
 0x5ef   : > { %v5071_v53 = vpop.eup %5070  ;;  %5084 = vpow2.f32 %v4190_v10  ;;  %v4191_v59 = vmul.f32 -1.442695, %v2844_v60  ;;  %v2845_v11 = vadd.f32 %v6300_v48, %v2822_v52  ;;  %2969 = vperm.xlu1 %4825, %v5069_v32  }
 0x5f0   : > { %v5073_v49 = vpop.eup %5072  ;;  %v2902_v18 = vadd.f32 1.0, %v5071_v53 }
 0x5f1   : > { %v5075_v5 = vpop.eup %5074  ;;  %5086 = vpow2.f32 %v4191_v59  ;;  %v4192_v51 = vmul.f32 -1.442695, %v2845_v11  ;;  %2974 = vperm.xlu0 %4824, %v5073_v49  }
 0x5f2   : > { %v5077_v34 = vpop.eup %5076  ;;  %5088 = vrcp.f32 %v2902_v18  ;;  %v2903_v44 = vadd.f32 1.0, %v5075_v5 }
 0x5f3   : > { %v5079_v27 = vpop.eup %5078  ;;  %5090 = vpow2.f32 %v4192_v51  ;;  %2979 = vperm.xlu1 %4825, %v5077_v34  }
 0x5f4   : > { %5092 = vrcp.f32 %v2903_v44  ;;  %v2904_v40 = vadd.f32 1.0, %v5079_v27 }
 0x5f5   : > { %v5081_v50 = vpop.eup %5080 }
 0x5f6   : > { %5094 = vrcp.f32 %v2904_v40  ;;  %v2905_v48 = vadd.f32 1.0, %v5081_v50 }
 0x5f7   : > { %v5083_v2 = vpop.eup %5082 }
 0x5f8   : > { %5096 = vrcp.f32 %v2905_v48  ;;  %v2906_v63 = vadd.f32 1.0, %v5083_v2 }
 0x5f9   : > { %v5085_v3 = vpop.eup %5084 }
 0x5fa   : > { %5098 = vrcp.f32 %v2906_v63  ;;  %v2907_v56 = vadd.f32 1.0, %v5085_v3 }
 0x5fb   : > { %v5087_v23 = vpop.eup %5086 }
 0x5fc   : > { %v5089_v30 = vpop.eup %5088  ;;  %5100 = vrcp.f32 %v2907_v56  ;;  %v2908_v54 = vadd.f32 1.0, %v5087_v23 }
 0x5fd   : > { %v5091_v45 = vpop.eup %5090  ;;  %2984 = vperm.xlu0 %4824, %v5089_v30  }
 0x5fe   : > { %v5093_v31 = vpop.eup %5092  ;;  %5102 = vrcp.f32 %v2908_v54  ;;  %v2909_v17 = vadd.f32 1.0, %v5091_v45 }
 0x5ff   : > { %2989 = vperm.xlu1 %4825, %v5093_v31  }
 0x600   : > { %v5095_v1 = vpop.eup %5094  ;;  %5104 = vrcp.f32 %v2909_v17 }
 0x601   : > { %2994 = vperm.xlu0 %4824, %v5095_v1  }
 0x602   : > { %v5097_v14 = vpop.eup %5096 }
 0x603   : > { %2999 = vperm.xlu1 %4825, %v5097_v14  }
 0x604   : > { %v5099_v10 = vpop.eup %5098 }
 0x605   : > { %3004 = vperm.xlu0 %4824, %v5099_v10  }
 0x606   : > { %v5101_v60 = vpop.eup %5100 }
 0x607   : > { %3009 = vperm.xlu1 %4825, %v5101_v60  }
 0x608   : > { %v5103_v36 = vpop.eup %5102 }
 0x609   : > { %3014 = vperm.xlu0 %4824, %v5103_v36  }
 0x60a   : > { %v5105_v32 = vpop.eup %5104 }
 0x60b   : > { %3019 = vperm.xlu1 %4825, %v5105_v32  }
 0x662   : > { %v2945_v52 = vpop.permute.xlu1 %2944 }
 0x663   : > { %v3022_v59 = vmul.f32 %v2945_v52, %v6095_v13 }
 0x664   : > { %v2950_v53 = vpop.permute.xlu0 %2949 }
 0x665   : > { %v3023_v11 = vmul.f32 %v2950_v53, %v6098_v24 }
 0x666   : > { %v2955_v49 = vpop.permute.xlu1 %2954 }
 0x667   : > { %v3038_v18 = vpack.c.bf16 %v3023_v11, %v3022_v59  ;;  %v3024_v51 = vmul.f32 %v2955_v49, %v6101_v8 }
 0x669   : > { %4596 = vmatprep.mubr.bf16.mxu0 %v3038_v18  ;;  %4613 = vmatpush3.bf16.msra.mxu1 %v3038_v18 }
 0x66a   : > { %v2960_v5 = vpop.permute.xlu1 %2959  ;;  %4614 = vmatprep.subr.bf16.mxu1 %v6743_v41 }
 0x66b   : > { %v2965_v34 = vpop.permute.xlu0 %2964  ;;  %v3025_v44 = vmul.f32 %v2960_v5, %v6092_v9 }
 0x66c   : > { %v3026_v50 = vmul.f32 %v2965_v34, %v6124_v15 }
 0x66d   : > { %v3039_v27 = vpack.c.bf16 %v3025_v44, %v3024_v51 }
 0x66e   : > { %v2970_v40 = vpop.permute.xlu1 %2969 }
 0x66f   : > { %v3027_v13 = vmul.f32 %v2970_v40, %v6127_v4  ;;  %4597 = vmatmul.mubr.bf16.vlgmr.msra.gmra.mrb[32].mxu0 %v3039_v27  ;;  %4615 = vmatpush3.bf16.msra.mxu1 %v3039_v27 }
 0x670   : > { %v2975_v24 = vpop.permute.xlu0 %2974  ;;  %4616 = vmatprep.subr.bf16.mxu1 %v6743_v41 }
 0x671   : > { %v3040_v48 = vpack.c.bf16 %v3027_v13, %v3026_v50  ;;  %v3028_v63 = vmul.f32 %v2975_v24, %v6130_v29 }
 0x672   : > { %v2980_v2 = vpop.permute.xlu1 %2979 }
 0x673   : > { %v3029_v8 = vmul.f32 %v2980_v2, %v6121_v62  ;;  %4600 = vmatprep.mubr.bf16.mxu0 %v3040_v48  ;;  %4617 = vmatpush3.bf16.msra.mxu1 %v3040_v48 }
 0x674   : > { %4618 = vmatprep.subr.bf16.mxu1 %v6743_v41 }
 0x675   : > { %v3041_v9 = vpack.c.bf16 %v3029_v8, %v3028_v63 }
 0x677   : > { %4601 = vmatmul.mubr.bf16.gmra.mrb[36].mxu0 %v3041_v9  ;;  %4619 = vmatpush3.bf16.msra.mxu1 %v3041_v9 }
 0x678   : > { %4620 = vmatprep.subr.bf16.mxu1 %v6743_v41 }
 0x67c   : > { %v2985_v15 = vpop.permute.xlu0 %2984 }
 0x67d   : > { %v3030_v3 = vmul.f32 %v2985_v15, %v6140_v57 }
 0x67e   : > { %v2990_v4 = vpop.permute.xlu1 %2989 }
 0x67f   : > { %v3031_v56 = vmul.f32 %v2990_v4, %v6143_v21 }
 0x680   : > { %v2995_v23 = vpop.permute.xlu0 %2994 }
 0x681   : > { %v3042_v30 = vpack.c.bf16 %v3031_v56, %v3030_v3  ;;  %v3032_v62 = vmul.f32 %v2995_v23, %v6146_v42 }
 0x682   : > { %v3000_v29 = vpop.permute.xlu1 %2999 }
 0x683   : > { %v3033_v54 = vmul.f32 %v3000_v29, %v6137_v0  ;;  %4604 = vmatprep.mubr.bf16.mxu0 %v3042_v30  ;;  %4621 = vmatpush3.bf16.msra.mxu1 %v3042_v30 }
 0x684   : > { %v3005_v45 = vpop.permute.xlu0 %3004  ;;  %4622 = vmatprep.subr.bf16.mxu1 %v6743_v41 }
 0x685   : > { %v3043_v31 = vpack.c.bf16 %v3033_v54, %v3032_v62  ;;  %v3034_v1 = vmul.f32 %v3005_v45, %v6153_v35  ;;  %v6353_v35 = vld [vmem:[%s6665_s16] ss:$0 sm:$0xff] }
 0x686   : > { %v3010_v17 = vpop.permute.xlu1 %3009 }
 0x687   : > { %v3035_v57 = vmul.f32 %v3010_v17, %v6155_v16  ;;  %4605 = vmatmul.mubr.bf16.gmra.mrb[40].mxu0 %v3043_v31  ;;  %4623 = vmatpush3.bf16.msra.mxu1 %v3043_v31 }
 0x688   : > { %v3015_v21 = vpop.permute.xlu0 %3014  ;;  %4624 = vmatprep.subr.bf16.mxu1 %v6743_v41 }
 0x689   : > { %v3044_v14 = vpack.c.bf16 %v3035_v57, %v3034_v1  ;;  %v3036_v0 = vmul.f32 %v3015_v21, %v6163_v55 }
 0x68a   : > { %v3020_v42 = vpop.permute.xlu1 %3019 }
 0x68b   : > { %v3037_v10 = vmul.f32 %v3020_v42, %v6158_v12  ;;  %4608 = vmatprep.mubr.bf16.mxu0 %v3044_v14  ;;  %4625 = vmatpush3.bf16.msra.mxu1 %v3044_v14 }
 0x68c   : > { %4626 = vmatprep.subr.bf16.mxu1 %v6743_v41  ;;  %v5263_v41 = vmov 1.0|1.0  }
 0x68d   : > { %v3045_v60 = vpack.c.bf16 %v3037_v10, %v3036_v0 }
 0x68f   : > { %4609 = vmatmul.mubr.bf16.gmra.mrb[44].mxu0 %v3045_v60  ;;  %4627 = vmatpush3.bf16.msra.mxu1 %v3045_v60 }
 0x742   : > { %v4598_v16 = vpop.f32.mrb[32].mxu0 }
 0x743   : > { %v6356_v36 = vadd.f32 %v4598_v16, %v6353_v35  ;;  %v3151_v32 = vpop.f32.mrb[33].mxu0 }
 0x744   : > { %v6359_v55 = vadd.f32 %v6353_v35, %v3151_v32  ;;  %v4599_v12 = vpop.f32.mrb[34].mxu0 }
 0x745   : > { %v4204_v52 = vmul.f32 -1.442695, %v6356_v36  ;;  %v6363_v53 = vadd.f32 %v4599_v12, %v6353_v35  ;;  %v3154_v59 = vpop.f32.mrb[35].mxu0 }
 0x746   : > { %v4202_v11 = vmul.f32 -1.442695, %v6359_v55  ;;  %v6367_v49 = vadd.f32 %v6353_v35, %v3154_v59 }
 0x747   : > { %5106 = vpow2.f32 %v4204_v52  ;;  %v4205_v18 = vmul.f32 -1.442695, %v6363_v53 }
 0x748   : > { %5108 = vpow2.f32 %v4202_v11  ;;  %v4203_v5 = vmul.f32 -1.442695, %v6367_v49 }
 0x749   : > { %5110 = vpow2.f32 %v4205_v18 }
 0x74a   : > { %5112 = vpow2.f32 %v4203_v5  ;;  %v4602_v51 = vpop.f32.mrb[36].mxu0 }
 0x74b   : > { %v6372_v34 = vadd.f32 %v4602_v51, %v6353_v35  ;;  %v3167_v44 = vpop.f32.mrb[37].mxu0 }
 0x74c   : > { %v6375_v27 = vadd.f32 %v6353_v35, %v3167_v44  ;;  %v4603_v40 = vpop.f32.mrb[38].mxu0  ;;  %v6406_v44 = vld [vmem:[%s6666_s17] ss:$0 sm:$0xff] }
 0x74d   : > { %v4208_v50 = vmul.f32 -1.442695, %v6372_v34  ;;  %v6379_v13 = vadd.f32 %v4603_v40, %v6353_v35  ;;  %v3170_v24 = vpop.f32.mrb[39].mxu0 }
 0x74e   : > { %v4206_v48 = vmul.f32 -1.442695, %v6375_v27  ;;  %v6383_v2 = vadd.f32 %v6353_v35, %v3170_v24 }
 0x74f   : > { %5114 = vpow2.f32 %v4208_v50  ;;  %v4209_v63 = vmul.f32 -1.442695, %v6379_v13 }
 0x750   : > { %5116 = vpow2.f32 %v4206_v48  ;;  %v4207_v8 = vmul.f32 -1.442695, %v6383_v2 }
 0x751   : > { %v5107_v9 = vpop.eup %5106  ;;  %5118 = vpow2.f32 %v4209_v63 }
 0x752   : > { %v5109_v15 = vpop.eup %5108  ;;  %v3264_v4 = vadd.f32 1.0, %v5107_v9  ;;  %5120 = vpow2.f32 %v4207_v8 }
 0x753   : > { %v5111_v3 = vpop.eup %5110  ;;  %v3262_v56 = vadd.f32 1.0, %v5109_v15 }
 0x754   : > { %v5113_v23 = vpop.eup %5112  ;;  %5122 = vrcp.f32 %v3264_v4  ;;  %v3265_v30 = vadd.f32 1.0, %v5111_v3 }
 0x755   : > { %5124 = vrcp.f32 %v3262_v56  ;;  %v3263_v29 = vadd.f32 1.0, %v5113_v23 }
 0x756   : > { %5126 = vrcp.f32 %v3265_v30 }
 0x757   : > { %5128 = vrcp.f32 %v3263_v29 }
 0x759   : > { %v5115_v62 = vpop.eup %5114 }
 0x75a   : > { %v5117_v54 = vpop.eup %5116  ;;  %v3268_v45 = vadd.f32 1.0, %v5115_v62  ;;  %v4606_v31 = vpop.f32.mrb[40].mxu0 }
 0x75b   : > { %v5119_v17 = vpop.eup %5118  ;;  %v3266_v1 = vadd.f32 1.0, %v5117_v54  ;;  %v6388_v57 = vadd.f32 %v4606_v31, %v6353_v35  ;;  %v3183_v21 = vpop.f32.mrb[41].mxu0 }
 0x75c   : > { %v5121_v14 = vpop.eup %5120  ;;  %5130 = vrcp.f32 %v3268_v45  ;;  %v3269_v42 = vadd.f32 1.0, %v5119_v17  ;;  %v6391_v0 = vadd.f32 %v6353_v35, %v3183_v21  ;;  %v4607_v10 = vpop.f32.mrb[42].mxu0 }
 0x75d   : > { %5132 = vrcp.f32 %v3266_v1  ;;  %v3267_v60 = vadd.f32 1.0, %v5121_v14  ;;  %v4212_v16 = vmul.f32 -1.442695, %v6388_v57  ;;  %v6395_v32 = vadd.f32 %v4607_v10, %v6353_v35  ;;  %v3186_v12 = vpop.f32.mrb[43].mxu0 }
 0x75e   : > { %v5123_v52 = vpop.eup %5122  ;;  %5134 = vrcp.f32 %v3269_v42  ;;  %v4210_v59 = vmul.f32 -1.442695, %v6391_v0  ;;  %v6399_v11 = vadd.f32 %v6353_v35, %v3186_v12 }
 0x75f   : > { %v5125_v18 = vpop.eup %5124  ;;  %v3312_v5 = vmul.f32 %v5123_v52, %v6356_v36  ;;  %5136 = vrcp.f32 %v3267_v60  ;;  %v4213_v51 = vmul.f32 -1.442695, %v6395_v32 }
 0x760   : > { %v5127_v40 = vpop.eup %5126  ;;  %v3310_v50 = vmul.f32 %v5125_v18, %v6359_v55  ;;  %5138 = vpow2.f32 %v4212_v16  ;;  %v4211_v24 = vmul.f32 -1.442695, %v6399_v11 }
 0x761   : > { %v5129_v48 = vpop.eup %5128  ;;  %5140 = vpow2.f32 %v4210_v59  ;;  %v3313_v9 = vmul.f32 %v5127_v40, %v6363_v53  ;;  %v3335_v55 = vmul.f32 %v6406_v44, %v3312_v5 }
 0x762   : > { %v3311_v63 = vmul.f32 %v5129_v48, %v6367_v49  ;;  %5142 = vpow2.f32 %v4213_v51  ;;  %v4610_v36 = vpop.f32.mrb[44].mxu0  ;;  %v3333_v8 = vmul.f32 %v6406_v44, %v3310_v50 }
 0x763   : > { %5144 = vpow2.f32 %v4211_v24  ;;  %v6414_v15 = vadd.f32 %v4610_v36, %v6353_v35  ;;  %v3199_v4 = vpop.f32.mrb[45].mxu0  ;;  %v3356_v21 = vsel %vm3349_vm6, %v3335_v55, 0.0  ;;  %v3336_v14 = vmul.f32 %v6406_v44, %v3313_v9 }
 0x764   : > { %v6418_v3 = vadd.f32 %v6353_v35, %v3199_v4  ;;  %v4611_v56 = vpop.f32.mrb[46].mxu0  ;;  %v3350_v23 = vsel %vm3349_vm6, %v3333_v8, 0.0  ;;  %v3334_v49 = vmul.f32 %v6406_v44, %v3311_v63 }
 0x765   : > { %v4216_v30 = vmul.f32 -1.442695, %v6414_v15  ;;  %v6424_v29 = vadd.f32 %v4611_v56, %v6353_v35  ;;  %v3202_v53 = vpop.f32.mrb[47].mxu0  ;;  %3351 = vadd.xlane.f32.xlu0 %v3350_v23 }
 0x766   : > { %v5131_v62 = vpop.eup %5130  ;;  %v4214_v54 = vmul.f32 -1.442695, %v6418_v3  ;;  %v6428_v45 = vadd.f32 %v6353_v35, %v3202_v53  ;;  %v3353_v31 = vsel %vm3349_vm6, %v3334_v49, 0.0 }
 0x767   : > { %v5133_v17 = vpop.eup %5132  ;;  %5146 = vpow2.f32 %v4216_v30  ;;  %v4217_v1 = vmul.f32 -1.442695, %v6424_v29  ;;  %3354 = vadd.xlane.f32.xlu1 %v3353_v31  ;;  %v3316_v10 = vmul.f32 %v5131_v62, %v6372_v34  ;;  %v3359_v34 = vsel %vm3349_vm6, %v3336_v14, 0.0 }
 0x768   : > { %v5135_v42 = vpop.eup %5134  ;;  %v3314_v60 = vmul.f32 %v5133_v17, %v6375_v27  ;;  %5148 = vpow2.f32 %v4214_v54  ;;  %v4215_v35 = vmul.f32 -1.442695, %v6428_v45 }
 0x769   : > { %v5137_v16 = vpop.eup %5136  ;;  %5150 = vpow2.f32 %v4217_v1  ;;  %3357 = vadd.xlane.f32.xlu0 %v3356_v21  ;;  %v3317_v5 = vmul.f32 %v5135_v42, %v6379_v13  ;;  %v3339_v48 = vmul.f32 %v6406_v44, %v3316_v10 }
 0x76a   : > { %v5139_v12 = vpop.eup %5138  ;;  %v3315_v52 = vmul.f32 %v5137_v16, %v6383_v2  ;;  %5152 = vpow2.f32 %v4215_v35  ;;  %v3337_v59 = vmul.f32 %v6406_v44, %v3314_v60 }
 0x76b   : > { %v5141_v18 = vpop.eup %5140  ;;  %v3272_v51 = vadd.f32 1.0, %v5139_v12  ;;  %v3368_v8 = vsel %vm3349_vm6, %v3339_v48, 0.0  ;;  %v3340_v9 = vmul.f32 %v6406_v44, %v3317_v5 }
 0x76c   : > { %v5143_v40 = vpop.eup %5142  ;;  %v3270_v27 = vadd.f32 1.0, %v5141_v18  ;;  %v3362_v50 = vsel %vm3349_vm6, %v3337_v59, 0.0  ;;  %v3338_v24 = vmul.f32 %v6406_v44, %v3315_v52 }
 0x76d   : > { %v5145_v63 = vpop.eup %5144  ;;  %5154 = vrcp.f32 %v3272_v51  ;;  %v3273_v2 = vadd.f32 1.0, %v5143_v40  ;;  %3360 = vadd.xlane.f32.xlu0 %v3359_v34  ;;  %3363 = vadd.xlane.f32.xlu1 %v3362_v50  ;;  %v3371_v62 = vsel %vm3349_vm6, %v3340_v9, 0.0 }
 0x76e   : > { %5156 = vrcp.f32 %v3270_v27  ;;  %v3271_v36 = vadd.f32 1.0, %v5145_v63  ;;  %v3365_v13 = vsel %vm3349_vm6, %v3338_v24, 0.0 }
 0x76f   : > { %5158 = vrcp.f32 %v3273_v2 }
 0x770   : > { %5160 = vrcp.f32 %v3271_v36  ;;  %v6478_v36 = vld [vmem:[%s803_s9] ss:$0 sm:$0xff] }
 0x771   : > { %v5147_v4 = vpop.eup %5146  ;;  %3366 = vadd.xlane.f32.xlu0 %v3365_v13  ;;  %3369 = vadd.xlane.f32.xlu1 %v3368_v8  ;;  %v6746_v13 = vlaneseq }
 0x772   : > { %v5149_v55 = vpop.eup %5148  ;;  %v3276_v56 = vadd.f32 1.0, %v5147_v4  ;;  %v1833_v4 = vadd.f32 1e-15, %v5858_v26 }
 0x773   : > { %v5151_v23 = vpop.eup %5150  ;;  %v3274_v49 = vadd.f32 1.0, %v5149_v55  ;;  %v3415_v8 = vshrl.u32 %v6746_v13, 7  ;;  %v1834_v55 = vadd.f32 1e-15, %v5854_v22  ;;  %v1840_v22 = vadd.f32 1e-15, %v5914_v20 }
 0x774   : > { %v5153_v30 = vpop.eup %5152  ;;  %5162 = vrcp.f32 %v3276_v56  ;;  %v3277_v53 = vadd.f32 1.0, %v5151_v23  ;;  %v1835_v56 = vadd.f32 1e-15, %v5883_v39  ;;  %v1836_v23 = vadd.f32 1e-15, %v5871_v38 }
 0x775   : > { %5164 = vrcp.f32 %v3274_v49  ;;  %v3275_v54 = vadd.f32 1.0, %v5153_v30  ;;  %3372 = vadd.xlane.f32.xlu0 %v3371_v62  ;;  %v6481_v9 = vadd.s32 8, %v3415_v8  ;;  %vm3421_vm7 = vcmp.eq.s32.totalorder %v3415_v8, %v6478_v36 }
 0x776   : > { %5166 = vrcp.f32 %v3277_v53  ;;  %v1837_v49 = vadd.f32 1e-15, %v5881_v47  ;;  %v1838_v30 = vadd.f32 1e-15, %v5896_v7  ;;  %v1839_v62 = vadd.f32 1e-15, %v5894_v6 }
 0x777   : > { %v5155_v31 = vpop.eup %5154  ;;  %5168 = vrcp.f32 %v3275_v54  ;;  %vm3422_vm8 = vcmp.eq.s32.totalorder %v6481_v9, %v6478_v36  ;;  %v3609_v36 = vld [vmem:[%s6668_s19] sm:$0xff] (!%p4226_p6)  ;;  %v3610_v9 = vld [vmem:[%s6668_s19 + $0x8] sm:$0xff] (!%p4226_p6) }
 0x778   : > { %v5157_v17 = vpop.eup %5156  ;;  %v3320_v21 = vmul.f32 %v5155_v31, %v6388_v57  ;;  %vm4222_vm9 = vmpackc.low %vm3422_vm8, %vm3421_vm7  ;;  %5170 = vrsqrt.f32 %v1833_v4 }
 0x779   : > { %v5159_v1 = vpop.eup %5158  ;;  %v3318_v14 = vmul.f32 %v5157_v17, %v6391_v0  ;;  %4629 = vmatmul.mubr.msk.bf16.vlgmr.msra.gmra.mrb[52].mxu1 %vm4222_vm9, %v5263_v41  ;;  %5172 = vrsqrt.f32 %v1834_v55  ;;  %v6752_v41 = vld [vmem:[#allocation23_spill] sm:$0xff] }
 0x77a   : > { %v5161_v42 = vpop.eup %5160  ;;  %v3321_v10 = vmul.f32 %v5159_v1, %v6395_v32  ;;  %v3343_v52 = vmul.f32 %v6406_v44, %v3320_v21  ;;  %5174 = vrsqrt.f32 %v1835_v56  ;;  %v1847_v4 = vadd.f32 1e-15, %v6752_v41  ;;  %v3429_v41 = vld [vmem:[#allocation4 + $0x8] sm:$0xff] }
 0x77b   : > { %v3319_v60 = vmul.f32 %v5161_v42, %v6399_v11  ;;  %v3341_v35 = vmul.f32 %v6406_v44, %v3318_v14  ;;  %5176 = vrsqrt.f32 %v1836_v23 }
 0x77c   : > { %v3344_v0 = vmul.f32 %v6406_v44, %v3321_v10  ;;  %v3380_v34 = vsel %vm3349_vm6, %v3343_v52, 0.0  ;;  %5178 = vrsqrt.f32 %v1837_v49  ;;  %v1842_v52 = vadd.f32 1e-15, %v5932_v61  ;;  %v6747_v61 = vld [vmem:[#allocation22_spill] sm:$0xff] }
 0x77d   : > { %v3374_v16 = vsel %vm3349_vm6, %v3341_v35, 0.0  ;;  %v3342_v12 = vmul.f32 %v6406_v44, %v3319_v60  ;;  %5180 = vrsqrt.f32 %v1838_v30  ;;  %v6753_v30 = vld [vmem:[#allocation25_spill] sm:$0xff] }
 0x77e   : > { %v5163_v59 = vpop.eup %5162  ;;  %3375 = vadd.xlane.f32.xlu1 %v3374_v16  ;;  %v3383_v24 = vsel %vm3349_vm6, %v3344_v0, 0.0  ;;  %5182 = vrsqrt.f32 %v1839_v62 }
 0x77f   : > { %v5165_v18 = vpop.eup %5164  ;;  %v3377_v57 = vsel %vm3349_vm6, %v3342_v12, 0.0  ;;  %v3324_v51 = vmul.f32 %v5163_v59, %v6414_v15  ;;  %5184 = vrsqrt.f32 %v1840_v22  ;;  %v6754_v22 = vld [vmem:[#allocation14_spill] sm:$0xff] }
 0x780   : > { %v5167_v5 = vpop.eup %5166  ;;  %v3322_v32 = vmul.f32 %v5165_v18, %v6418_v3  ;;  %3378 = vadd.xlane.f32.xlu0 %v3377_v57 }
 0x781   : > { %v5169_v11 = vpop.eup %5168  ;;  %v3325_v50 = vmul.f32 %v5167_v5, %v6424_v29  ;;  %v3347_v63 = vmul.f32 %v6406_v44, %v3324_v51 }
 0x782   : > { %v3323_v40 = vmul.f32 %v5169_v11, %v6428_v45  ;;  %3381 = vadd.xlane.f32.xlu1 %v3380_v34  ;;  %v3345_v27 = vmul.f32 %v6406_v44, %v3322_v32  ;;  %v5171_v53 = vpop.eup %5170 }
 0x783   : > { %v3348_v45 = vmul.f32 %v6406_v44, %v3325_v50  ;;  %v3392_v2 = vsel %vm3349_vm6, %v3347_v63, 0.0  ;;  %v5173_v54 = vpop.eup %5172  ;;  %v1865_v26 = vmul.f32 %v5171_v53, %v5715_v28  ;;  %v1841_v28 = vadd.f32 1e-15, %v5912_v19 }
 0x784   : > { %3384 = vadd.xlane.f32.xlu0 %v3383_v24  ;;  %v3386_v48 = vsel %vm3349_vm6, %v3345_v27, 0.0  ;;  %v3346_v3 = vmul.f32 %v6406_v44, %v3323_v40  ;;  %v5262_v44 = vmov 1.0   ;;  %v1866_v38 = vmul.f32 %v5173_v54, %v5713_v25  ;;  %v5175_v47 = vpop.eup %5174  ;;  %v6748_v27 = vld [vmem:[#allocation12_spill] sm:$0xff]  ;;  %v6749_v24 = vld [vmem:[#allocation21_spill] sm:$0xff] }
 0x785   : > { %v3395_v29 = vsel %vm3349_vm6, %v3348_v45, 0.0  ;;  %4664 = vmatprep.mubr.msk.f32.mxu0 %vm3421_vm7, %v5262_v44  ;;  %v5177_v7 = vpop.eup %5176  ;;  %v1867_v42 = vmul.f32 %v5175_v47, %v5724_v37  ;;  %5186 = vrsqrt.f32 %v1841_v28  ;;  %v1843_v37 = vadd.f32 1e-15, %v5930_v58 }
 0x786   : > { %3387 = vadd.xlane.f32.xlu1 %v3386_v48  ;;  %v3389_v15 = vsel %vm3349_vm6, %v3346_v3, 0.0  ;;  %v5179_v20 = vpop.eup %5178  ;;  %v1868_v35 = vmul.f32 %v5177_v7, %v5721_v33  ;;  %5188 = vrsqrt.f32 %v1842_v52  ;;  %v1844_v40 = vadd.f32 1e-15, %v6747_v61 }
 0x787   : > { %v5181_v25 = vpop.eup %5180  ;;  %v1869_v18 = vmul.f32 %v5179_v20, %v5732_v46  ;;  %5190 = vrsqrt.f32 %v1843_v37  ;;  %v1845_v58 = vadd.f32 1e-15, %v6749_v24  ;;  %v1848_v53 = vadd.f32 1e-15, %v6753_v30  ;;  %v3492_v30 = vld [vmem:[#allocation5 + $0x8] sm:$0xff] }
 0x788   : > { %3390 = vadd.xlane.f32.xlu0 %v3389_v15  ;;  %v5183_v57 = vpop.eup %5182  ;;  %v1870_v33 = vmul.f32 %v5181_v25, %v5729_v43  ;;  %v6750_v43 = vld [vmem:[#allocation11_spill] sm:$0xff]  ;;  %5192 = vrsqrt.f32 %v1844_v40  ;;  %v6760_v40 = vld [vmem:[#allocation20_spill] sm:$0xff] }
 0x789   : > { %v5185_v32 = vpop.eup %5184  ;;  %v1871_v50 = vmul.f32 %v5183_v57, %v6748_v27  ;;  %5194 = vrsqrt.f32 %v1845_v58 }
 0x78a   : > { %3393 = vadd.xlane.f32.xlu1 %v3392_v2  ;;  %v1872_v15 = vmul.f32 %v5185_v32, %v6750_v43 }
 0x78c   : > { %3396 = vadd.xlane.f32.xlu0 %v3395_v29  ;;  %v6751_v29 = vld [vmem:[#allocation24_spill] sm:$0xff] }
 0x78d   : > { %v1846_v13 = vadd.f32 1e-15, %v6751_v29 }
 0x78f   : > { %v5187_v23 = vpop.eup %5186  ;;  %5196 = vrsqrt.f32 %v1846_v13  ;;  %v3428_v13 = vld [vmem:[#allocation4] sm:$0xff] }
 0x790   : > { %v5189_v62 = vpop.eup %5188  ;;  %5198 = vrsqrt.f32 %v1847_v4 }
 0x791   : > { %v5191_v54 = vpop.eup %5190  ;;  %5200 = vrsqrt.f32 %v1848_v53  ;;  %v3491_v53 = vld [vmem:[#allocation5] sm:$0xff] }
 0x7f2   : > { %v3352_v39 = vpop.xlane.xlu0 %3351 }
 0x7f3   : > { %v3398_v31 = vmul.f32 %v3352_v39, %v1865_v26  ;;  %v1873_v26 = vmul.f32 %v5187_v23, %v6754_v22 }
 0x7f4   : > { %v3355_v17 = vpop.xlane.xlu1 %3354 }
 0x7f5   : > { %v3399_v1 = vmul.f32 %v3355_v17, %v1866_v38  ;;  %v3475_v14 = vsel %vm1784_vm4, %v3398_v31, 1.0  ;;  %v6755_v38 = vld [vmem:[#allocation13_spill] sm:$0xff]  ;;  %v5193_v17 = vpop.eup %5192 }
 0x7f6   : > { %v3358_v21 = vpop.xlane.xlu0 %3357  ;;  %v1874_v47 = vmul.f32 %v5189_v62, %v6755_v38 }
 0x7f7   : > { %v3476_v6 = vsel %vm1784_vm4, %v3399_v1, 1.0  ;;  %v3400_v60 = vmul.f32 %v3358_v21, %v1867_v42  ;;  %v6756_v21 = vld [vmem:[#allocation16_spill] sm:$0xff] }
 0x7f8   : > { %v4724_v10 = vpack.c.bf16 %v3476_v6, %v3475_v14  ;;  %v1875_v14 = vmul.f32 %v5191_v54, %v6756_v21  ;;  %v5195_v6 = vpop.eup %5194  ;;  %v3607_v21 = vld [vmem:[%s6667_s18 + $0x10] sm:$0xff] (!%p4226_p6) }
 0x7f9   : > { %v3477_v19 = vsel %vm1784_vm4, %v3400_v60, 1.0  ;;  %v6757_v60 = vld [vmem:[#allocation15_spill] sm:$0xff]  ;;  %v5197_v25 = vpop.eup %5196 }
 0x7fa   : > { %v3361_v16 = vpop.xlane.xlu0 %3360  ;;  %4725 = vmatprep.subr.bf16.mxu0 %v4724_v10  ;;  %v3364_v12 = vpop.xlane.xlu1 %3363 }
 0x7fb   : > { %v3401_v59 = vmul.f32 %v3361_v16, %v1868_v35  ;;  %4727 = vmatpush3.bf16.msra.mxu0 %v4724_v10  ;;  %v3402_v5 = vmul.f32 %v3364_v12, %v1869_v18  ;;  %v1876_v35 = vmul.f32 %v5193_v17, %v6757_v60  ;;  %v5199_v57 = vpop.eup %5198  ;;  %v3605_v17 = vld [vmem:[%s6667_s18] sm:$0xff] (!%p4226_p6)  ;;  %v3799_v60 = vld [vmem:[%s6670_s21 + $0x8] sm:$0xff] (!%p4226_p6) }
 0x7fd   : > { %v3478_v0 = vsel %vm1784_vm4, %v3401_v59, 1.0  ;;  %v3479_v48 = vsel %vm1784_vm4, %v3402_v5, 1.0  ;;  %v6758_v59 = vld [vmem:[#allocation18_spill] sm:$0xff] }
 0x7fe   : > { %v4728_v11 = vpack.c.bf16 %v3478_v0, %v3477_v19  ;;  %v3367_v51 = vpop.xlane.xlu0 %3366  ;;  %v3370_v34 = vpop.xlane.xlu1 %3369  ;;  %v1877_v18 = vmul.f32 %v5195_v6, %v6758_v59 }
 0x7ff   : > { %v3403_v46 = vmul.f32 %v3367_v51, %v1870_v33  ;;  %v3404_v63 = vmul.f32 %v3370_v34, %v1871_v50  ;;  %v6759_v33 = vld [vmem:[#allocation17_spill] sm:$0xff] }
 0x800   : > { %4729 = vmatprep.subr.bf16.mxu0 %v4728_v11  ;;  %v1878_v32 = vmul.f32 %v5197_v25, %v6759_v33  ;;  %v3800_v25 = vld [vmem:[%s6670_s21 + $0x10] sm:$0xff] (!%p4226_p6) }
 0x801   : > { %v3480_v3 = vsel %vm1784_vm4, %v3403_v46, 1.0  ;;  %4731 = vmatpush3.bf16.msra.mxu0 %v4728_v11  ;;  %v3481_v55 = vsel %vm1784_vm4, %v3404_v63, 1.0  ;;  %v5201_v11 = vpop.eup %5200  ;;  %v1879_v46 = vmul.f32 %v5199_v57, %v6760_v40 }
 0x802   : > { %v4732_v45 = vpack.c.bf16 %v3480_v3, %v3479_v48  ;;  %v3373_v2 = vpop.xlane.xlu0 %3372  ;;  %v6761_v48 = vld [vmem:[#allocation19_spill] sm:$0xff] }
 0x803   : > { %v3405_v8 = vmul.f32 %v3373_v2, %v1872_v15  ;;  %v1880_v3 = vmul.f32 %v5201_v11, %v6761_v48 }
 0x804   : > { %4733 = vmatprep.subr.bf16.mxu0 %v4732_v45 }
 0x805   : > { %v3482_v56 = vsel %vm1784_vm4, %v3405_v8, 1.0  ;;  %4735 = vmatpush3.bf16.msra.mxu0 %v4732_v45 }
 0x806   : > { %v4736_v49 = vpack.c.bf16 %v3482_v56, %v3481_v55 }
 0x808   : > { %4737 = vmatprep.subr.bf16.mxu0 %v4736_v49 }
 0x809   : > { %4739 = vmatpush3.bf16.msra.mxu0 %v4736_v49 }
 0x80b   : > { %v3376_v39 = vpop.xlane.xlu1 %3375 }
 0x80c   : > { %v3406_v31 = vmul.f32 %v3376_v39, %v1873_v26  ;;  %v4756_v39 = vpack.c.bf16 (!%p4226_p6), %v3610_v9, %v3609_v36  ;;  %v3579_v36 = vld [vmem:[%s6763_s30] sm:$0xff] (!%p4226_p6) }
 0x80d   : > { %v3379_v1 = vpop.xlane.xlu0 %3378 }
 0x80e   : > { %v3407_v7 = vmul.f32 %v3379_v1, %v1874_v47  ;;  %v3483_v20 = vsel %vm1784_vm4, %v3406_v31, 1.0  ;;  %v3612_v31 = vld [vmem:[%s6668_s19 + $0x18] sm:$0xff] (!%p4226_p6)  ;;  %v3606_v1 = vld [vmem:[%s6667_s18 + $0x8] sm:$0xff] (!%p4226_p6) }
 0x80f   : > { %v3382_v42 = vpop.xlane.xlu1 %3381 }
 0x810   : > { %v3484_v28 = vsel %vm1784_vm4, %v3407_v7, 1.0  ;;  %v3408_v10 = vmul.f32 %v3382_v42, %v1875_v14  ;;  %v4764_v7 = vpack.c.bf16 (!%p4226_p6), %v3606_v1, %v3605_v17  ;;  %v3608_v14 = vld [vmem:[%s6667_s18 + $0x18] sm:$0xff] (!%p4226_p6) }
 0x811   : > { %v4740_v16 = vpack.c.bf16 %v3484_v28, %v3483_v20  ;;  %v3385_v12 = vpop.xlane.xlu0 %3384  ;;  %v4768_v42 = vpack.c.bf16 (!%p4226_p6), %v3608_v14, %v3607_v21  ;;  %v3601_v20 = vld [vmem:[%s6762_s0] sm:$0xff] (!%p4226_p6)  ;;  %v3602_v28 = vld [vmem:[%s6762_s0 + $0x8] sm:$0xff] (!%p4226_p6) }
 0x812   : > { %v3409_v52 = vmul.f32 %v3385_v12, %v1876_v35  ;;  %v3485_v19 = vsel %vm1784_vm4, %v3408_v10, 1.0  ;;  %v3798_v10 = vld [vmem:[%s6670_s21] sm:$0xff] (!%p4226_p6) }
 0x813   : > { %v3388_v37 = vpop.xlane.xlu1 %3387  ;;  %4741 = vmatprep.subr.bf16.mxu0 %v4740_v16  ;;  %v4772_v35 = vpack.c.bf16 (!%p4226_p6), %v3799_v60, %v3798_v10  ;;  %v4237_v21 = vld [vmem:[%s6764_s27] ss:$0 sm:$0xff] (!%p4226_p6) }
 0x814   : > { %v3486_v0 = vsel %vm1784_vm4, %v3409_v52, 1.0  ;;  %v3410_v5 = vmul.f32 %v3388_v37, %v1877_v18  ;;  %4743 = vmatpush3.bf16.msra.mxu0 %v4740_v16  ;;  %v3801_v16 = vld [vmem:[%s6670_s21 + $0x18] sm:$0xff] (!%p4226_p6)  ;;  %v4231_v52 = vld [vmem:[%s6669_s20] ss:$0 sm:$0xff] (!%p4226_p6) }
 0x815   : > { %v4744_v51 = vpack.c.bf16 %v3486_v0, %v3485_v19  ;;  %v3391_v34 = vpop.xlane.xlu0 %3390  ;;  %4773 = vmatprep.subr.bf16.mxu1 (!%p4226_p6), %v4772_v35  ;;  %v4776_v12 = vpack.c.bf16 (!%p4226_p6), %v3801_v16, %v3800_v25 }
 0x816   : > { %v3411_v61 = vmul.f32 %v3391_v34, %v1878_v32  ;;  %v3487_v50 = vsel %vm1784_vm4, %v3410_v5, 1.0  ;;  %4775 = vmatpush3.bf16.msra.mxu1 (!%p4226_p6), %v4772_v35  ;;  %v3580_v35 = vld [vmem:[%s6763_s30 + $0x8] sm:$0xff] (!%p4226_p6) }
 0x817   : > { %v3394_v27 = vpop.xlane.xlu1 %3393  ;;  %4745 = vmatprep.subr.bf16.mxu0 %v4744_v51  ;;  %4777 = vmatprep.subr.bf16.mxu1 (!%p4226_p6), %v4776_v12 }
 0x818   : > { %v3488_v24 = vsel %vm1784_vm4, %v3411_v61, 1.0  ;;  %v3412_v58 = vmul.f32 %v3394_v27, %v1879_v46  ;;  %4747 = vmatpush3.bf16.msra.mxu0 %v4744_v51  ;;  %v4234_v46 = vld [vmem:[%s6671_s22] ss:$0 sm:$0xff] (!%p4226_p6) }
 0x819   : > { %v4748_v63 = vpack.c.bf16 %v3488_v24, %v3487_v50  ;;  %v3397_v43 = vpop.xlane.xlu0 %3396 }
 0x81a   : > { %v3413_v15 = vmul.f32 %v3397_v43, %v1880_v3  ;;  %v3489_v45 = vsel %vm1784_vm4, %v3412_v58, 1.0  ;;  %4779 = vmatpush3.bf16.msra.mxu1 (!%p4226_p6), %v4776_v12 }
 0x81b   : > { %4749 = vmatprep.subr.bf16.mxu0 %v4748_v63 }
 0x81c   : > { %v3490_v2 = vsel %vm1784_vm4, %v3413_v15, 1.0  ;;  %4751 = vmatpush3.bf16.msra.mxu0 %v4748_v63  ;;  %v5264_v15 = vmov (!%p4226_p6), 3  }
 0x81d   : > { %v4752_v29 = vpack.c.bf16 %v3490_v2, %v3489_v45  ;;  %5203 = vset.pattern.permute.xlu1 (!%p4226_p6), %v5264_v15  ;;  %5202 = vset.pattern.permute.xlu0 (!%p4226_p6), %v5264_v15 }
 0x81f   : > { %4753 = vmatprep.subr.bf16.mxu0 %v4752_v29 }
 0x820   : > { %4755 = vmatpush3.bf16.msra.mxu0 %v4752_v29 }
 0x821   : > { %4757 = vmatprep.subr.bf16.mxu0 (!%p4226_p6), %v4756_v39 }
 0x823   : > { %4665 = vmatmul.mubr.msk.f32.vlgmr.msra.gmra.mrb[48].mxu0 %vm3422_vm8, %v5262_v44  ;;  %v3611_v44 = vld [vmem:[%s6668_s19 + $0x10] sm:$0xff] (!%p4226_p6) }
 0x824   : > { %v4760_v47 = vpack.c.bf16 (!%p4226_p6), %v3612_v31, %v3611_v44  ;;  %4759 = vmatpush3.bf16.msra.mxu0 (!%p4226_p6), %v4756_v39 }
 0x826   : > { %4761 = vmatprep.subr.bf16.mxu0 (!%p4226_p6), %v4760_v47 }
 0x828   : > { %4763 = vmatpush3.bf16.msra.mxu0 (!%p4226_p6), %v4760_v47 }
 0x829   : > { %4765 = vmatprep.subr.bf16.mxu0 (!%p4226_p6), %v4764_v7 }
 0x84c   : > { %v3464_v8 = vpop.f32.mrb[52].mxu1 }
 0x84d   : > { %v3471_v4 = vadd.f32 %v3464_v8, %v3428_v13  ;;  %v4630_v55 = vpop.f32.mrb[53].mxu1 }
 0x84e   : > { %v3467_v56 = vpop.f32.mrb[54].mxu1 }
 0x84f   : > { %3473 = vst [vmem:[#allocation4] sm:$0xff] %v3471_v4  ;;  %v3472_v23 = vadd.f32 %v3467_v56, %v3429_v41  ;;  %v4631_v49 = vpop.f32.mrb[55].mxu1 }
 0x851   : > { %3474 = vst [vmem:[#allocation4 + $0x8] sm:$0xff] %v3472_v23 }
 0x856   : > { %v3603_v38 = vld [vmem:[#allocation4] sm:$0xff] (!%p4226_p6) }
 0x857   : > { %4675 = vmatprep.mubr.msk.f32.mxu0 (!%p4226_p6), %vm3349_vm6, %v3603_v38 }
 0x858   : > { %v3604_v6 = vld [vmem:[#allocation4 + $0x8] sm:$0xff] (!%p4226_p6) }
 0x859   : > { %4676 = vmatmul.mubr.msk.f32.vlgmr.msra.gmra.mrb[0].mxu0 (!%p4226_p6), %vm3349_vm6, %v3604_v6  ;;  %v4238_v6 = vld [vmem:[%s6765_s6] ss:$0 sm:$0xff] (!%p4226_p6) }
 0x85a   : > { %4767 = vmatpush3.bf16.msra.mxu0 (!%p4226_p6), %v4764_v7  ;;  %4686 = vmatprep.mubr.msk.f32.mxu0 (!%p4226_p6), %vm3349_vm6, %v3601_v20 }
 0x85b   : > { %4769 = vmatprep.subr.bf16.mxu0 (!%p4226_p6), %v4768_v42 }
 0x85e   : > { %4771 = vmatpush3.bf16.msra.mxu0 (!%p4226_p6), %v4768_v42 }
 0x861   : > { %4687 = vmatmul.mubr.msk.f32.vlgmr.msra.gmra.mrb[0].mxu0 (!%p4226_p6), %vm3349_vm6, %v3602_v28 }
 0x8f4   : > { %3576 = sbr.rel (%p4226_p6) target bundleno = 2928 (0xb70), region = 128 }
 0x8f6   : > { %v4666_v62 = vpop.f32.mrb[48].mxu0 }
 0x8f7   : > { %v3569_v54 = vadd.f32 %v4666_v62, %v3492_v30  ;;  %v3559_v22 = vpop.f32.mrb[49].mxu0 }
 0x8f8   : > { %v3568_v26 = vadd.f32 %v3559_v22, %v3491_v53 }
 0x8f9   : > { %3572 = vst.msk [vmem:[#allocation5 + $0x8] sm:$0xff] %vm3570_vm10, %v3569_v54 }
 0x8fa   : > { %3571 = vst.msk [vmem:[#allocation5] sm:$0xff] %vm3570_vm10, %v3568_v26 }
 0x900   : > { %v3578_v53 = vld [vmem:[#allocation5 + $0x8] sm:$0xff] }
 0x901   : > { %v3577_v45 = vld [vmem:[#allocation5] sm:$0xff]  ;;  %v3582_v62 = vmax.f32 %v3578_v53, 1.0 }
 0x902   : > { %v3581_v2 = vmax.f32 %v3577_v45, 1.0 }
 0x934   : > { %v4688_v59 = vpop.f32.mrb[0].mxu0 }
 0x935   : > { %v3783_v18 = vadd.f32 %v4688_v59, %v4231_v52  ;;  %v3766_v57 = vpop.f32.mrb[1].mxu0 }
 0x936   : > { %v3782_v37 = vadd.f32 %v4231_v52, %v3766_v57 }
 0x937   : > { %v4233_v19 = vmul.f32 -1.442695, %v3783_v18 }
 0x938   : > { %v4232_v0 = vmul.f32 -1.442695, %v3782_v37 }
 0x939   : > { %5204 = vpow2.f32 %v4233_v19 }
 0x93a   : > { %5206 = vpow2.f32 %v4232_v0 }
 0x943   : > { %v5205_v5 = vpop.eup %5204 }
 0x944   : > { %v5207_v33 = vpop.eup %5206  ;;  %v3791_v32 = vadd.f32 1.0, %v5205_v5 }
 0x945   : > { %v3790_v11 = vadd.f32 1.0, %v5207_v33 }
 0x946   : > { %5208 = vrcp.f32 %v3791_v32 }
 0x947   : > { %5210 = vrcp.f32 %v3790_v11 }
 0x950   : > { %v5209_v51 = vpop.eup %5208 }
 0x951   : > { %v5211_v34 = vpop.eup %5210  ;;  %v3797_v40 = vmul.f32 %v5209_v51, %v3783_v18 }
 0x952   : > { %v3796_v61 = vmul.f32 %v5211_v34, %v3782_v37 }
 0x954   : > { %4697 = vmatprep.mubr.msk.f32.mxu1 %vm3349_vm6, %v3796_v61 }
 0x955   : > { %4698 = vmatmul.mubr.msk.f32.vlgmr.msra.gmra.mrb[0].mxu1 %vm3349_vm6, %v3797_v40 }
 0xa28   : > { %v4699_v27 = vpop.f32.mrb[0].mxu1 }
 0xa29   : > { %v3881_v50 = vpop.f32.mrb[1].mxu1  ;;  %v3887_v24 = vadd.f32 %v4699_v27, %v4234_v46 }
 0xa2a   : > { %v3882_v58 = vadd.f32 %v4234_v46, %v3881_v50 }
 0xa2b   : > { %v3891_v63 = vadd.f32 %v3887_v24, %v3602_v28 }
 0xa2c   : > { %v3890_v48 = vadd.f32 %v3882_v58, %v3601_v20 }
 0xa2d   : > { %v3895_v43 = vsel %vm3349_vm6, %v3891_v63, 0.0 }
 0xa2e   : > { %v3892_v3 = vsel %vm3349_vm6, %v3890_v48, 0.0 }
 0xa2f   : > { %3893 = vadd.xlane.f32.xlu0 %v3892_v3 }
 0xa33   : > { %3896 = vadd.xlane.f32.xlu0 %v3895_v43 }
 0xa49   : > { %3585 = vperm.xlu0 %5202, %v3581_v2  }
 0xabc   : > { %v3894_v29 = vpop.xlane.xlu0 %3893 }
 0xabd   : > { %v3899_v13 = vmul.f32 0.03125, %v3894_v29 }
 0xabf   : > { %v3901_v4 = vsub.f32 %v3890_v48, %v3899_v13 }
 0xac0   : > { %v3897_v8 = vpop.xlane.xlu0 %3896 }
 0xac1   : > { %v3900_v41 = vmul.f32 0.03125, %v3897_v8  ;;  %v3903_v49 = vmul.f32 %v3901_v4, %v3901_v4 }
 0xac3   : > { %v3902_v55 = vsub.f32 %v3891_v63, %v3900_v41  ;;  %v3905_v30 = vsel %vm3349_vm6, %v3903_v49, 0.0 }
 0xac5   : > { %v3904_v56 = vmul.f32 %v3902_v55, %v3902_v55 }
 0xac7   : > { %v3908_v23 = vsel %vm3349_vm6, %v3904_v56, 0.0 }
 0xac8   : > { %3909 = vadd.xlane.f32.xlu1 %v3908_v23  ;;  %v3586_v54 = vpop.permute.xlu0 %3585 }
 0xac9   : > { %5212 = vrcp.f32 %v3586_v54 }
 0xacc   : > { %3906 = vadd.xlane.f32.xlu1 %v3905_v30 }
 0xad3   : > { %v5213_v22 = vpop.eup %5212 }
 0xad4   : > { %v3594_v26 = vmul.f32 %v5213_v22, %v3577_v45 }
 0xad6   : > { %v3597_v9 = vadd.f32 %v3594_v26, %v3579_v36 }
 0xad8   : > { %3599 = vst.msk [vmem:[%s6675_s26] sm:$0xff] %vm1784_vm4, %v3597_v9 }
 0xadd   : > { %3590 = vperm.xlu1 %5203, %v3582_v62  }
 0xb55   : > { %v3910_v44 = vpop.xlane.xlu1 %3909 }
 0xb56   : > { %v3912_v39 = vmul.f32 0.03125, %v3910_v44 }
 0xb58   : > { %v3914_v31 = vadd.f32 1e-05, %v3912_v39 }
 0xb59   : > { %v3907_v38 = vpop.xlane.xlu1 %3906 }
 0xb5a   : > { %5214 = vrsqrt.f32 %v3914_v31  ;;  %v3911_v47 = vmul.f32 0.03125, %v3907_v38 }
 0xb5c   : > { %v3913_v17 = vadd.f32 1e-05, %v3911_v47 }
 0xb5d   : > { %v3591_v1 = vpop.permute.xlu1 %3590 }
 0xb5e   : > { %5216 = vrsqrt.f32 %v3913_v17 }
 0xb5f   : > { %5218 = vrcp.f32 %v3591_v1 }
 0xb64   : > { %v5215_v7 = vpop.eup %5214 }
 0xb65   : > { %v3918_v14 = vmul.f32 %v5215_v7, %v3902_v55 }
 0xb67   : > { %v3927_v42 = vmul.f32 %v4237_v21, %v3918_v14 }
 0xb68   : > { %v5217_v20 = vpop.eup %5216 }
 0xb69   : > { %v5219_v28 = vpop.eup %5218  ;;  %v3936_v10 = vadd.f32 %v4238_v6, %v3927_v42  ;;  %v3917_v60 = vmul.f32 %v5217_v20, %v3901_v4 }
 0xb6a   : > { %v3596_v25 = vmul.f32 %v5219_v28, %v3578_v53 }
 0xb6b   : > { %3938 = vst.msk [vmem:[#allocation7 + $0x8] sm:$0xff] %vm3349_vm6, %v3936_v10  ;;  %v3926_v16 = vmul.f32 %v4237_v21, %v3917_v60 }
 0xb6c   : > { %v3598_v12 = vadd.f32 %v3596_v25, %v3580_v35 }
 0xb6d   : > { %v3935_v52 = vadd.f32 %v4238_v6, %v3926_v16 }
 0xb6e   : > { %3600 = vst.msk [vmem:[%s6675_s26 + $0x8] sm:$0xff] %vm1784_vm4, %v3598_v12 }
 0xb6f   : > { %3937 = vst.msk [vmem:[#allocation7] sm:$0xff] %vm3349_vm6, %v3935_v52 }
 0xb70 PF: > { %p4804_p7 = scmp.eq.s32.totalorder %s5412_s28, 1  ;;  %s5265_s0 = smov [#allocation7]  }
 0xb71   : > { %s3945_s5 = sshll.u32 %s5265_s0, 4  ;;  %s3946_s5 = int_to_ptr.vmem [resolvable:$true] %s3945_s5 }
 0xb72   : > { %s5220_s30 = scalar_lea.vmem %s3946_s5, 256  ;;  %p5227_p11 = scmp.lt.s32.totalorder %s3946_s5, %s3946_s5 }
 0xb73   : > { %p5221_p8 = scmp.ne.s32.totalorder %s3946_s5, %s5220_s30  ;;  %p5228_p12 = scmp.lt.s32.totalorder %s5220_s30, %s5220_s30 }
 0xb75   : > { %p5222_p9 = pnand %p5221_p8, %p4804_p7  ;;  %p5229_p13 = por %p5228_p12, %p5227_p11 }
 0xb77   : > { %p5223_p10 = pneg %p5222_p9 }
 0xb79   : > { %p5230_p0 = pnand %p5229_p13, %p5223_p10 }
 0xb7b   : > { %5233 = shalt.err (!%p5230_p0)
}
 0xb7c   : > { %s6766_s24 = sld [smem:[#allocation39_spill]] }
 0xb82   : > { %s5234_s25 = scalar_lea.hbm %s6766_s24, 256 }
 0xb83   : > { %p5235_p1 = scmp.ne.s32.totalorder %s6766_s24, %s5234_s25  ;;  %p5240_p4 = scmp.lt.u32.totalorder %s5234_s25, %s6766_s24 }
 0xb85   : > { %p5236_p2 = pnand %p5235_p1, %p4804_p7 }
 0xb87   : > { %p5237_p3 = pneg %p5236_p2 }
 0xb89   : > { %p5242_p5 = pnand %p5240_p4, %p5237_p3 }
 0xb8b   : > { %5245 = shalt.err (!%p5242_p5)
}
 0xb8c   : > { %s5266_s29 = smov 128   ;;  %s5267_s8 = smov 8  }
 0xb8d   : > { %4801 = dma.vmem_to_hbm [thread:$0]  (%p4804_p7), %s3946_s5, 256, %s6766_s24, [#allocation8], %s5266_s29, %s5266_s29, %s5267_s8  }
 0xb8e   : > { %5251 = dma.done.wait (%p4804_p7), [#allocation8], 256  }
 0xb8f   : > { %5253 = vsyncadd (%p4804_p7), [#allocation8], 4294967040 }
 0xb90 PF: > { %s6767_s0 = sld [smem:[#allocation10_spill]] }
 0xb96   : > { %s40_s7 = sadd.s32 1, %s6767_s0  }
 0xb97   : > { %p37_p6 = scmp.ge.s32.totalorder %s40_s7, 4  }
 0xb99   :  { %39 = sbr.rel (!%p37_p6) target bundleno = 16 (0x10), region = 169 }
 0xba0   :  { %3967 = vsyncpa [#allocation8], 1 }
 0xba1   :  { %3969 = vsyncpa [#allocation8 + $0x1], 1 }

</bundles_post_ra>
